<compile_context>
chip_gen: v6e
topology: v6e:2x2x1
jax: 0.10.0
libtpu: 0.0.40
codegen_flags: <defaults>
</compile_context>

<pallas_src>
import functools

import jax
import jax.numpy as jnp
import numpy as np
from jax.experimental import pallas as pl
from jax.experimental.pallas import tpu as pltpu


# ----------------------------------------------------------------------------
# Fused Pallas kernel: 2-layer LSTM recurrence (wavefront) + fc1 + fc2
# ----------------------------------------------------------------------------
def _fused_lstm2_kernel(x_ref, wih1_ref, whh1_ref, bl1_ref,
                        wih2_ref, whh2_ref, bl2_ref,
                        w1t_ref, fb1_ref, w2t_ref, fb2_ref,
                        out_ref, gx1_ref, *, T, Bp, Hp):
    """Refs:
    x_ref   : (T*Bp, Ip)  bf16  time-major rows (t major, padded batch minor)
    wih1    : (Ip, 4Hp)   bf16  layer-1 input weights (gate order i,f,o,g)
    whh1    : (Hp, 4Hp)   bf16
    bl1     : (1, 4Hp)    f32   b_ih + b_hh, layer 1
    wih2    : (Hp, 4Hp)   bf16  layer-2 input weights
    whh2    : (Hp, 4Hp)   bf16
    bl2     : (1, 4Hp)    f32
    w1t     : (Hp, 256)   bf16 ;  fb1: (1, 256) f32
    w2t     : (256, Cp)   bf16 ;  fb2: (1, Cp)  f32
    out     : (Bp, Cp)    f32
    gx1_ref : (T*Bp, 4Hp) f32   VMEM scratch (hoisted layer-1 input projection)
    """
    H3 = 3 * Hp
    bf16 = jnp.bfloat16

    # Hoisted layer-1 input projection: one big-M bf16 matmul, parked in VMEM
    # so the unrolled recurrence reads aligned (Bp, 4Hp) tiles per step instead
    # of holding the whole (T*Bp, 4Hp) value in vregs.
    gx1_ref[...] = (jnp.dot(x_ref[...], wih1_ref[...],
                            preferred_element_type=jnp.float32)
                    + bl1_ref[...])

    whh1 = whh1_ref[...]
    wih2 = wih2_ref[...]
    whh2 = whh2_ref[...]
    # Hoist the layer-2 bias broadcast out of the loop (no CSE for broadcasts).
    bias2 = jnp.broadcast_to(bl2_ref[...], (Bp, 4 * Hp))

    def gate_step(pre, c):
        # Gate layout (i, f, o, g): one wide sigmoid + one tanh per step.
        # sigmoid(x) = 0.5*tanh(0.5*x) + 0.5 : single EUP push + cheap VPU ops.
        s = 0.5 * jnp.tanh(0.5 * pre[:, :H3]) + 0.5
        i_g = s[:, 0 * Hp:1 * Hp]
        f_g = s[:, 1 * Hp:2 * Hp]
        o_g = s[:, 2 * Hp:3 * Hp]
        g_g = jnp.tanh(pre[:, H3:])
        c_new = f_g * c + i_g * g_g
        h_new = o_g * jnp.tanh(c_new)
        return h_new, c_new

    h1 = jnp.zeros((Bp, Hp), jnp.float32)
    c1 = jnp.zeros((Bp, Hp), jnp.float32)
    h2 = jnp.zeros((Bp, Hp), jnp.float32)
    c2 = jnp.zeros((Bp, Hp), jnp.float32)

    for t in range(T):          # fully unrolled: straight-line for the scheduler
        # ---- layer 1, step t ----
        pre1 = gx1_ref[pl.ds(t * Bp, Bp), :] + jnp.dot(
            h1.astype(bf16), whh1, preferred_element_type=jnp.float32)
        h1, c1 = gate_step(pre1, c1)

        # ---- layer 2, step t (wavefront) ----
        # The h2@whh2 term depends only on h2_{t-1}: the scheduler overlaps it
        # with the layer-1 step above; only h1@wih2 waits on the fresh h1_t.
        pre2 = (bias2
                + jnp.dot(h2.astype(bf16), whh2, preferred_element_type=jnp.float32)
                + jnp.dot(h1.astype(bf16), wih2, preferred_element_type=jnp.float32))
        h2, c2 = gate_step(pre2, c2)

    # Head: fc2(fc1(h2_T)) on the already-resident final hidden state.
    y1 = jnp.dot(h2.astype(bf16), w1t_ref[...],
                 preferred_element_type=jnp.float32) + fb1_ref[...]
    y2 = jnp.dot(y1.astype(bf16), w2t_ref[...],
                 preferred_element_type=jnp.float32) + fb2_ref[...]
    out_ref[...] = y2           # (Bp, Cp): lane-dense full-tile, unmasked store


# ----------------------------------------------------------------------------
# Wrapper
# ----------------------------------------------------------------------------
def lstm_forward(x, kp, *, num_classes):
    """x: (B, T, I) batch_first, like the PyTorch module. Returns (B, C) logits."""
    B, T, I = x.shape
    Ip = kp["wih1"].shape[0]
    Hp = kp["whh1"].shape[0]
    Cp = kp["w2t"].shape[1]
    Bp = ((B + 7) // 8) * 8          # pad batch to a full sublane tile

    # Time-major + zero-pad batch/feature dims (tiny; fused by XLA, zero rows
    # keep padded batch lanes finite). Cast to bf16 for the MXU.
    x_tm = jnp.transpose(x, (1, 0, 2))                        # (T, B, I)
    x_tm = jnp.pad(x_tm, ((0, 0), (0, Bp - B), (0, Ip - I)))  # (T, Bp, Ip)
    x_tm = x_tm.reshape(T * Bp, Ip).astype(jnp.bfloat16)

    kernel = functools.partial(_fused_lstm2_kernel, T=T, Bp=Bp, Hp=Hp)
    out = pl.pallas_call(
        kernel,
        out_shape=jax.ShapeDtypeStruct((Bp, Cp), jnp.float32),
        scratch_shapes=[pltpu.VMEM((T * Bp, 4 * Hp), jnp.float32)],
    )(x_tm, kp["wih1"], kp["whh1"], kp["bl1"],
      kp["wih2"], kp["whh2"], kp["bl2"],
      kp["w1t"], kp["b1"], kp["w2t"], kp["b2"])
    return out[:B, :num_classes]


# ----------------------------------------------------------------------------
# Parameters: PyTorch-style raw params + kernel-layout preparation
# ----------------------------------------------------------------------------
def init_raw_params(key, input_size, hidden_size, num_classes, num_layers):
    """PyTorch-layout params, uniform(-1/sqrt(fan), 1/sqrt(fan))."""
    H = hidden_size
    k = 1.0 / np.sqrt(H)
    raw = {"lstm": []}
    for layer in range(num_layers):
        in_sz = input_size if layer == 0 else H
        key, k1, k2, k3, k4 = jax.random.split(key, 5)
        w_ih = jax.random.uniform(k1, (4 * H, in_sz), jnp.float32, -k, k)
        w_hh = jax.random.uniform(k2, (4 * H, H), jnp.float32, -k, k)
        b_ih = jax.random.uniform(k3, (4 * H,), jnp.float32, -k, k)
        b_hh = jax.random.uniform(k4, (4 * H,), jnp.float32, -k, k)
        raw["lstm"].append((w_ih, w_hh, b_ih, b_hh))
    key, k1, k2, k3, k4 = jax.random.split(key, 5)
    kf1 = 1.0 / np.sqrt(H)
    kf2 = 1.0 / np.sqrt(256)
    raw["fc1_w"] = jax.random.uniform(k1, (256, H), jnp.float32, -kf1, kf1)
    raw["fc1_b"] = jax.random.uniform(k2, (256,), jnp.float32, -kf1, kf1)
    raw["fc2_w"] = jax.random.uniform(k3, (num_classes, 256), jnp.float32, -kf2, kf2)
    raw["fc2_b"] = jax.random.uniform(k4, (num_classes,), jnp.float32, -kf2, kf2)
    return raw


_IFOG = np.array([0, 1, 3, 2])   # PyTorch gate order (i,f,g,o) -> kernel (i,f,o,g)


def _prep_lstm_weight(w, H, Hp, pad_rows_to=None):
    """(4H, in) PyTorch weight -> (in[->padded], 4Hp) bf16, gate order i,f,o,g."""
    in_dim = w.shape[1]
    w4 = w.reshape(4, H, in_dim)[_IFOG]                   # reorder gate blocks
    wt = jnp.transpose(w4, (2, 0, 1))                     # (in, 4, H)
    wt = jnp.pad(wt, ((0, 0), (0, 0), (0, Hp - H)))       # each gate -> Hp lanes
    wt = wt.reshape(in_dim, 4 * Hp)
    if pad_rows_to is not None and pad_rows_to > in_dim:
        wt = jnp.pad(wt, ((0, pad_rows_to - in_dim), (0, 0)))
    return wt.astype(jnp.bfloat16)


def _prep_lstm_bias(b_ih, b_hh, H, Hp):
    b = (b_ih + b_hh).reshape(4, H)[_IFOG]
    b = jnp.pad(b, ((0, 0), (0, Hp - H)))
    return b.reshape(1, 4 * Hp).astype(jnp.float32)


def prepare_kernel_params(raw, input_size, hidden_size):
    """Reorder / transpose / zero-pad / bf16-cast into the kernel's layout."""
    assert len(raw["lstm"]) == 2, "fused kernel is specialized for num_layers=2"
    H = hidden_size
    Hp = ((H + 127) // 128) * 128
    Ip = ((input_size + 127) // 128) * 128
    C = raw["fc2_w"].shape[0]
    Cp = ((C + 127) // 128) * 128

    (w_ih1, w_hh1, b_ih1, b_hh1), (w_ih2, w_hh2, b_ih2, b_hh2) = raw["lstm"]
    return {
        "wih1": _prep_lstm_weight(w_ih1, H, Hp, pad_rows_to=Ip),   # (Ip, 4Hp)
        "whh1": _prep_lstm_weight(w_hh1, H, Hp, pad_rows_to=Hp),   # (Hp, 4Hp)
        "bl1": _prep_lstm_bias(b_ih1, b_hh1, H, Hp),               # (1, 4Hp)
        "wih2": _prep_lstm_weight(w_ih2, H, Hp, pad_rows_to=Hp),   # (Hp, 4Hp)
        "whh2": _prep_lstm_weight(w_hh2, H, Hp, pad_rows_to=Hp),   # (Hp, 4Hp)
        "bl2": _prep_lstm_bias(b_ih2, b_hh2, H, Hp),               # (1, 4Hp)
        "w1t": jnp.pad(raw["fc1_w"].T, ((0, Hp - H), (0, 0))).astype(jnp.bfloat16),
        "b1": raw["fc1_b"].reshape(1, -1).astype(jnp.float32),
        "w2t": jnp.pad(raw["fc2_w"].T, ((0, 0), (0, Cp - C))).astype(jnp.bfloat16),
        "b2": jnp.pad(raw["fc2_b"], (0, Cp - C)).reshape(1, Cp).astype(jnp.float32),
    }


# ----------------------------------------------------------------------------
# Pure-JAX reference (unpadded f32, PyTorch semantics) for correctness check
# ----------------------------------------------------------------------------
def ref_model(x, raw, H):
    out = x
    for (w_ih, w_hh, b_ih, b_hh) in raw["lstm"]:
        B, T, _ = out.shape
        h = jnp.zeros((B, H), jnp.float32)
        c = jnp.zeros((B, H), jnp.float32)
        wih_t, whh_t, b = w_ih.T, w_hh.T, (b_ih + b_hh)[None, :]
        ys = []
        for t in range(T):
            gates = out[:, t] @ wih_t + h @ whh_t + b
            i_g = jax.nn.sigmoid(gates[:, 0 * H:1 * H])
            f_g = jax.nn.sigmoid(gates[:, 1 * H:2 * H])
            g_g = jnp.tanh(gates[:, 2 * H:3 * H])
            o_g = jax.nn.sigmoid(gates[:, 3 * H:4 * H])
            c = f_g * c + i_g * g_g
            h = o_g * jnp.tanh(c)
            ys.append(h)
        out = jnp.stack(ys, axis=1)
    h_last = out[:, -1, :]
    return (h_last @ raw["fc1_w"].T + raw["fc1_b"]) @ raw["fc2_w"].T + raw["fc2_b"]


# ----------------------------------------------------------------------------
if __name__ == "__main__":
    batch, seq_len, input_size, hidden_size = 2, 8, 16, 32
    num_classes, num_layers = 2, 2

    key = jax.random.PRNGKey(0)
    key, xk = jax.random.split(key)
    x = jax.random.normal(xk, (batch, seq_len, input_size), jnp.float32)

    raw = init_raw_params(key, input_size, hidden_size, num_classes, num_layers)
    kparams = prepare_kernel_params(raw, input_size, hidden_size)

    run = jax.jit(functools.partial(lstm_forward, num_classes=num_classes))
    logits = jax.block_until_ready(run(x, kparams))

    expected = ref_model(x, raw, hidden_size)
    # bf16 MXU operands (f32 accumulation) => looser tolerance vs. pure-f32 ref.
    np.testing.assert_allclose(np.asarray(logits), np.asarray(expected),
                               rtol=2e-2, atol=2e-2)
    assert logits.shape == (batch, num_classes)
    print("KERNEL_OK")
</pallas_src>

<mosaic_0001>
module attributes {stable_mosaic.version = 11 : i64} {
  func.func @_fused_lstm2_kernel(%arg0: memref<64x128xbf16, #tpu.memory_space<vmem>>, %arg1: memref<128x512xbf16, #tpu.memory_space<vmem>>, %arg2: memref<128x512xbf16, #tpu.memory_space<vmem>>, %arg3: memref<1x512xf32, #tpu.memory_space<vmem>>, %arg4: memref<128x512xbf16, #tpu.memory_space<vmem>>, %arg5: memref<128x512xbf16, #tpu.memory_space<vmem>>, %arg6: memref<1x512xf32, #tpu.memory_space<vmem>>, %arg7: memref<128x256xbf16, #tpu.memory_space<vmem>>, %arg8: memref<1x256xf32, #tpu.memory_space<vmem>>, %arg9: memref<256x128xbf16, #tpu.memory_space<vmem>>, %arg10: memref<1x128xf32, #tpu.memory_space<vmem>>, %arg11: memref<8x128xf32, #tpu.memory_space<vmem>>, %arg12: memref<64x512xf32, #tpu.memory_space<vmem>>) attributes {dimension_semantics = [], scalar_prefetch = 0 : i64, scratch_operands = 1 : i64, tpu.core_type = #tpu.core_type<tc>} {
    %c0 = arith.constant 0 : index
    %c0_0 = arith.constant 0 : index
    %0 = vector.load %arg0[%c0, %c0_0] : memref<64x128xbf16, #tpu.memory_space<vmem>>, vector<64x128xbf16>
    %c0_1 = arith.constant 0 : index
    %c0_2 = arith.constant 0 : index
    %1 = vector.load %arg1[%c0_1, %c0_2] : memref<128x512xbf16, #tpu.memory_space<vmem>>, vector<128x512xbf16>
    %cst = arith.constant dense<0.000000e+00> : vector<64x512xf32>
    %2 = tpu.matmul %0, %1, %cst {dimension_numbers = #tpu.dot_dimension_numbers<[1], [0], [0], [1], [0, 0, 1, 1], [], []>} : vector<64x128xbf16>, vector<128x512xbf16>, vector<64x512xf32> -> vector<64x512xf32>
    %c0_3 = arith.constant 0 : index
    %c0_4 = arith.constant 0 : index
    %3 = vector.load %arg3[%c0_3, %c0_4] : memref<1x512xf32, #tpu.memory_space<vmem>>, vector<1x512xf32>
    %4 = vector.broadcast %3 : vector<1x512xf32> to vector<64x512xf32>
    %5 = arith.addf %2, %4 : vector<64x512xf32>
    %c0_5 = arith.constant 0 : index
    %c0_6 = arith.constant 0 : index
    %6 = vector.load %arg12[%c0_5, %c0_6] : memref<64x512xf32, #tpu.memory_space<vmem>>, vector<64x512xf32>
    tpu.vector_store %arg12[%c0_5, %c0_6], %5 {strides = array<i32>} : memref<64x512xf32, #tpu.memory_space<vmem>>, vector<64x512xf32>,
    %c0_7 = arith.constant 0 : index
    %c0_8 = arith.constant 0 : index
    %7 = vector.load %arg2[%c0_7, %c0_8] : memref<128x512xbf16, #tpu.memory_space<vmem>>, vector<128x512xbf16>
    %c0_9 = arith.constant 0 : index
    %c0_10 = arith.constant 0 : index
    %8 = vector.load %arg4[%c0_9, %c0_10] : memref<128x512xbf16, #tpu.memory_space<vmem>>, vector<128x512xbf16>
    %c0_11 = arith.constant 0 : index
    %c0_12 = arith.constant 0 : index
    %9 = vector.load %arg5[%c0_11, %c0_12] : memref<128x512xbf16, #tpu.memory_space<vmem>>, vector<128x512xbf16>
    %c0_13 = arith.constant 0 : index
    %c0_14 = arith.constant 0 : index
    %10 = vector.load %arg6[%c0_13, %c0_14] : memref<1x512xf32, #tpu.memory_space<vmem>>, vector<1x512xf32>
    %11 = vector.shape_cast %10 : vector<1x512xf32> to vector<1x512xf32>
    %12 = vector.broadcast %11 : vector<1x512xf32> to vector<8x512xf32>
    %cst_15 = arith.constant 0.000000e+00 : f32
    %13 = vector.broadcast %cst_15 : f32 to vector<8x128xf32>
    %cst_16 = arith.constant 0.000000e+00 : f32
    %14 = vector.broadcast %cst_16 : f32 to vector<8x128xf32>
    %cst_17 = arith.constant 0.000000e+00 : f32
    %15 = vector.broadcast %cst_17 : f32 to vector<8x128xf32>
    %cst_18 = arith.constant 0.000000e+00 : f32
    %16 = vector.broadcast %cst_18 : f32 to vector<8x128xf32>
    %c0_19 = arith.constant 0 : index
    %c0_20 = arith.constant 0 : index
    %17 = vector.load %arg12[%c0_19, %c0_20] : memref<64x512xf32, #tpu.memory_space<vmem>>, vector<8x512xf32>
    %18 = arith.truncf %13 : vector<8x128xf32> to vector<8x128xbf16>
    %cst_21 = arith.constant dense<0.000000e+00> : vector<8x512xf32>
    %19 = tpu.matmul %18, %7, %cst_21 {dimension_numbers = #tpu.dot_dimension_numbers<[1], [0], [0], [1], [0, 0, 1, 1], [], []>} : vector<8x128xbf16>, vector<128x512xbf16>, vector<8x512xf32> -> vector<8x512xf32>
    %20 = arith.addf %17, %19 : vector<8x512xf32>
    %21 = vector.extract_strided_slice %20 {offsets = [0, 0], sizes = [8, 384], strides = [1, 1]} : vector<8x512xf32> to vector<8x384xf32>
    %cst_22 = arith.constant 5.000000e-01 : f32
    %22 = vector.broadcast %cst_22 : f32 to vector<8x384xf32>
    %23 = arith.mulf %22, %21 : vector<8x384xf32>
    %24 = math.tanh %23 : vector<8x384xf32>
    %cst_23 = arith.constant 5.000000e-01 : f32
    %25 = vector.broadcast %cst_23 : f32 to vector<8x384xf32>
    %26 = arith.mulf %25, %24 : vector<8x384xf32>
    %cst_24 = arith.constant 5.000000e-01 : f32
    %27 = vector.broadcast %cst_24 : f32 to vector<8x384xf32>
    %28 = arith.addf %26, %27 : vector<8x384xf32>
    %29 = vector.extract_strided_slice %28 {offsets = [0, 0], sizes = [8, 128], strides = [1, 1]} : vector<8x384xf32> to vector<8x128xf32>
    %30 = vector.extract_strided_slice %28 {offsets = [0, 128], sizes = [8, 128], strides = [1, 1]} : vector<8x384xf32> to vector<8x128xf32>
    %31 = vector.extract_strided_slice %28 {offsets = [0, 256], sizes = [8, 128], strides = [1, 1]} : vector<8x384xf32> to vector<8x128xf32>
    %32 = vector.extract_strided_slice %20 {offsets = [0, 384], sizes = [8, 128], strides = [1, 1]} : vector<8x512xf32> to vector<8x128xf32>
    %33 = math.tanh %32 : vector<8x128xf32>
    %34 = arith.mulf %30, %14 : vector<8x128xf32>
    %35 = arith.mulf %29, %33 : vector<8x128xf32>
    %36 = arith.addf %34, %35 : vector<8x128xf32>
    %37 = math.tanh %36 : vector<8x128xf32>
    %38 = arith.mulf %31, %37 : vector<8x128xf32>
    %39 = arith.truncf %15 : vector<8x128xf32> to vector<8x128xbf16>
    %cst_25 = arith.constant dense<0.000000e+00> : vector<8x512xf32>
    %40 = tpu.matmul %39, %9, %cst_25 {dimension_numbers = #tpu.dot_dimension_numbers<[1], [0], [0], [1], [0, 0, 1, 1], [], []>} : vector<8x128xbf16>, vector<128x512xbf16>, vector<8x512xf32> -> vector<8x512xf32>
    %41 = arith.addf %12, %40 : vector<8x512xf32>
    %42 = arith.truncf %38 : vector<8x128xf32> to vector<8x128xbf16>
    %cst_26 = arith.constant dense<0.000000e+00> : vector<8x512xf32>
    %43 = tpu.matmul %42, %8, %cst_26 {dimension_numbers = #tpu.dot_dimension_numbers<[1], [0], [0], [1], [0, 0, 1, 1], [], []>} : vector<8x128xbf16>, vector<128x512xbf16>, vector<8x512xf32> -> vector<8x512xf32>
    %44 = arith.addf %41, %43 : vector<8x512xf32>
    %45 = vector.extract_strided_slice %44 {offsets = [0, 0], sizes = [8, 384], strides = [1, 1]} : vector<8x512xf32> to vector<8x384xf32>
    %cst_27 = arith.constant 5.000000e-01 : f32
    %46 = vector.broadcast %cst_27 : f32 to vector<8x384xf32>
    %47 = arith.mulf %46, %45 : vector<8x384xf32>
    %48 = math.tanh %47 : vector<8x384xf32>
    %cst_28 = arith.constant 5.000000e-01 : f32
    %49 = vector.broadcast %cst_28 : f32 to vector<8x384xf32>
    %50 = arith.mulf %49, %48 : vector<8x384xf32>
    %cst_29 = arith.constant 5.000000e-01 : f32
    %51 = vector.broadcast %cst_29 : f32 to vector<8x384xf32>
    %52 = arith.addf %50, %51 : vector<8x384xf32>
    %53 = vector.extract_strided_slice %52 {offsets = [0, 0], sizes = [8, 128], strides = [1, 1]} : vector<8x384xf32> to vector<8x128xf32>
    %54 = vector.extract_strided_slice %52 {offsets = [0, 128], sizes = [8, 128], strides = [1, 1]} : vector<8x384xf32> to vector<8x128xf32>
    %55 = vector.extract_strided_slice %52 {offsets = [0, 256], sizes = [8, 128], strides = [1, 1]} : vector<8x384xf32> to vector<8x128xf32>
    %56 = vector.extract_strided_slice %44 {offsets = [0, 384], sizes = [8, 128], strides = [1, 1]} : vector<8x512xf32> to vector<8x128xf32>
    %57 = math.tanh %56 : vector<8x128xf32>
    %58 = arith.mulf %54, %16 : vector<8x128xf32>
    %59 = arith.mulf %53, %57 : vector<8x128xf32>
    %60 = arith.addf %58, %59 : vector<8x128xf32>
    %61 = math.tanh %60 : vector<8x128xf32>
    %62 = arith.mulf %55, %61 : vector<8x128xf32>
    %c8 = arith.constant 8 : index
    %c0_30 = arith.constant 0 : index
    %63 = vector.load %arg12[%c8, %c0_30] : memref<64x512xf32, #tpu.memory_space<vmem>>, vector<8x512xf32>
    %64 = arith.truncf %38 : vector<8x128xf32> to vector<8x128xbf16>
    %cst_31 = arith.constant dense<0.000000e+00> : vector<8x512xf32>
    %65 = tpu.matmul %64, %7, %cst_31 {dimension_numbers = #tpu.dot_dimension_numbers<[1], [0], [0], [1], [0, 0, 1, 1], [], []>} : vector<8x128xbf16>, vector<128x512xbf16>, vector<8x512xf32> -> vector<8x512xf32>
    %66 = arith.addf %63, %65 : vector<8x512xf32>
    %67 = vector.extract_strided_slice %66 {offsets = [0, 0], sizes = [8, 384], strides = [1, 1]} : vector<8x512xf32> to vector<8x384xf32>
    %cst_32 = arith.constant 5.000000e-01 : f32
    %68 = vector.broadcast %cst_32 : f32 to vector<8x384xf32>
    %69 = arith.mulf %68, %67 : vector<8x384xf32>
    %70 = math.tanh %69 : vector<8x384xf32>
    %cst_33 = arith.constant 5.000000e-01 : f32
    %71 = vector.broadcast %cst_33 : f32 to vector<8x384xf32>
    %72 = arith.mulf %71, %70 : vector<8x384xf32>
    %cst_34 = arith.constant 5.000000e-01 : f32
    %73 = vector.broadcast %cst_34 : f32 to vector<8x384xf32>
    %74 = arith.addf %72, %73 : vector<8x384xf32>
    %75 = vector.extract_strided_slice %74 {offsets = [0, 0], sizes = [8, 128], strides = [1, 1]} : vector<8x384xf32> to vector<8x128xf32>
    %76 = vector.extract_strided_slice %74 {offsets = [0, 128], sizes = [8, 128], strides = [1, 1]} : vector<8x384xf32> to vector<8x128xf32>
    %77 = vector.extract_strided_slice %74 {offsets = [0, 256], sizes = [8, 128], strides = [1, 1]} : vector<8x384xf32> to vector<8x128xf32>
    %78 = vector.extract_strided_slice %66 {offsets = [0, 384], sizes = [8, 128], strides = [1, 1]} : vector<8x512xf32> to vector<8x128xf32>
    %79 = math.tanh %78 : vector<8x128xf32>
    %80 = arith.mulf %76, %36 : vector<8x128xf32>
    %81 = arith.mulf %75, %79 : vector<8x128xf32>
    %82 = arith.addf %80, %81 : vector<8x128xf32>
    %83 = math.tanh %82 : vector<8x128xf32>
    %84 = arith.mulf %77, %83 : vector<8x128xf32>
    %85 = arith.truncf %62 : vector<8x128xf32> to vector<8x128xbf16>
    %cst_35 = arith.constant dense<0.000000e+00> : vector<8x512xf32>
    %86 = tpu.matmul %85, %9, %cst_35 {dimension_numbers = #tpu.dot_dimension_numbers<[1], [0], [0], [1], [0, 0, 1, 1], [], []>} : vector<8x128xbf16>, vector<128x512xbf16>, vector<8x512xf32> -> vector<8x512xf32>
    %87 = arith.addf %12, %86 : vector<8x512xf32>
    %88 = arith.truncf %84 : vector<8x128xf32> to vector<8x128xbf16>
    %cst_36 = arith.constant dense<0.000000e+00> : vector<8x512xf32>
    %89 = tpu.matmul %88, %8, %cst_36 {dimension_numbers = #tpu.dot_dimension_numbers<[1], [0], [0], [1], [0, 0, 1, 1], [], []>} : vector<8x128xbf16>, vector<128x512xbf16>, vector<8x512xf32> -> vector<8x512xf32>
    %90 = arith.addf %87, %89 : vector<8x512xf32>
    %91 = vector.extract_strided_slice %90 {offsets = [0, 0], sizes = [8, 384], strides = [1, 1]} : vector<8x512xf32> to vector<8x384xf32>
    %cst_37 = arith.constant 5.000000e-01 : f32
    %92 = vector.broadcast %cst_37 : f32 to vector<8x384xf32>
    %93 = arith.mulf %92, %91 : vector<8x384xf32>
    %94 = math.tanh %93 : vector<8x384xf32>
    %cst_38 = arith.constant 5.000000e-01 : f32
    %95 = vector.broadcast %cst_38 : f32 to vector<8x384xf32>
    %96 = arith.mulf %95, %94 : vector<8x384xf32>
    %cst_39 = arith.constant 5.000000e-01 : f32
    %97 = vector.broadcast %cst_39 : f32 to vector<8x384xf32>
    %98 = arith.addf %96, %97 : vector<8x384xf32>
    %99 = vector.extract_strided_slice %98 {offsets = [0, 0], sizes = [8, 128], strides = [1, 1]} : vector<8x384xf32> to vector<8x128xf32>
    %100 = vector.extract_strided_slice %98 {offsets = [0, 128], sizes = [8, 128], strides = [1, 1]} : vector<8x384xf32> to vector<8x128xf32>
    %101 = vector.extract_strided_slice %98 {offsets = [0, 256], sizes = [8, 128], strides = [1, 1]} : vector<8x384xf32> to vector<8x128xf32>
    %102 = vector.extract_strided_slice %90 {offsets = [0, 384], sizes = [8, 128], strides = [1, 1]} : vector<8x512xf32> to vector<8x128xf32>
    %103 = math.tanh %102 : vector<8x128xf32>
    %104 = arith.mulf %100, %60 : vector<8x128xf32>
    %105 = arith.mulf %99, %103 : vector<8x128xf32>
    %106 = arith.addf %104, %105 : vector<8x128xf32>
    %107 = math.tanh %106 : vector<8x128xf32>
    %108 = arith.mulf %101, %107 : vector<8x128xf32>
    %c16 = arith.constant 16 : index
    %c0_40 = arith.constant 0 : index
    %109 = vector.load %arg12[%c16, %c0_40] : memref<64x512xf32, #tpu.memory_space<vmem>>, vector<8x512xf32>
    %110 = arith.truncf %84 : vector<8x128xf32> to vector<8x128xbf16>
    %cst_41 = arith.constant dense<0.000000e+00> : vector<8x512xf32>
    %111 = tpu.matmul %110, %7, %cst_41 {dimension_numbers = #tpu.dot_dimension_numbers<[1], [0], [0], [1], [0, 0, 1, 1], [], []>} : vector<8x128xbf16>, vector<128x512xbf16>, vector<8x512xf32> -> vector<8x512xf32>
    %112 = arith.addf %109, %111 : vector<8x512xf32>
    %113 = vector.extract_strided_slice %112 {offsets = [0, 0], sizes = [8, 384], strides = [1, 1]} : vector<8x512xf32> to vector<8x384xf32>
    %cst_42 = arith.constant 5.000000e-01 : f32
    %114 = vector.broadcast %cst_42 : f32 to vector<8x384xf32>
    %115 = arith.mulf %114, %113 : vector<8x384xf32>
    %116 = math.tanh %115 : vector<8x384xf32>
    %cst_43 = arith.constant 5.000000e-01 : f32
    %117 = vector.broadcast %cst_43 : f32 to vector<8x384xf32>
    %118 = arith.mulf %117, %116 : vector<8x384xf32>
    %cst_44 = arith.constant 5.000000e-01 : f32
    %119 = vector.broadcast %cst_44 : f32 to vector<8x384xf32>
    %120 = arith.addf %118, %119 : vector<8x384xf32>
    %121 = vector.extract_strided_slice %120 {offsets = [0, 0], sizes = [8, 128], strides = [1, 1]} : vector<8x384xf32> to vector<8x128xf32>
    %122 = vector.extract_strided_slice %120 {offsets = [0, 128], sizes = [8, 128], strides = [1, 1]} : vector<8x384xf32> to vector<8x128xf32>
    %123 = vector.extract_strided_slice %120 {offsets = [0, 256], sizes = [8, 128], strides = [1, 1]} : vector<8x384xf32> to vector<8x128xf32>
    %124 = vector.extract_strided_slice %112 {offsets = [0, 384], sizes = [8, 128], strides = [1, 1]} : vector<8x512xf32> to vector<8x128xf32>
    %125 = math.tanh %124 : vector<8x128xf32>
    %126 = arith.mulf %122, %82 : vector<8x128xf32>
    %127 = arith.mulf %121, %125 : vector<8x128xf32>
    %128 = arith.addf %126, %127 : vector<8x128xf32>
    %129 = math.tanh %128 : vector<8x128xf32>
    %130 = arith.mulf %123, %129 : vector<8x128xf32>
    %131 = arith.truncf %108 : vector<8x128xf32> to vector<8x128xbf16>
    %cst_45 = arith.constant dense<0.000000e+00> : vector<8x512xf32>
    %132 = tpu.matmul %131, %9, %cst_45 {dimension_numbers = #tpu.dot_dimension_numbers<[1], [0], [0], [1], [0, 0, 1, 1], [], []>} : vector<8x128xbf16>, vector<128x512xbf16>, vector<8x512xf32> -> vector<8x512xf32>
    %133 = arith.addf %12, %132 : vector<8x512xf32>
    %134 = arith.truncf %130 : vector<8x128xf32> to vector<8x128xbf16>
    %cst_46 = arith.constant dense<0.000000e+00> : vector<8x512xf32>
    %135 = tpu.matmul %134, %8, %cst_46 {dimension_numbers = #tpu.dot_dimension_numbers<[1], [0], [0], [1], [0, 0, 1, 1], [], []>} : vector<8x128xbf16>, vector<128x512xbf16>, vector<8x512xf32> -> vector<8x512xf32>
    %136 = arith.addf %133, %135 : vector<8x512xf32>
    %137 = vector.extract_strided_slice %136 {offsets = [0, 0], sizes = [8, 384], strides = [1, 1]} : vector<8x512xf32> to vector<8x384xf32>
    %cst_47 = arith.constant 5.000000e-01 : f32
    %138 = vector.broadcast %cst_47 : f32 to vector<8x384xf32>
    %139 = arith.mulf %138, %137 : vector<8x384xf32>
    %140 = math.tanh %139 : vector<8x384xf32>
    %cst_48 = arith.constant 5.000000e-01 : f32
    %141 = vector.broadcast %cst_48 : f32 to vector<8x384xf32>
    %142 = arith.mulf %141, %140 : vector<8x384xf32>
    %cst_49 = arith.constant 5.000000e-01 : f32
    %143 = vector.broadcast %cst_49 : f32 to vector<8x384xf32>
    %144 = arith.addf %142, %143 : vector<8x384xf32>
    %145 = vector.extract_strided_slice %144 {offsets = [0, 0], sizes = [8, 128], strides = [1, 1]} : vector<8x384xf32> to vector<8x128xf32>
    %146 = vector.extract_strided_slice %144 {offsets = [0, 128], sizes = [8, 128], strides = [1, 1]} : vector<8x384xf32> to vector<8x128xf32>
    %147 = vector.extract_strided_slice %144 {offsets = [0, 256], sizes = [8, 128], strides = [1, 1]} : vector<8x384xf32> to vector<8x128xf32>
    %148 = vector.extract_strided_slice %136 {offsets = [0, 384], sizes = [8, 128], strides = [1, 1]} : vector<8x512xf32> to vector<8x128xf32>
    %149 = math.tanh %148 : vector<8x128xf32>
    %150 = arith.mulf %146, %106 : vector<8x128xf32>
    %151 = arith.mulf %145, %149 : vector<8x128xf32>
    %152 = arith.addf %150, %151 : vector<8x128xf32>
    %153 = math.tanh %152 : vector<8x128xf32>
    %154 = arith.mulf %147, %153 : vector<8x128xf32>
    %c24 = arith.constant 24 : index
    %c0_50 = arith.constant 0 : index
    %155 = vector.load %arg12[%c24, %c0_50] : memref<64x512xf32, #tpu.memory_space<vmem>>, vector<8x512xf32>
    %156 = arith.truncf %130 : vector<8x128xf32> to vector<8x128xbf16>
    %cst_51 = arith.constant dense<0.000000e+00> : vector<8x512xf32>
    %157 = tpu.matmul %156, %7, %cst_51 {dimension_numbers = #tpu.dot_dimension_numbers<[1], [0], [0], [1], [0, 0, 1, 1], [], []>} : vector<8x128xbf16>, vector<128x512xbf16>, vector<8x512xf32> -> vector<8x512xf32>
    %158 = arith.addf %155, %157 : vector<8x512xf32>
    %159 = vector.extract_strided_slice %158 {offsets = [0, 0], sizes = [8, 384], strides = [1, 1]} : vector<8x512xf32> to vector<8x384xf32>
    %cst_52 = arith.constant 5.000000e-01 : f32
    %160 = vector.broadcast %cst_52 : f32 to vector<8x384xf32>
    %161 = arith.mulf %160, %159 : vector<8x384xf32>
    %162 = math.tanh %161 : vector<8x384xf32>
    %cst_53 = arith.constant 5.000000e-01 : f32
    %163 = vector.broadcast %cst_53 : f32 to vector<8x384xf32>
    %164 = arith.mulf %163, %162 : vector<8x384xf32>
    %cst_54 = arith.constant 5.000000e-01 : f32
    %165 = vector.broadcast %cst_54 : f32 to vector<8x384xf32>
    %166 = arith.addf %164, %165 : vector<8x384xf32>
    %167 = vector.extract_strided_slice %166 {offsets = [0, 0], sizes = [8, 128], strides = [1, 1]} : vector<8x384xf32> to vector<8x128xf32>
    %168 = vector.extract_strided_slice %166 {offsets = [0, 128], sizes = [8, 128], strides = [1, 1]} : vector<8x384xf32> to vector<8x128xf32>
    %169 = vector.extract_strided_slice %166 {offsets = [0, 256], sizes = [8, 128], strides = [1, 1]} : vector<8x384xf32> to vector<8x128xf32>
    %170 = vector.extract_strided_slice %158 {offsets = [0, 384], sizes = [8, 128], strides = [1, 1]} : vector<8x512xf32> to vector<8x128xf32>
    %171 = math.tanh %170 : vector<8x128xf32>
    %172 = arith.mulf %168, %128 : vector<8x128xf32>
    %173 = arith.mulf %167, %171 : vector<8x128xf32>
    %174 = arith.addf %172, %173 : vector<8x128xf32>
    %175 = math.tanh %174 : vector<8x128xf32>
    %176 = arith.mulf %169, %175 : vector<8x128xf32>
    %177 = arith.truncf %154 : vector<8x128xf32> to vector<8x128xbf16>
    %cst_55 = arith.constant dense<0.000000e+00> : vector<8x512xf32>
    %178 = tpu.matmul %177, %9, %cst_55 {dimension_numbers = #tpu.dot_dimension_numbers<[1], [0], [0], [1], [0, 0, 1, 1], [], []>} : vector<8x128xbf16>, vector<128x512xbf16>, vector<8x512xf32> -> vector<8x512xf32>
    %179 = arith.addf %12, %178 : vector<8x512xf32>
    %180 = arith.truncf %176 : vector<8x128xf32> to vector<8x128xbf16>
    %cst_56 = arith.constant dense<0.000000e+00> : vector<8x512xf32>
    %181 = tpu.matmul %180, %8, %cst_56 {dimension_numbers = #tpu.dot_dimension_numbers<[1], [0], [0], [1], [0, 0, 1, 1], [], []>} : vector<8x128xbf16>, vector<128x512xbf16>, vector<8x512xf32> -> vector<8x512xf32>
    %182 = arith.addf %179, %181 : vector<8x512xf32>
    %183 = vector.extract_strided_slice %182 {offsets = [0, 0], sizes = [8, 384], strides = [1, 1]} : vector<8x512xf32> to vector<8x384xf32>
    %cst_57 = arith.constant 5.000000e-01 : f32
    %184 = vector.broadcast %cst_57 : f32 to vector<8x384xf32>
    %185 = arith.mulf %184, %183 : vector<8x384xf32>
    %186 = math.tanh %185 : vector<8x384xf32>
    %cst_58 = arith.constant 5.000000e-01 : f32
    %187 = vector.broadcast %cst_58 : f32 to vector<8x384xf32>
    %188 = arith.mulf %187, %186 : vector<8x384xf32>
    %cst_59 = arith.constant 5.000000e-01 : f32
    %189 = vector.broadcast %cst_59 : f32 to vector<8x384xf32>
    %190 = arith.addf %188, %189 : vector<8x384xf32>
    %191 = vector.extract_strided_slice %190 {offsets = [0, 0], sizes = [8, 128], strides = [1, 1]} : vector<8x384xf32> to vector<8x128xf32>
    %192 = vector.extract_strided_slice %190 {offsets = [0, 128], sizes = [8, 128], strides = [1, 1]} : vector<8x384xf32> to vector<8x128xf32>
    %193 = vector.extract_strided_slice %190 {offsets = [0, 256], sizes = [8, 128], strides = [1, 1]} : vector<8x384xf32> to vector<8x128xf32>
    %194 = vector.extract_strided_slice %182 {offsets = [0, 384], sizes = [8, 128], strides = [1, 1]} : vector<8x512xf32> to vector<8x128xf32>
    %195 = math.tanh %194 : vector<8x128xf32>
    %196 = arith.mulf %192, %152 : vector<8x128xf32>
    %197 = arith.mulf %191, %195 : vector<8x128xf32>
    %198 = arith.addf %196, %197 : vector<8x128xf32>
    %199 = math.tanh %198 : vector<8x128xf32>
    %200 = arith.mulf %193, %199 : vector<8x128xf32>
    %c32 = arith.constant 32 : index
    %c0_60 = arith.constant 0 : index
    %201 = vector.load %arg12[%c32, %c0_60] : memref<64x512xf32, #tpu.memory_space<vmem>>, vector<8x512xf32>
    %202 = arith.truncf %176 : vector<8x128xf32> to vector<8x128xbf16>
    %cst_61 = arith.constant dense<0.000000e+00> : vector<8x512xf32>
    %203 = tpu.matmul %202, %7, %cst_61 {dimension_numbers = #tpu.dot_dimension_numbers<[1], [0], [0], [1], [0, 0, 1, 1], [], []>} : vector<8x128xbf16>, vector<128x512xbf16>, vector<8x512xf32> -> vector<8x512xf32>
    %204 = arith.addf %201, %203 : vector<8x512xf32>
    %205 = vector.extract_strided_slice %204 {offsets = [0, 0], sizes = [8, 384], strides = [1, 1]} : vector<8x512xf32> to vector<8x384xf32>
    %cst_62 = arith.constant 5.000000e-01 : f32
    %206 = vector.broadcast %cst_62 : f32 to vector<8x384xf32>
    %207 = arith.mulf %206, %205 : vector<8x384xf32>
    %208 = math.tanh %207 : vector<8x384xf32>
    %cst_63 = arith.constant 5.000000e-01 : f32
    %209 = vector.broadcast %cst_63 : f32 to vector<8x384xf32>
    %210 = arith.mulf %209, %208 : vector<8x384xf32>
    %cst_64 = arith.constant 5.000000e-01 : f32
    %211 = vector.broadcast %cst_64 : f32 to vector<8x384xf32>
    %212 = arith.addf %210, %211 : vector<8x384xf32>
    %213 = vector.extract_strided_slice %212 {offsets = [0, 0], sizes = [8, 128], strides = [1, 1]} : vector<8x384xf32> to vector<8x128xf32>
    %214 = vector.extract_strided_slice %212 {offsets = [0, 128], sizes = [8, 128], strides = [1, 1]} : vector<8x384xf32> to vector<8x128xf32>
    %215 = vector.extract_strided_slice %212 {offsets = [0, 256], sizes = [8, 128], strides = [1, 1]} : vector<8x384xf32> to vector<8x128xf32>
    %216 = vector.extract_strided_slice %204 {offsets = [0, 384], sizes = [8, 128], strides = [1, 1]} : vector<8x512xf32> to vector<8x128xf32>
    %217 = math.tanh %216 : vector<8x128xf32>
    %218 = arith.mulf %214, %174 : vector<8x128xf32>
    %219 = arith.mulf %213, %217 : vector<8x128xf32>
    %220 = arith.addf %218, %219 : vector<8x128xf32>
    %221 = math.tanh %220 : vector<8x128xf32>
    %222 = arith.mulf %215, %221 : vector<8x128xf32>
    %223 = arith.truncf %200 : vector<8x128xf32> to vector<8x128xbf16>
    %cst_65 = arith.constant dense<0.000000e+00> : vector<8x512xf32>
    %224 = tpu.matmul %223, %9, %cst_65 {dimension_numbers = #tpu.dot_dimension_numbers<[1], [0], [0], [1], [0, 0, 1, 1], [], []>} : vector<8x128xbf16>, vector<128x512xbf16>, vector<8x512xf32> -> vector<8x512xf32>
    %225 = arith.addf %12, %224 : vector<8x512xf32>
    %226 = arith.truncf %222 : vector<8x128xf32> to vector<8x128xbf16>
    %cst_66 = arith.constant dense<0.000000e+00> : vector<8x512xf32>
    %227 = tpu.matmul %226, %8, %cst_66 {dimension_numbers = #tpu.dot_dimension_numbers<[1], [0], [0], [1], [0, 0, 1, 1], [], []>} : vector<8x128xbf16>, vector<128x512xbf16>, vector<8x512xf32> -> vector<8x512xf32>
    %228 = arith.addf %225, %227 : vector<8x512xf32>
    %229 = vector.extract_strided_slice %228 {offsets = [0, 0], sizes = [8, 384], strides = [1, 1]} : vector<8x512xf32> to vector<8x384xf32>
    %cst_67 = arith.constant 5.000000e-01 : f32
    %230 = vector.broadcast %cst_67 : f32 to vector<8x384xf32>
    %231 = arith.mulf %230, %229 : vector<8x384xf32>
    %232 = math.tanh %231 : vector<8x384xf32>
    %cst_68 = arith.constant 5.000000e-01 : f32
    %233 = vector.broadcast %cst_68 : f32 to vector<8x384xf32>
    %234 = arith.mulf %233, %232 : vector<8x384xf32>
    %cst_69 = arith.constant 5.000000e-01 : f32
    %235 = vector.broadcast %cst_69 : f32 to vector<8x384xf32>
    %236 = arith.addf %234, %235 : vector<8x384xf32>
    %237 = vector.extract_strided_slice %236 {offsets = [0, 0], sizes = [8, 128], strides = [1, 1]} : vector<8x384xf32> to vector<8x128xf32>
    %238 = vector.extract_strided_slice %236 {offsets = [0, 128], sizes = [8, 128], strides = [1, 1]} : vector<8x384xf32> to vector<8x128xf32>
    %239 = vector.extract_strided_slice %236 {offsets = [0, 256], sizes = [8, 128], strides = [1, 1]} : vector<8x384xf32> to vector<8x128xf32>
    %240 = vector.extract_strided_slice %228 {offsets = [0, 384], sizes = [8, 128], strides = [1, 1]} : vector<8x512xf32> to vector<8x128xf32>
    %241 = math.tanh %240 : vector<8x128xf32>
    %242 = arith.mulf %238, %198 : vector<8x128xf32>
    %243 = arith.mulf %237, %241 : vector<8x128xf32>
    %244 = arith.addf %242, %243 : vector<8x128xf32>
    %245 = math.tanh %244 : vector<8x128xf32>
    %246 = arith.mulf %239, %245 : vector<8x128xf32>
    %c40 = arith.constant 40 : index
    %c0_70 = arith.constant 0 : index
    %247 = vector.load %arg12[%c40, %c0_70] : memref<64x512xf32, #tpu.memory_space<vmem>>, vector<8x512xf32>
    %248 = arith.truncf %222 : vector<8x128xf32> to vector<8x128xbf16>
    %cst_71 = arith.constant dense<0.000000e+00> : vector<8x512xf32>
    %249 = tpu.matmul %248, %7, %cst_71 {dimension_numbers = #tpu.dot_dimension_numbers<[1], [0], [0], [1], [0, 0, 1, 1], [], []>} : vector<8x128xbf16>, vector<128x512xbf16>, vector<8x512xf32> -> vector<8x512xf32>
    %250 = arith.addf %247, %249 : vector<8x512xf32>
    %251 = vector.extract_strided_slice %250 {offsets = [0, 0], sizes = [8, 384], strides = [1, 1]} : vector<8x512xf32> to vector<8x384xf32>
    %cst_72 = arith.constant 5.000000e-01 : f32
    %252 = vector.broadcast %cst_72 : f32 to vector<8x384xf32>
    %253 = arith.mulf %252, %251 : vector<8x384xf32>
    %254 = math.tanh %253 : vector<8x384xf32>
    %cst_73 = arith.constant 5.000000e-01 : f32
    %255 = vector.broadcast %cst_73 : f32 to vector<8x384xf32>
    %256 = arith.mulf %255, %254 : vector<8x384xf32>
    %cst_74 = arith.constant 5.000000e-01 : f32
    %257 = vector.broadcast %cst_74 : f32 to vector<8x384xf32>
    %258 = arith.addf %256, %257 : vector<8x384xf32>
    %259 = vector.extract_strided_slice %258 {offsets = [0, 0], sizes = [8, 128], strides = [1, 1]} : vector<8x384xf32> to vector<8x128xf32>
    %260 = vector.extract_strided_slice %258 {offsets = [0, 128], sizes = [8, 128], strides = [1, 1]} : vector<8x384xf32> to vector<8x128xf32>
    %261 = vector.extract_strided_slice %258 {offsets = [0, 256], sizes = [8, 128], strides = [1, 1]} : vector<8x384xf32> to vector<8x128xf32>
    %262 = vector.extract_strided_slice %250 {offsets = [0, 384], sizes = [8, 128], strides = [1, 1]} : vector<8x512xf32> to vector<8x128xf32>
    %263 = math.tanh %262 : vector<8x128xf32>
    %264 = arith.mulf %260, %220 : vector<8x128xf32>
    %265 = arith.mulf %259, %263 : vector<8x128xf32>
    %266 = arith.addf %264, %265 : vector<8x128xf32>
    %267 = math.tanh %266 : vector<8x128xf32>
    %268 = arith.mulf %261, %267 : vector<8x128xf32>
    %269 = arith.truncf %246 : vector<8x128xf32> to vector<8x128xbf16>
    %cst_75 = arith.constant dense<0.000000e+00> : vector<8x512xf32>
    %270 = tpu.matmul %269, %9, %cst_75 {dimension_numbers = #tpu.dot_dimension_numbers<[1], [0], [0], [1], [0, 0, 1, 1], [], []>} : vector<8x128xbf16>, vector<128x512xbf16>, vector<8x512xf32> -> vector<8x512xf32>
    %271 = arith.addf %12, %270 : vector<8x512xf32>
    %272 = arith.truncf %268 : vector<8x128xf32> to vector<8x128xbf16>
    %cst_76 = arith.constant dense<0.000000e+00> : vector<8x512xf32>
    %273 = tpu.matmul %272, %8, %cst_76 {dimension_numbers = #tpu.dot_dimension_numbers<[1], [0], [0], [1], [0, 0, 1, 1], [], []>} : vector<8x128xbf16>, vector<128x512xbf16>, vector<8x512xf32> -> vector<8x512xf32>
    %274 = arith.addf %271, %273 : vector<8x512xf32>
    %275 = vector.extract_strided_slice %274 {offsets = [0, 0], sizes = [8, 384], strides = [1, 1]} : vector<8x512xf32> to vector<8x384xf32>
    %cst_77 = arith.constant 5.000000e-01 : f32
    %276 = vector.broadcast %cst_77 : f32 to vector<8x384xf32>
    %277 = arith.mulf %276, %275 : vector<8x384xf32>
    %278 = math.tanh %277 : vector<8x384xf32>
    %cst_78 = arith.constant 5.000000e-01 : f32
    %279 = vector.broadcast %cst_78 : f32 to vector<8x384xf32>
    %280 = arith.mulf %279, %278 : vector<8x384xf32>
    %cst_79 = arith.constant 5.000000e-01 : f32
    %281 = vector.broadcast %cst_79 : f32 to vector<8x384xf32>
    %282 = arith.addf %280, %281 : vector<8x384xf32>
    %283 = vector.extract_strided_slice %282 {offsets = [0, 0], sizes = [8, 128], strides = [1, 1]} : vector<8x384xf32> to vector<8x128xf32>
    %284 = vector.extract_strided_slice %282 {offsets = [0, 128], sizes = [8, 128], strides = [1, 1]} : vector<8x384xf32> to vector<8x128xf32>
    %285 = vector.extract_strided_slice %282 {offsets = [0, 256], sizes = [8, 128], strides = [1, 1]} : vector<8x384xf32> to vector<8x128xf32>
    %286 = vector.extract_strided_slice %274 {offsets = [0, 384], sizes = [8, 128], strides = [1, 1]} : vector<8x512xf32> to vector<8x128xf32>
    %287 = math.tanh %286 : vector<8x128xf32>
    %288 = arith.mulf %284, %244 : vector<8x128xf32>
    %289 = arith.mulf %283, %287 : vector<8x128xf32>
    %290 = arith.addf %288, %289 : vector<8x128xf32>
    %291 = math.tanh %290 : vector<8x128xf32>
    %292 = arith.mulf %285, %291 : vector<8x128xf32>
    %c48 = arith.constant 48 : index
    %c0_80 = arith.constant 0 : index
    %293 = vector.load %arg12[%c48, %c0_80] : memref<64x512xf32, #tpu.memory_space<vmem>>, vector<8x512xf32>
    %294 = arith.truncf %268 : vector<8x128xf32> to vector<8x128xbf16>
    %cst_81 = arith.constant dense<0.000000e+00> : vector<8x512xf32>
    %295 = tpu.matmul %294, %7, %cst_81 {dimension_numbers = #tpu.dot_dimension_numbers<[1], [0], [0], [1], [0, 0, 1, 1], [], []>} : vector<8x128xbf16>, vector<128x512xbf16>, vector<8x512xf32> -> vector<8x512xf32>
    %296 = arith.addf %293, %295 : vector<8x512xf32>
    %297 = vector.extract_strided_slice %296 {offsets = [0, 0], sizes = [8, 384], strides = [1, 1]} : vector<8x512xf32> to vector<8x384xf32>
    %cst_82 = arith.constant 5.000000e-01 : f32
    %298 = vector.broadcast %cst_82 : f32 to vector<8x384xf32>
    %299 = arith.mulf %298, %297 : vector<8x384xf32>
    %300 = math.tanh %299 : vector<8x384xf32>
    %cst_83 = arith.constant 5.000000e-01 : f32
    %301 = vector.broadcast %cst_83 : f32 to vector<8x384xf32>
    %302 = arith.mulf %301, %300 : vector<8x384xf32>
    %cst_84 = arith.constant 5.000000e-01 : f32
    %303 = vector.broadcast %cst_84 : f32 to vector<8x384xf32>
    %304 = arith.addf %302, %303 : vector<8x384xf32>
    %305 = vector.extract_strided_slice %304 {offsets = [0, 0], sizes = [8, 128], strides = [1, 1]} : vector<8x384xf32> to vector<8x128xf32>
    %306 = vector.extract_strided_slice %304 {offsets = [0, 128], sizes = [8, 128], strides = [1, 1]} : vector<8x384xf32> to vector<8x128xf32>
    %307 = vector.extract_strided_slice %304 {offsets = [0, 256], sizes = [8, 128], strides = [1, 1]} : vector<8x384xf32> to vector<8x128xf32>
    %308 = vector.extract_strided_slice %296 {offsets = [0, 384], sizes = [8, 128], strides = [1, 1]} : vector<8x512xf32> to vector<8x128xf32>
    %309 = math.tanh %308 : vector<8x128xf32>
    %310 = arith.mulf %306, %266 : vector<8x128xf32>
    %311 = arith.mulf %305, %309 : vector<8x128xf32>
    %312 = arith.addf %310, %311 : vector<8x128xf32>
    %313 = math.tanh %312 : vector<8x128xf32>
    %314 = arith.mulf %307, %313 : vector<8x128xf32>
    %315 = arith.truncf %292 : vector<8x128xf32> to vector<8x128xbf16>
    %cst_85 = arith.constant dense<0.000000e+00> : vector<8x512xf32>
    %316 = tpu.matmul %315, %9, %cst_85 {dimension_numbers = #tpu.dot_dimension_numbers<[1], [0], [0], [1], [0, 0, 1, 1], [], []>} : vector<8x128xbf16>, vector<128x512xbf16>, vector<8x512xf32> -> vector<8x512xf32>
    %317 = arith.addf %12, %316 : vector<8x512xf32>
    %318 = arith.truncf %314 : vector<8x128xf32> to vector<8x128xbf16>
    %cst_86 = arith.constant dense<0.000000e+00> : vector<8x512xf32>
    %319 = tpu.matmul %318, %8, %cst_86 {dimension_numbers = #tpu.dot_dimension_numbers<[1], [0], [0], [1], [0, 0, 1, 1], [], []>} : vector<8x128xbf16>, vector<128x512xbf16>, vector<8x512xf32> -> vector<8x512xf32>
    %320 = arith.addf %317, %319 : vector<8x512xf32>
    %321 = vector.extract_strided_slice %320 {offsets = [0, 0], sizes = [8, 384], strides = [1, 1]} : vector<8x512xf32> to vector<8x384xf32>
    %cst_87 = arith.constant 5.000000e-01 : f32
    %322 = vector.broadcast %cst_87 : f32 to vector<8x384xf32>
    %323 = arith.mulf %322, %321 : vector<8x384xf32>
    %324 = math.tanh %323 : vector<8x384xf32>
    %cst_88 = arith.constant 5.000000e-01 : f32
    %325 = vector.broadcast %cst_88 : f32 to vector<8x384xf32>
    %326 = arith.mulf %325, %324 : vector<8x384xf32>
    %cst_89 = arith.constant 5.000000e-01 : f32
    %327 = vector.broadcast %cst_89 : f32 to vector<8x384xf32>
    %328 = arith.addf %326, %327 : vector<8x384xf32>
    %329 = vector.extract_strided_slice %328 {offsets = [0, 0], sizes = [8, 128], strides = [1, 1]} : vector<8x384xf32> to vector<8x128xf32>
    %330 = vector.extract_strided_slice %328 {offsets = [0, 128], sizes = [8, 128], strides = [1, 1]} : vector<8x384xf32> to vector<8x128xf32>
    %331 = vector.extract_strided_slice %328 {offsets = [0, 256], sizes = [8, 128], strides = [1, 1]} : vector<8x384xf32> to vector<8x128xf32>
    %332 = vector.extract_strided_slice %320 {offsets = [0, 384], sizes = [8, 128], strides = [1, 1]} : vector<8x512xf32> to vector<8x128xf32>
    %333 = math.tanh %332 : vector<8x128xf32>
    %334 = arith.mulf %330, %290 : vector<8x128xf32>
    %335 = arith.mulf %329, %333 : vector<8x128xf32>
    %336 = arith.addf %334, %335 : vector<8x128xf32>
    %337 = math.tanh %336 : vector<8x128xf32>
    %338 = arith.mulf %331, %337 : vector<8x128xf32>
    %c56 = arith.constant 56 : index
    %c0_90 = arith.constant 0 : index
    %339 = vector.load %arg12[%c56, %c0_90] : memref<64x512xf32, #tpu.memory_space<vmem>>, vector<8x512xf32>
    %340 = arith.truncf %314 : vector<8x128xf32> to vector<8x128xbf16>
    %cst_91 = arith.constant dense<0.000000e+00> : vector<8x512xf32>
    %341 = tpu.matmul %340, %7, %cst_91 {dimension_numbers = #tpu.dot_dimension_numbers<[1], [0], [0], [1], [0, 0, 1, 1], [], []>} : vector<8x128xbf16>, vector<128x512xbf16>, vector<8x512xf32> -> vector<8x512xf32>
    %342 = arith.addf %339, %341 : vector<8x512xf32>
    %343 = vector.extract_strided_slice %342 {offsets = [0, 0], sizes = [8, 384], strides = [1, 1]} : vector<8x512xf32> to vector<8x384xf32>
    %cst_92 = arith.constant 5.000000e-01 : f32
    %344 = vector.broadcast %cst_92 : f32 to vector<8x384xf32>
    %345 = arith.mulf %344, %343 : vector<8x384xf32>
    %346 = math.tanh %345 : vector<8x384xf32>
    %cst_93 = arith.constant 5.000000e-01 : f32
    %347 = vector.broadcast %cst_93 : f32 to vector<8x384xf32>
    %348 = arith.mulf %347, %346 : vector<8x384xf32>
    %cst_94 = arith.constant 5.000000e-01 : f32
    %349 = vector.broadcast %cst_94 : f32 to vector<8x384xf32>
    %350 = arith.addf %348, %349 : vector<8x384xf32>
    %351 = vector.extract_strided_slice %350 {offsets = [0, 0], sizes = [8, 128], strides = [1, 1]} : vector<8x384xf32> to vector<8x128xf32>
    %352 = vector.extract_strided_slice %350 {offsets = [0, 128], sizes = [8, 128], strides = [1, 1]} : vector<8x384xf32> to vector<8x128xf32>
    %353 = vector.extract_strided_slice %350 {offsets = [0, 256], sizes = [8, 128], strides = [1, 1]} : vector<8x384xf32> to vector<8x128xf32>
    %354 = vector.extract_strided_slice %342 {offsets = [0, 384], sizes = [8, 128], strides = [1, 1]} : vector<8x512xf32> to vector<8x128xf32>
    %355 = math.tanh %354 : vector<8x128xf32>
    %356 = arith.mulf %352, %312 : vector<8x128xf32>
    %357 = arith.mulf %351, %355 : vector<8x128xf32>
    %358 = arith.addf %356, %357 : vector<8x128xf32>
    %359 = math.tanh %358 : vector<8x128xf32>
    %360 = arith.mulf %353, %359 : vector<8x128xf32>
    %361 = arith.truncf %338 : vector<8x128xf32> to vector<8x128xbf16>
    %cst_95 = arith.constant dense<0.000000e+00> : vector<8x512xf32>
    %362 = tpu.matmul %361, %9, %cst_95 {dimension_numbers = #tpu.dot_dimension_numbers<[1], [0], [0], [1], [0, 0, 1, 1], [], []>} : vector<8x128xbf16>, vector<128x512xbf16>, vector<8x512xf32> -> vector<8x512xf32>
    %363 = arith.addf %12, %362 : vector<8x512xf32>
    %364 = arith.truncf %360 : vector<8x128xf32> to vector<8x128xbf16>
    %cst_96 = arith.constant dense<0.000000e+00> : vector<8x512xf32>
    %365 = tpu.matmul %364, %8, %cst_96 {dimension_numbers = #tpu.dot_dimension_numbers<[1], [0], [0], [1], [0, 0, 1, 1], [], []>} : vector<8x128xbf16>, vector<128x512xbf16>, vector<8x512xf32> -> vector<8x512xf32>
    %366 = arith.addf %363, %365 : vector<8x512xf32>
    %367 = vector.extract_strided_slice %366 {offsets = [0, 0], sizes = [8, 384], strides = [1, 1]} : vector<8x512xf32> to vector<8x384xf32>
    %cst_97 = arith.constant 5.000000e-01 : f32
    %368 = vector.broadcast %cst_97 : f32 to vector<8x384xf32>
    %369 = arith.mulf %368, %367 : vector<8x384xf32>
    %370 = math.tanh %369 : vector<8x384xf32>
    %cst_98 = arith.constant 5.000000e-01 : f32
    %371 = vector.broadcast %cst_98 : f32 to vector<8x384xf32>
    %372 = arith.mulf %371, %370 : vector<8x384xf32>
    %cst_99 = arith.constant 5.000000e-01 : f32
    %373 = vector.broadcast %cst_99 : f32 to vector<8x384xf32>
    %374 = arith.addf %372, %373 : vector<8x384xf32>
    %375 = vector.extract_strided_slice %374 {offsets = [0, 0], sizes = [8, 128], strides = [1, 1]} : vector<8x384xf32> to vector<8x128xf32>
    %376 = vector.extract_strided_slice %374 {offsets = [0, 128], sizes = [8, 128], strides = [1, 1]} : vector<8x384xf32> to vector<8x128xf32>
    %377 = vector.extract_strided_slice %374 {offsets = [0, 256], sizes = [8, 128], strides = [1, 1]} : vector<8x384xf32> to vector<8x128xf32>
    %378 = vector.extract_strided_slice %366 {offsets = [0, 384], sizes = [8, 128], strides = [1, 1]} : vector<8x512xf32> to vector<8x128xf32>
    %379 = math.tanh %378 : vector<8x128xf32>
    %380 = arith.mulf %376, %336 : vector<8x128xf32>
    %381 = arith.mulf %375, %379 : vector<8x128xf32>
    %382 = arith.addf %380, %381 : vector<8x128xf32>
    %383 = math.tanh %382 : vector<8x128xf32>
    %384 = arith.mulf %377, %383 : vector<8x128xf32>
    %385 = arith.truncf %384 : vector<8x128xf32> to vector<8x128xbf16>
    %c0_100 = arith.constant 0 : index
    %c0_101 = arith.constant 0 : index
    %386 = vector.load %arg7[%c0_100, %c0_101] : memref<128x256xbf16, #tpu.memory_space<vmem>>, vector<128x256xbf16>
    %cst_102 = arith.constant dense<0.000000e+00> : vector<8x256xf32>
    %387 = tpu.matmul %385, %386, %cst_102 {dimension_numbers = #tpu.dot_dimension_numbers<[1], [0], [0], [1], [0, 0, 1, 1], [], []>} : vector<8x128xbf16>, vector<128x256xbf16>, vector<8x256xf32> -> vector<8x256xf32>
    %c0_103 = arith.constant 0 : index
    %c0_104 = arith.constant 0 : index
    %388 = vector.load %arg8[%c0_103, %c0_104] : memref<1x256xf32, #tpu.memory_space<vmem>>, vector<1x256xf32>
    %389 = vector.broadcast %388 : vector<1x256xf32> to vector<8x256xf32>
    %390 = arith.addf %387, %389 : vector<8x256xf32>
    %391 = arith.truncf %390 : vector<8x256xf32> to vector<8x256xbf16>
    %c0_105 = arith.constant 0 : index
    %c0_106 = arith.constant 0 : index
    %392 = vector.load %arg9[%c0_105, %c0_106] : memref<256x128xbf16, #tpu.memory_space<vmem>>, vector<256x128xbf16>
    %cst_107 = arith.constant dense<0.000000e+00> : vector<8x128xf32>
    %393 = tpu.matmul %391, %392, %cst_107 {dimension_numbers = #tpu.dot_dimension_numbers<[1], [0], [0], [1], [0, 0, 1, 1], [], []>} : vector<8x256xbf16>, vector<256x128xbf16>, vector<8x128xf32> -> vector<8x128xf32>
    %c0_108 = arith.constant 0 : index
    %c0_109 = arith.constant 0 : index
    %394 = vector.load %arg10[%c0_108, %c0_109] : memref<1x128xf32, #tpu.memory_space<vmem>>, vector<1x128xf32>
    %395 = vector.broadcast %394 : vector<1x128xf32> to vector<8x128xf32>
    %396 = arith.addf %393, %395 : vector<8x128xf32>
    %c0_110 = arith.constant 0 : index
    %c0_111 = arith.constant 0 : index
    %397 = vector.load %arg11[%c0_110, %c0_111] : memref<8x128xf32, #tpu.memory_space<vmem>>, vector<8x128xf32>
    tpu.vector_store %arg11[%c0_110, %c0_111], %396 {strides = array<i32>} : memref<8x128xf32, #tpu.memory_space<vmem>>, vector<8x128xf32>,
    return
  }
}

</mosaic_0001>

<bundles_post_ra>
// kernel: lstm_forward.1
= control target key start
LH: loop header
LB: loop body
LE: loop exit
PB: predicated region body
PF: predicated region fallthrough
CT: control target
= control target key end

     0   :  { %16 = vsyncpa [#allocation4], 0  ;;  %s6584_s0 = inlined_call_operand.vmem [shape: bf16[64,128], index: 0, kind: input, shape index: {}]   ;;  %s6585_s1 = inlined_call_operand.hbm [shape: bf16[128,512], index: 1, kind: input, shape index: {}]   ;;  %s6586_s2 = inlined_call_operand.hbm [shape: bf16[128,512], index: 2, kind: input, shape index: {}]   ;;  %s6587_s3 = inlined_call_operand.vmem [shape: f32[1,512], index: 3, kind: input, shape index: {}]   ;;  %s6588_s4 = inlined_call_operand.hbm [shape: bf16[128,512], index: 4, kind: input, shape index: {}]   ;;  %s6589_s5 = inlined_call_operand.hbm [shape: bf16[128,512], index: 5, kind: input, shape index: {}]   ;;  %s6590_s6 = inlined_call_operand.vmem [shape: f32[1,512], index: 6, kind: input, shape index: {}]   ;;  %s6591_s7 = inlined_call_operand.hbm [shape: bf16[128,256], index: 7, kind: input, shape index: {}]   ;;  %s6592_s8 = inlined_call_operand.vmem [shape: f32[1,256], index: 8, kind: input, shape index: {}]   ;;  %s6593_s9 = inlined_call_operand.hbm [shape: bf16[256,128], index: 9, kind: input, shape index: {}]   ;;  %s6594_s10 = inlined_call_operand.vmem [shape: f32[1,128], index: 10, kind: input, shape index: {}]   ;;  %s6595_s11 = inlined_call_operand.vmem [shape: f32[8,128], index: 11, kind: output, shape index: {}]  }
   0x1   :  { %17 = vsyncpa [#allocation6], 0 }
   0x2   :  { %18 = vsyncpa [#allocation9], 0 }
   0x3   :  { %19 = vsyncpa [#allocation12], 0  ;;  %s4794_s17 = smov [#allocation5]   ;;  %s4795_s19 = smov [#allocation8]  }
   0x4   :  { %s39_s18 = sshll.u32 %s4794_s17, 4  ;;  %s65_s20 = sshll.u32 %s4795_s19, 4  ;;  %s40_s18 = int_to_ptr.vmem [resolvable:$true] %s39_s18  ;;  %s66_s20 = int_to_ptr.vmem [resolvable:$true] %s65_s20 }
   0x5   :  { %s4674_s21 = scalar_lea.vmem %s40_s18, 4096  ;;  %p4679_p1 = scmp.lt.s32.totalorder %s40_s18, %s40_s18 }
   0x6   :  { %p4675_p0 = scmp.ne.s32.totalorder %s40_s18, %s4674_s21  ;;  %p4680_p2 = scmp.lt.s32.totalorder %s4674_s21, %s4674_s21 }
   0x8   :  { %p4681_p3 = por %p4680_p2, %p4679_p1 }
   0xa   :  { %p4682_p4 = pnand %p4681_p3, %p4675_p0 }
   0xc   :  { %4685 = shalt.err (!%p4682_p4)
}
   0xd   :  { %s4796_s22 = smov 256   ;;  %s4797_s23 = smov 16  }
   0xe   :  { %45 = dma.hbm_to_vmem [thread:$0]  %s6586_s2, 4096, %s40_s18, [#allocation6], %s4796_s22, %s4796_s22, %s4797_s23  }
   0xf   :  { %s4694_s26 = scalar_lea.vmem %s66_s20, 4096  ;;  %p4699_p6 = scmp.lt.s32.totalorder %s66_s20, %s66_s20 }
  0x10   :  { %p4695_p5 = scmp.ne.s32.totalorder %s66_s20, %s4694_s26  ;;  %p4700_p7 = scmp.lt.s32.totalorder %s4694_s26, %s4694_s26 }
  0x12   :  { %p4701_p8 = por %p4700_p7, %p4699_p6 }
  0x14   :  { %p4702_p9 = pnand %p4701_p8, %p4695_p5 }
  0x16   :  { %4705 = shalt.err (!%p4702_p9)
}
  0x17   :  { %71 = dma.hbm_to_vmem [thread:$0]  %s6589_s5, 4096, %s66_s20, [#allocation9], %s4796_s22, %s4796_s22, %s4797_s23  }
  0x18   :  { %s4798_s29 = smov [#allocation3]   ;;  %s4799_s12 = smov [#allocation7]  }
  0x19   :  { %s27_s30 = sshll.u32 %s4798_s29, 4  ;;  %s53_s13 = sshll.u32 %s4799_s12, 4  ;;  %s28_s30 = int_to_ptr.vmem [resolvable:$true] %s27_s30  ;;  %s54_s13 = int_to_ptr.vmem [resolvable:$true] %s53_s13 }
  0x1a   :  { %s4714_s2 = scalar_lea.vmem %s28_s30, 4096  ;;  %p4719_p11 = scmp.lt.s32.totalorder %s28_s30, %s28_s30 }
  0x1b   :  { %p4715_p10 = scmp.ne.s32.totalorder %s28_s30, %s4714_s2  ;;  %p4720_p12 = scmp.lt.s32.totalorder %s4714_s2, %s4714_s2 }
  0x1d   :  { %p4721_p13 = por %p4720_p12, %p4719_p11 }
  0x1f   :  { %p4722_p0 = pnand %p4721_p13, %p4715_p10 }
  0x21   :  { %4725 = shalt.err (!%p4722_p0)
}
  0x22   :  { %33 = dma.hbm_to_vmem [thread:$0]  %s6585_s1, 4096, %s28_s30, [#allocation4], %s4796_s22, %s4796_s22, %s4797_s23  }
  0x23   :  { %s4734_s5 = scalar_lea.vmem %s54_s13, 4096  ;;  %p4739_p2 = scmp.lt.s32.totalorder %s54_s13, %s54_s13 }
  0x24   :  { %p4735_p1 = scmp.ne.s32.totalorder %s54_s13, %s4734_s5  ;;  %p4740_p3 = scmp.lt.s32.totalorder %s4734_s5, %s4734_s5 }
  0x26   :  { %p4741_p4 = por %p4740_p3, %p4739_p2 }
  0x28   :  { %p4742_p5 = pnand %p4741_p4, %p4735_p1 }
  0x2a   :  { %4745 = shalt.err (!%p4742_p5)
}
  0x2b   :  { %59 = dma.hbm_to_vmem [thread:$0]  %s6588_s4, 4096, %s54_s13, [#allocation6], %s4796_s22, %s4796_s22, %s4797_s23  }
  0x2c   :  { %s4800_s18 = smov [#allocation10]  }
  0x2d   :  { %s79_s19 = sshll.u32 %s4800_s18, 4  ;;  %s80_s19 = int_to_ptr.vmem [resolvable:$true] %s79_s19 }
  0x2e   :  { %s4754_s20 = scalar_lea.vmem %s80_s19, 2048  ;;  %p4759_p7 = scmp.lt.s32.totalorder %s80_s19, %s80_s19 }
  0x2f   :  { %p4755_p6 = scmp.ne.s32.totalorder %s80_s19, %s4754_s20  ;;  %p4760_p8 = scmp.lt.s32.totalorder %s4754_s20, %s4754_s20 }
  0x31   :  { %p4761_p9 = por %p4760_p8, %p4759_p7 }
  0x33   :  { %p4762_p10 = pnand %p4761_p9, %p4755_p6 }
  0x35   :  { %4765 = shalt.err (!%p4762_p10)
}
  0x36   :  { %s4801_s1 = smov 128   ;;  %s4802_s21 = smov 8  }
  0x37   :  { %85 = dma.hbm_to_vmem [thread:$0]  %s6591_s7, 2048, %s80_s19, [#allocation9], %s4801_s1, %s4801_s1, %s4802_s21  }
  0x38   :  { %s4803_s26 = smov [#allocation11]  }
  0x39   :  { %s93_s27 = sshll.u32 %s4803_s26, 4  ;;  %s94_s27 = int_to_ptr.vmem [resolvable:$true] %s93_s27 }
  0x3a   :  { %s4774_s4 = scalar_lea.vmem %s94_s27, 2048  ;;  %p4779_p12 = scmp.lt.s32.totalorder %s94_s27, %s94_s27 }
  0x3b   :  { %p4775_p11 = scmp.ne.s32.totalorder %s94_s27, %s4774_s4  ;;  %p4780_p13 = scmp.lt.s32.totalorder %s4774_s4, %s4774_s4 }
  0x3d   :  { %p4781_p0 = por %p4780_p13, %p4779_p12 }
  0x3f   :  { %p4782_p1 = pnand %p4781_p0, %p4775_p11 }
  0x41   :  { %4785 = shalt.err (!%p4782_p1)
}
  0x42   :  { %s4804_s22 = smov 64   ;;  %s4805_s23 = smov 4  }
  0x43   :  { %99 = dma.hbm_to_vmem [thread:$0]  %s6593_s9, 2048, %s94_s27, [#allocation12], %s4804_s22, %s4804_s22, %s4805_s23  }
  0x44   :  { %4786 = dma.done.wait [#allocation4], 4096  }
  0x45   :  { %4787 = vsyncadd [#allocation4], 4294963200 }
  0x46   :  { %4788 = dma.done.wait [#allocation6], 8192  }
  0x47   :  { %4789 = vsyncadd [#allocation6], 4294959104 }
  0x48   :  { %4790 = dma.done.wait [#allocation9], 6144  }
  0x49   :  { %4791 = vsyncadd [#allocation9], 4294961152 }
  0x4a   :  { %4792 = dma.done.wait [#allocation12], 2048  }
  0x4b   :  { %4793 = vsyncadd [#allocation12], 4294965248  ;;  %v6620_v0 = vmov 0   ;;  %v4078_v1 = vld [vmem:[#allocation3 + $0xe4] ss:$16 sps:$4 sm:$0xff]   ;;  %v4139_v44 = vld [vmem:[%s6584_s0 + $0x8] sm:$0xff]  }
  0x4c   :  { %399 = vmatprep.mubr.bf16.mxu0 %v6620_v0  ;;  %472 = vmatprep.mubr.bf16.mxu1 %v6620_v0  ;;  %v4080_v2 = vld [vmem:[#allocation3 + $0xec] ss:$16 sps:$4 sm:$0xff]   ;;  %v4082_v3 = vld [vmem:[#allocation3 + $0xe0] ss:$16 sps:$4 sm:$0xff]   ;;  %v4083_v4 = vld [vmem:[#allocation3 + $0xe8] ss:$16 sps:$4 sm:$0xff]  }
  0x4d   :  { %367 = vmatprep.subr.bf16.mxu0 %v4078_v1  ;;  %440 = vmatprep.subr.bf16.mxu1 %v4080_v2  ;;  %v4084_v5 = vld [vmem:[#allocation3 + $0xc4] ss:$16 sps:$4 sm:$0xff]   ;;  %v4086_v6 = vld [vmem:[#allocation3 + $0xcc] ss:$16 sps:$4 sm:$0xff]   ;;  %v4088_v7 = vld [vmem:[#allocation3 + $0xc0] ss:$16 sps:$4 sm:$0xff]  }
  0x4e   :  { %368 = vmatpush1.bf16.msra.mxu0 %v4082_v3  ;;  %441 = vmatpush1.bf16.msra.mxu1 %v4083_v4  ;;  %v4089_v8 = vld [vmem:[#allocation3 + $0xc8] ss:$16 sps:$4 sm:$0xff]   ;;  %v4090_v9 = vld [vmem:[#allocation3 + $0xa4] ss:$16 sps:$4 sm:$0xff]   ;;  %v4092_v10 = vld [vmem:[#allocation3 + $0xac] ss:$16 sps:$4 sm:$0xff]  }
  0x4f   :  { %369 = vmatprep.subr.bf16.mxu0 %v4084_v5  ;;  %442 = vmatprep.subr.bf16.mxu1 %v4086_v6  ;;  %v4094_v11 = vld [vmem:[#allocation3 + $0xa0] ss:$16 sps:$4 sm:$0xff]   ;;  %v4095_v12 = vld [vmem:[#allocation3 + $0xa8] ss:$16 sps:$4 sm:$0xff]   ;;  %v4096_v13 = vld [vmem:[#allocation3 + $0x84] ss:$16 sps:$4 sm:$0xff]  }
  0x50   :  { %v4098_v14 = vld [vmem:[#allocation3 + $0x8c] ss:$16 sps:$4 sm:$0xff]   ;;  %v4100_v15 = vld [vmem:[#allocation3 + $0x80] ss:$16 sps:$4 sm:$0xff]   ;;  %v4101_v16 = vld [vmem:[#allocation3 + $0x88] ss:$16 sps:$4 sm:$0xff]  }
  0x51   :  { %v4102_v17 = vld [vmem:[#allocation3 + $0x64] ss:$16 sps:$4 sm:$0xff]   ;;  %v4104_v18 = vld [vmem:[#allocation3 + $0x6c] ss:$16 sps:$4 sm:$0xff]   ;;  %v4106_v19 = vld [vmem:[#allocation3 + $0x60] ss:$16 sps:$4 sm:$0xff]  }
  0x52   :  { %370 = vmatpush1.bf16.msra.mxu0 %v4088_v7  ;;  %443 = vmatpush1.bf16.msra.mxu1 %v4089_v8  ;;  %v4107_v20 = vld [vmem:[#allocation3 + $0x68] ss:$16 sps:$4 sm:$0xff]   ;;  %v4108_v21 = vld [vmem:[#allocation3 + $0x44] ss:$16 sps:$4 sm:$0xff]   ;;  %v4110_v22 = vld [vmem:[#allocation3 + $0x4c] ss:$16 sps:$4 sm:$0xff]  }
  0x53   :  { %371 = vmatprep.subr.bf16.mxu0 %v4090_v9  ;;  %444 = vmatprep.subr.bf16.mxu1 %v4092_v10  ;;  %v4112_v23 = vld [vmem:[#allocation3 + $0x40] ss:$16 sps:$4 sm:$0xff]   ;;  %v4113_v24 = vld [vmem:[#allocation3 + $0x48] ss:$16 sps:$4 sm:$0xff]   ;;  %v4114_v25 = vld [vmem:[#allocation3 + $0x24] ss:$16 sps:$4 sm:$0xff]  }
  0x54   :  { %v4116_v26 = vld [vmem:[#allocation3 + $0x2c] ss:$16 sps:$4 sm:$0xff]   ;;  %v4118_v27 = vld [vmem:[#allocation3 + $0x20] ss:$16 sps:$4 sm:$0xff]   ;;  %v4119_v28 = vld [vmem:[#allocation3 + $0x28] ss:$16 sps:$4 sm:$0xff]  }
  0x55   :  { %v4120_v29 = vld [vmem:[#allocation3 + $0x4] ss:$16 sps:$4 sm:$0xff]   ;;  %v4122_v30 = vld [vmem:[#allocation3 + $0xc] ss:$16 sps:$4 sm:$0xff]   ;;  %v4124_v31 = vld [vmem:[#allocation3] ss:$16 sps:$4 sm:$0xff]  }
  0x56   :  { %372 = vmatpush1.bf16.msra.mxu0 %v4094_v11  ;;  %445 = vmatpush1.bf16.msra.mxu1 %v4095_v12  ;;  %v4125_v32 = vld [vmem:[#allocation3 + $0x8] ss:$16 sps:$4 sm:$0xff]   ;;  %v4899_v33 = vld [vmem:[#allocation5 + $0xe4] ss:$16 sps:$4 sm:$0xff]   ;;  %v4901_v34 = vld [vmem:[#allocation5 + $0xec] ss:$16 sps:$4 sm:$0xff]  }
  0x57   :  { %373 = vmatprep.subr.bf16.mxu0 %v4096_v13  ;;  %446 = vmatprep.subr.bf16.mxu1 %v4098_v14  ;;  %v4126_v35 = vld [vmem:[%s6584_s0] sm:$0xff]   ;;  %v4908_v37 = vld [vmem:[#allocation5 + $0xe8] ss:$16 sps:$4 sm:$0xff]   ;;  %v4914_v39 = vld [vmem:[#allocation5 + $0xcc] ss:$16 sps:$4 sm:$0xff]  }
  0x58   :  { %v4906_v36 = vld [vmem:[#allocation5 + $0xe0] ss:$16 sps:$4 sm:$0xff]   ;;  %v4912_v38 = vld [vmem:[#allocation5 + $0xc4] ss:$16 sps:$4 sm:$0xff]   ;;  %v4920_v41 = vld [vmem:[#allocation5 + $0xc8] ss:$16 sps:$4 sm:$0xff]  }
  0x59   :  { %v4916_v40 = vld [vmem:[#allocation5 + $0xc0] ss:$16 sps:$4 sm:$0xff]   ;;  %v4924_v42 = vld [vmem:[#allocation5 + $0xa4] ss:$16 sps:$4 sm:$0xff]   ;;  %v4926_v43 = vld [vmem:[#allocation5 + $0xac] ss:$16 sps:$4 sm:$0xff]  }
  0x5a   :  { %374 = vmatpush1.bf16.msra.mxu0 %v4100_v15  ;;  %447 = vmatpush1.bf16.msra.mxu1 %v4101_v16  ;;  %v4933_v45 = vld [vmem:[#allocation5 + $0xa0] ss:$16 sps:$4 sm:$0xff]   ;;  %v4935_v46 = vld [vmem:[#allocation5 + $0xa8] ss:$16 sps:$4 sm:$0xff]   ;;  %v4939_v47 = vld [vmem:[#allocation5 + $0x84] ss:$16 sps:$4 sm:$0xff]  }
  0x5b   :  { %375 = vmatprep.subr.bf16.mxu0 %v4102_v17  ;;  %448 = vmatprep.subr.bf16.mxu1 %v4104_v18  ;;  %v4943_v48 = vld [vmem:[#allocation5 + $0x8c] ss:$16 sps:$4 sm:$0xff]   ;;  %v4945_v49 = vld [vmem:[#allocation5 + $0x80] ss:$16 sps:$4 sm:$0xff]   ;;  %v4947_v50 = vld [vmem:[#allocation5 + $0x88] ss:$16 sps:$4 sm:$0xff]  }
  0x5c   :  { %v4951_v51 = vld [vmem:[#allocation5 + $0x64] ss:$16 sps:$4 sm:$0xff]   ;;  %v4955_v52 = vld [vmem:[#allocation5 + $0x6c] ss:$16 sps:$4 sm:$0xff]   ;;  %v4962_v54 = vld [vmem:[#allocation5 + $0x60] ss:$16 sps:$4 sm:$0xff]  }
  0x5d   :  { %v4152_v53 = vld [vmem:[%s6584_s0 + $0x10] sm:$0xff]   ;;  %v4964_v55 = vld [vmem:[#allocation5 + $0x68] ss:$16 sps:$4 sm:$0xff]   ;;  %v4968_v57 = vld [vmem:[#allocation5 + $0x4c] ss:$16 sps:$4 sm:$0xff]  }
  0x5e   :  { %376 = vmatpush1.bf16.msra.mxu0 %v4106_v19  ;;  %449 = vmatpush1.bf16.msra.mxu1 %v4107_v20  ;;  %v4966_v56 = vld [vmem:[#allocation5 + $0x44] ss:$16 sps:$4 sm:$0xff]   ;;  %v4974_v58 = vld [vmem:[#allocation5 + $0x40] ss:$16 sps:$4 sm:$0xff]   ;;  %v4976_v59 = vld [vmem:[#allocation5 + $0x48] ss:$16 sps:$4 sm:$0xff]  }
  0x5f   :  { %377 = vmatprep.subr.bf16.mxu0 %v4108_v21  ;;  %450 = vmatprep.subr.bf16.mxu1 %v4110_v22  ;;  %v4978_v60 = vld [vmem:[#allocation5 + $0x24] ss:$16 sps:$4 sm:$0xff]   ;;  %v4980_v61 = vld [vmem:[#allocation5 + $0x2c] ss:$16 sps:$4 sm:$0xff]   ;;  %v4991_v63 = vld [vmem:[#allocation5 + $0x20] ss:$16 sps:$4 sm:$0xff]  }
  0x60   :  { %v4165_v62 = vld [vmem:[%s6584_s0 + $0x18] sm:$0xff]   ;;  %v4995_v2 = vld [vmem:[#allocation5 + $0x4] ss:$16 sps:$4 sm:$0xff]   ;;  %v5003_v4 = vld [vmem:[#allocation5] ss:$16 sps:$4 sm:$0xff]  }
  0x61   :  { %v4993_v1 = vld [vmem:[#allocation5 + $0x28] ss:$16 sps:$4 sm:$0xff]   ;;  %v4997_v3 = vld [vmem:[#allocation5 + $0xc] ss:$16 sps:$4 sm:$0xff]   ;;  %v5019_v6 = vld [vmem:[#allocation8 + $0xe4] ss:$16 sps:$4 sm:$0xff]  }
  0x62   :  { %378 = vmatpush1.bf16.msra.mxu0 %v4112_v23  ;;  %451 = vmatpush1.bf16.msra.mxu1 %v4113_v24  ;;  %v5005_v5 = vld [vmem:[#allocation5 + $0x8] ss:$16 sps:$4 sm:$0xff]   ;;  %v5021_v7 = vld [vmem:[#allocation8 + $0xe0] ss:$16 sps:$4 sm:$0xff]   ;;  %v5025_v8 = vld [vmem:[#allocation8 + $0xc4] ss:$16 sps:$4 sm:$0xff]  }
  0x63   :  { %379 = vmatprep.subr.bf16.mxu0 %v4114_v25  ;;  %452 = vmatprep.subr.bf16.mxu1 %v4116_v26  ;;  %v5027_v9 = vld [vmem:[#allocation8 + $0xec] ss:$16 sps:$4 sm:$0xff]   ;;  %v5029_v10 = vld [vmem:[#allocation8 + $0xc0] ss:$16 sps:$4 sm:$0xff]   ;;  %v5032_v11 = vld [vmem:[#allocation8 + $0xe8] ss:$16 sps:$4 sm:$0xff]  }
  0x64   :  { %v5037_v12 = vld [vmem:[#allocation8 + $0xa4] ss:$16 sps:$4 sm:$0xff]   ;;  %v5039_v13 = vld [vmem:[#allocation8 + $0xcc] ss:$16 sps:$4 sm:$0xff]   ;;  %v5041_v14 = vld [vmem:[#allocation8 + $0xa0] ss:$16 sps:$4 sm:$0xff]  }
  0x65   :  { %v5044_v15 = vld [vmem:[#allocation8 + $0xc8] ss:$16 sps:$4 sm:$0xff]   ;;  %v5049_v16 = vld [vmem:[#allocation8 + $0x84] ss:$16 sps:$4 sm:$0xff]   ;;  %v5051_v17 = vld [vmem:[#allocation8 + $0xac] ss:$16 sps:$4 sm:$0xff]  }
  0x66   :  { %380 = vmatpush1.bf16.msra.mxu0 %v4118_v27  ;;  %453 = vmatpush1.bf16.msra.mxu1 %v4119_v28  ;;  %6883 = vst [vmem:[#allocation17_spill] sm:$0xff] %v5049_v16  ;;  %v5053_v18 = vld [vmem:[#allocation8 + $0x80] ss:$16 sps:$4 sm:$0xff]   ;;  %v5056_v19 = vld [vmem:[#allocation8 + $0xa8] ss:$16 sps:$4 sm:$0xff]  }
  0x67   :  { %381 = vmatprep.subr.bf16.mxu0 %v4120_v29  ;;  %454 = vmatprep.subr.bf16.mxu1 %v4122_v30  ;;  %6884 = vst [vmem:[#allocation18_spill] sm:$0xff] %v5053_v18  ;;  %6885 = vst [vmem:[#allocation19_spill] sm:$0xff] %v5056_v19  ;;  %v5061_v20 = vld [vmem:[#allocation8 + $0x64] ss:$16 sps:$4 sm:$0xff]   ;;  %v5063_v21 = vld [vmem:[#allocation8 + $0x8c] ss:$16 sps:$4 sm:$0xff]  }
  0x68   :  { %6886 = vst [vmem:[#allocation20_spill] sm:$0xff] %v5061_v20  ;;  %6887 = vst [vmem:[#allocation21_spill] sm:$0xff] %v5063_v21  ;;  %v5065_v22 = vld [vmem:[#allocation8 + $0x60] ss:$16 sps:$4 sm:$0xff]   ;;  %v5068_v23 = vld [vmem:[#allocation8 + $0x88] ss:$16 sps:$4 sm:$0xff]  }
  0x69   :  { %6888 = vst [vmem:[#allocation22_spill] sm:$0xff] %v5065_v22  ;;  %6889 = vst [vmem:[#allocation23_spill] sm:$0xff] %v5068_v23  ;;  %v5073_v24 = vld [vmem:[#allocation8 + $0x44] ss:$16 sps:$4 sm:$0xff]   ;;  %v5075_v25 = vld [vmem:[#allocation8 + $0x6c] ss:$16 sps:$4 sm:$0xff]  }
  0x6a   :  { %382 = vmatpush1.bf16.msra.mxu0 %v4124_v31  ;;  %455 = vmatpush1.bf16.msra.mxu1 %v4125_v32  ;;  %6890 = vst [vmem:[#allocation24_spill] sm:$0xff] %v5073_v24  ;;  %6891 = vst [vmem:[#allocation25_spill] sm:$0xff] %v5075_v25  ;;  %v5077_v26 = vld [vmem:[#allocation8 + $0x40] ss:$16 sps:$4 sm:$0xff]   ;;  %v5080_v27 = vld [vmem:[#allocation8 + $0x68] ss:$16 sps:$4 sm:$0xff]  }
  0x6b   :  { %827 = vmatprep.subr.bf16.mxu0 %v4899_v33  ;;  %868 = vmatprep.subr.bf16.mxu1 %v4901_v34  ;;  %6892 = vst [vmem:[#allocation26_spill] sm:$0xff] %v5077_v26  ;;  %6893 = vst [vmem:[#allocation27_spill] sm:$0xff] %v5080_v27  ;;  %v5085_v28 = vld [vmem:[#allocation8 + $0x24] ss:$16 sps:$4 sm:$0xff]   ;;  %v5087_v29 = vld [vmem:[#allocation8 + $0x4c] ss:$16 sps:$4 sm:$0xff]  }
  0x6c   :  { %6894 = vst [vmem:[#allocation28_spill] sm:$0xff] %v5085_v28  ;;  %6895 = vst [vmem:[#allocation29_spill] sm:$0xff] %v5087_v29  ;;  %v5089_v30 = vld [vmem:[#allocation8 + $0x20] ss:$16 sps:$4 sm:$0xff]   ;;  %v5092_v31 = vld [vmem:[#allocation8 + $0x48] ss:$16 sps:$4 sm:$0xff]  }
  0x6d   :  { %400 = vmatmul.mubr.bf16.vlgmr.msra.gmra.mxu0 %v4126_v35  ;;  %473 = vmatmul.mubr.bf16.vlgmr.msra.gmra.mxu1 %v4126_v35  ;;  %6896 = vst [vmem:[#allocation30_spill] sm:$0xff] %v5089_v30  ;;  %6897 = vst [vmem:[#allocation31_spill] sm:$0xff] %v5092_v31  ;;  %v5097_v32 = vld [vmem:[#allocation8 + $0x4] ss:$16 sps:$4 sm:$0xff]   ;;  %v5099_v35 = vld [vmem:[#allocation8 + $0x2c] ss:$16 sps:$4 sm:$0xff]  }
  0x6e   :  { %828 = vmatpush1.bf16.msra.mxu0 %v4906_v36  ;;  %869 = vmatpush1.bf16.msra.mxu1 %v4908_v37  ;;  %6898 = vst [vmem:[#allocation32_spill] sm:$0xff] %v5097_v32  ;;  %6899 = vst [vmem:[#allocation33_spill] sm:$0xff] %v5099_v35 }
  0x6f   :  { %829 = vmatprep.subr.bf16.mxu0 %v4912_v38  ;;  %870 = vmatprep.subr.bf16.mxu1 %v4914_v39 }
  0x70   :  { %409 = vmatprep.mubr.bf16.mxu0 %v6620_v0  ;;  %482 = vmatprep.mubr.bf16.mxu1 %v6620_v0 }
  0x72   :  { %830 = vmatpush1.bf16.msra.mxu0 %v4916_v40  ;;  %871 = vmatpush1.bf16.msra.mxu1 %v4920_v41 }
  0x73   :  { %831 = vmatprep.subr.bf16.mxu0 %v4924_v42  ;;  %872 = vmatprep.subr.bf16.mxu1 %v4926_v43 }
  0x75   :  { %410 = vmatmul.mubr.bf16.gmra.mxu0 %v4139_v44  ;;  %483 = vmatmul.mubr.bf16.gmra.mxu1 %v4139_v44  ;;  %v5101_v44 = vld [vmem:[#allocation8] ss:$16 sps:$4 sm:$0xff]  }
  0x76   :  { %832 = vmatpush1.bf16.msra.mxu0 %v4933_v45  ;;  %873 = vmatpush1.bf16.msra.mxu1 %v4935_v46  ;;  %6900 = vst [vmem:[#allocation34_spill] sm:$0xff] %v5101_v44 }
  0x77   :  { %833 = vmatprep.subr.bf16.mxu0 %v4939_v47  ;;  %874 = vmatprep.subr.bf16.mxu1 %v4943_v48 }
  0x78   :  { %419 = vmatprep.mubr.bf16.mxu0 %v6620_v0  ;;  %492 = vmatprep.mubr.bf16.mxu1 %v6620_v0 }
  0x7a   :  { %834 = vmatpush1.bf16.msra.mxu0 %v4945_v49  ;;  %875 = vmatpush1.bf16.msra.mxu1 %v4947_v50 }
  0x7b   :  { %835 = vmatprep.subr.bf16.mxu0 %v4951_v51  ;;  %876 = vmatprep.subr.bf16.mxu1 %v4955_v52 }
  0x7d   :  { %420 = vmatmul.mubr.bf16.gmra.mxu0 %v4152_v53  ;;  %493 = vmatmul.mubr.bf16.gmra.mxu1 %v4152_v53  ;;  %v5104_v53 = vld [vmem:[#allocation8 + $0x28] ss:$16 sps:$4 sm:$0xff]  }
  0x7e   :  { %836 = vmatpush1.bf16.msra.mxu0 %v4962_v54  ;;  %877 = vmatpush1.bf16.msra.mxu1 %v4964_v55  ;;  %6901 = vst [vmem:[#allocation35_spill] sm:$0xff] %v5104_v53 }
  0x7f   :  { %837 = vmatprep.subr.bf16.mxu0 %v4966_v56  ;;  %878 = vmatprep.subr.bf16.mxu1 %v4968_v57 }
  0x80   :  { %429 = vmatprep.mubr.bf16.mxu0 %v6620_v0  ;;  %502 = vmatprep.mubr.bf16.mxu1 %v6620_v0 }
  0x82   :  { %838 = vmatpush1.bf16.msra.mxu0 %v4974_v58  ;;  %879 = vmatpush1.bf16.msra.mxu1 %v4976_v59 }
  0x83   :  { %839 = vmatprep.subr.bf16.mxu0 %v4978_v60  ;;  %880 = vmatprep.subr.bf16.mxu1 %v4980_v61 }
  0x85   :  { %430 = vmatmul.mubr.bf16.gmra.mxu0 %v4165_v62  ;;  %503 = vmatmul.mubr.bf16.gmra.mxu1 %v4165_v62  ;;  %v5109_v62 = vld [vmem:[#allocation8 + $0xc] ss:$16 sps:$4 sm:$0xff]  }
  0x86   :  { %840 = vmatpush1.bf16.msra.mxu0 %v4991_v63  ;;  %881 = vmatpush1.bf16.msra.mxu1 %v4993_v1  ;;  %6902 = vst [vmem:[#allocation36_spill] sm:$0xff] %v5109_v62 }
  0x87   :  { %841 = vmatprep.subr.bf16.mxu0 %v4995_v2  ;;  %882 = vmatprep.subr.bf16.mxu1 %v4997_v3 }
  0x88   :  { %859 = vmatprep.mubr.bf16.mxu0 %v6620_v0  ;;  %900 = vmatprep.mubr.bf16.mxu1 %v6620_v0 }
  0x8a   :  { %842 = vmatpush1.bf16.msra.mxu0 %v5003_v4  ;;  %883 = vmatpush1.bf16.msra.mxu1 %v5005_v5 }
  0x8b   :  { %1091 = vmatprep.subr.bf16.mxu0 %v5019_v6  ;;  %1132 = vmatprep.subr.bf16.mxu1 %v5027_v9 }
  0x8d   :  { %860 = vmatmul.mubr.bf16.vlgmr.msra.gmra.mxu0 %v6620_v0  ;;  %901 = vmatmul.mubr.bf16.vlgmr.msra.gmra.mxu1 %v6620_v0 }
  0x8e   :  { %1123 = vmatprep.mubr.bf16.mxu0 %v6620_v0  ;;  %1164 = vmatprep.mubr.bf16.mxu1 %v6620_v0 }
  0x8f   :  { %1092 = vmatpush1.bf16.msra.mxu0 %v5021_v7  ;;  %1133 = vmatpush1.bf16.msra.mxu1 %v5032_v11 }
  0x90   :  { %1093 = vmatprep.subr.bf16.mxu0 %v5025_v8  ;;  %1134 = vmatprep.subr.bf16.mxu1 %v5039_v13 }
  0x93   :  { %1094 = vmatpush1.bf16.msra.mxu0 %v5029_v10  ;;  %1135 = vmatpush1.bf16.msra.mxu1 %v5044_v15 }
  0x94   :  { %1095 = vmatprep.subr.bf16.mxu0 %v5037_v12  ;;  %1136 = vmatprep.subr.bf16.mxu1 %v5051_v17 }
  0x97   :  { %1096 = vmatpush1.bf16.msra.mxu0 %v5041_v14  ;;  %1137 = vmatpush1.bf16.msra.mxu1 %v5056_v19 }
  0x98   :  { %1097 = vmatprep.subr.bf16.mxu0 %v5049_v16  ;;  %1138 = vmatprep.subr.bf16.mxu1 %v5063_v21 }
  0x9b   :  { %1098 = vmatpush1.bf16.msra.mxu0 %v5053_v18  ;;  %1139 = vmatpush1.bf16.msra.mxu1 %v5068_v23 }
  0x9c   :  { %1099 = vmatprep.subr.bf16.mxu0 %v5061_v20  ;;  %1140 = vmatprep.subr.bf16.mxu1 %v5075_v25 }
  0x9f   :  { %1100 = vmatpush1.bf16.msra.mxu0 %v5065_v22  ;;  %1141 = vmatpush1.bf16.msra.mxu1 %v5080_v27 }
  0xa0   :  { %1101 = vmatprep.subr.bf16.mxu0 %v5073_v24  ;;  %1142 = vmatprep.subr.bf16.mxu1 %v5087_v29 }
  0xa3   :  { %1102 = vmatpush1.bf16.msra.mxu0 %v5077_v26  ;;  %1143 = vmatpush1.bf16.msra.mxu1 %v5092_v31  ;;  %v5137_v31 = vld [vmem:[#allocation7 + $0xc8] ss:$16 sps:$4 sm:$0xff]  }
  0xa4   :  { %1103 = vmatprep.subr.bf16.mxu0 %v5085_v28  ;;  %1144 = vmatprep.subr.bf16.mxu1 %v5099_v35  ;;  %v5119_v28 = vld [vmem:[#allocation7 + $0xec] ss:$16 sps:$4 sm:$0xff]   ;;  %v5121_v35 = vld [vmem:[#allocation7 + $0xe0] ss:$16 sps:$4 sm:$0xff]   ;;  %6911 = vst [vmem:[#allocation45_spill] sm:$0xff] %v5137_v31 }
  0xa5   :  { %6905 = vst [vmem:[#allocation39_spill] sm:$0xff] %v5119_v28  ;;  %6906 = vst [vmem:[#allocation40_spill] sm:$0xff] %v5121_v35 }
  0xa7   :  { %1104 = vmatpush1.bf16.msra.mxu0 %v5089_v30  ;;  %1145 = vmatpush1.bf16.msra.mxu1 %v5104_v53  ;;  %v5112_v30 = vld [vmem:[#allocation8 + $0x8] ss:$16 sps:$4 sm:$0xff]   ;;  %v5135_v53 = vld [vmem:[#allocation7 + $0xc0] ss:$16 sps:$4 sm:$0xff]  }
  0xa8   :  { %1105 = vmatprep.subr.bf16.mxu0 %v5097_v32  ;;  %6903 = vst [vmem:[#allocation37_spill] sm:$0xff] %v5112_v30  ;;  %1146 = vmatprep.subr.bf16.mxu1 %v5109_v62  ;;  %v5117_v32 = vld [vmem:[#allocation7 + $0xe4] ss:$16 sps:$4 sm:$0xff]   ;;  %6910 = vst [vmem:[#allocation44_spill] sm:$0xff] %v5135_v53 }
  0xa9   :  { %6904 = vst [vmem:[#allocation38_spill] sm:$0xff] %v5117_v32  ;;  %v5130_v62 = vld [vmem:[#allocation7 + $0xc4] ss:$16 sps:$4 sm:$0xff]  }
  0xaa   :  { %6908 = vst [vmem:[#allocation42_spill] sm:$0xff] %v5130_v62 }
  0xab   :  { %1106 = vmatpush1.bf16.msra.mxu0 %v5101_v44  ;;  %1147 = vmatpush1.bf16.msra.mxu1 %v5112_v30  ;;  %v5123_v44 = vld [vmem:[#allocation7 + $0xe8] ss:$16 sps:$4 sm:$0xff]   ;;  %v5132_v30 = vld [vmem:[#allocation7 + $0xcc] ss:$16 sps:$4 sm:$0xff]  }
  0xac   :  { %6907 = vst [vmem:[#allocation41_spill] sm:$0xff] %v5123_v44  ;;  %1338 = vmatprep.subr.bf16.mxu0 %v5117_v32  ;;  %1379 = vmatprep.subr.bf16.mxu1 %v5119_v28  ;;  %6909 = vst [vmem:[#allocation43_spill] sm:$0xff] %v5132_v30  ;;  %v5147_v28 = vld [vmem:[#allocation7 + $0xa0] ss:$16 sps:$4 sm:$0xff]   ;;  %v5149_v32 = vld [vmem:[#allocation7 + $0xa8] ss:$16 sps:$4 sm:$0xff]  }
  0xad   :  { %6914 = vst [vmem:[#allocation48_spill] sm:$0xff] %v5147_v28  ;;  %6915 = vst [vmem:[#allocation49_spill] sm:$0xff] %v5149_v32 }
  0xae   :  { %1124 = vmatmul.mubr.bf16.vlgmr.msra.gmra.mxu0 %v6620_v0  ;;  %1165 = vmatmul.mubr.bf16.vlgmr.msra.gmra.mxu1 %v6620_v0 }
  0xaf   :  { %1370 = vmatprep.mubr.bf16.mxu0 %v6620_v0  ;;  %1339 = vmatpush1.bf16.msra.mxu0 %v5121_v35  ;;  %v5143_v35 = vld [vmem:[#allocation7 + $0xa4] ss:$16 sps:$4 sm:$0xff]  }
  0xb0   :  { %1380 = vmatpush1.bf16.msra.mxu1 %v5123_v44  ;;  %1411 = vmatprep.mubr.bf16.mxu1 %v6620_v0  ;;  %6912 = vst [vmem:[#allocation46_spill] sm:$0xff] %v5143_v35  ;;  %v5145_v44 = vld [vmem:[#allocation7 + $0xac] ss:$16 sps:$4 sm:$0xff]   ;;  %v5155_v0 = vld [vmem:[#allocation7 + $0x84] ss:$16 sps:$4 sm:$0xff]  }
  0xb1   :  { %1340 = vmatprep.subr.bf16.mxu0 %v5130_v62  ;;  %1381 = vmatprep.subr.bf16.mxu1 %v5132_v30  ;;  %6913 = vst [vmem:[#allocation47_spill] sm:$0xff] %v5145_v44  ;;  %6916 = vst [vmem:[#allocation50_spill] sm:$0xff] %v5155_v0  ;;  %v5161_v30 = vld [vmem:[#allocation7 + $0x88] ss:$16 sps:$4 sm:$0xff]   ;;  %v5165_v62 = vld [vmem:[#allocation7 + $0x64] ss:$16 sps:$4 sm:$0xff]  }
  0xb2   :  { %6919 = vst [vmem:[#allocation53_spill] sm:$0xff] %v5161_v30  ;;  %6920 = vst [vmem:[#allocation54_spill] sm:$0xff] %v5165_v62 }
  0xb3   :  { %1341 = vmatpush1.bf16.msra.mxu0 %v5135_v53  ;;  %v5157_v53 = vld [vmem:[#allocation7 + $0x8c] ss:$16 sps:$4 sm:$0xff]  }
  0xb4   :  { %1382 = vmatpush1.bf16.msra.mxu1 %v5137_v31  ;;  %1342 = vmatprep.subr.bf16.mxu0 %v5143_v35  ;;  %6917 = vst [vmem:[#allocation51_spill] sm:$0xff] %v5157_v53  ;;  %v5159_v31 = vld [vmem:[#allocation7 + $0x80] ss:$16 sps:$4 sm:$0xff]   ;;  %v5167_v35 = vld [vmem:[#allocation7 + $0x6c] ss:$16 sps:$4 sm:$0xff]  }
  0xb5   :  { %1383 = vmatprep.subr.bf16.mxu1 %v5145_v44  ;;  %6918 = vst [vmem:[#allocation52_spill] sm:$0xff] %v5159_v31  ;;  %6921 = vst [vmem:[#allocation55_spill] sm:$0xff] %v5167_v35  ;;  %v5176_v44 = vld [vmem:[#allocation7 + $0x44] ss:$16 sps:$4 sm:$0xff]  }
  0xb6   :  { %6924 = vst [vmem:[#allocation58_spill] sm:$0xff] %v5176_v44 }
  0xb7   :  { %1343 = vmatpush1.bf16.msra.mxu0 %v5147_v28  ;;  %v5170_v28 = vld [vmem:[#allocation7 + $0x60] ss:$16 sps:$4 sm:$0xff]  }
  0xb8   :  { %1384 = vmatpush1.bf16.msra.mxu1 %v5149_v32  ;;  %1344 = vmatprep.subr.bf16.mxu0 %v5155_v0  ;;  %6922 = vst [vmem:[#allocation56_spill] sm:$0xff] %v5170_v28  ;;  %v5174_v32 = vld [vmem:[#allocation7 + $0x68] ss:$16 sps:$4 sm:$0xff]   ;;  %v5179_v0 = vld [vmem:[#allocation7 + $0x4c] ss:$16 sps:$4 sm:$0xff]  }
  0xb9   :  { %1385 = vmatprep.subr.bf16.mxu1 %v5157_v53  ;;  %6923 = vst [vmem:[#allocation57_spill] sm:$0xff] %v5174_v32  ;;  %6925 = vst [vmem:[#allocation59_spill] sm:$0xff] %v5179_v0  ;;  %v5182_v53 = vld [vmem:[#allocation7 + $0x40] ss:$16 sps:$4 sm:$0xff]  }
  0xba   :  { %6926 = vst [vmem:[#allocation60_spill] sm:$0xff] %v5182_v53 }
  0xbb   :  { %1345 = vmatpush1.bf16.msra.mxu0 %v5159_v31  ;;  %v5186_v31 = vld [vmem:[#allocation7 + $0x48] ss:$16 sps:$4 sm:$0xff]  }
  0xbc   :  { %1386 = vmatpush1.bf16.msra.mxu1 %v5161_v30  ;;  %1346 = vmatprep.subr.bf16.mxu0 %v5165_v62  ;;  %6927 = vst [vmem:[#allocation61_spill] sm:$0xff] %v5186_v31  ;;  %v5188_v30 = vld [vmem:[#allocation7 + $0x24] ss:$16 sps:$4 sm:$0xff]   ;;  %v5191_v62 = vld [vmem:[#allocation7 + $0x2c] ss:$16 sps:$4 sm:$0xff]  }
  0xbd   :  { %1387 = vmatprep.subr.bf16.mxu1 %v5167_v35  ;;  %6928 = vst [vmem:[#allocation62_spill] sm:$0xff] %v5188_v30  ;;  %6929 = vst [vmem:[#allocation63_spill] sm:$0xff] %v5191_v62  ;;  %v5194_v35 = vld [vmem:[#allocation7 + $0x20] ss:$16 sps:$4 sm:$0xff]  }
  0xbe   :  { %6930 = vst [vmem:[#allocation64_spill] sm:$0xff] %v5194_v35 }
  0xbf   :  { %1347 = vmatpush1.bf16.msra.mxu0 %v5170_v28  ;;  %v5198_v28 = vld [vmem:[#allocation7 + $0x28] ss:$16 sps:$4 sm:$0xff]  }
  0xc0   :  { %1388 = vmatpush1.bf16.msra.mxu1 %v5174_v32  ;;  %1348 = vmatprep.subr.bf16.mxu0 %v5176_v44  ;;  %6931 = vst [vmem:[#allocation65_spill] sm:$0xff] %v5198_v28  ;;  %v5200_v32 = vld [vmem:[#allocation7 + $0x4] ss:$16 sps:$4 sm:$0xff]   ;;  %v5203_v44 = vld [vmem:[#allocation7 + $0xc] ss:$16 sps:$4 sm:$0xff]  }
  0xc1   :  { %1389 = vmatprep.subr.bf16.mxu1 %v5179_v0  ;;  %6932 = vst [vmem:[#allocation66_spill] sm:$0xff] %v5200_v32  ;;  %6933 = vst [vmem:[#allocation67_spill] sm:$0xff] %v5203_v44  ;;  %v5206_v0 = vld [vmem:[#allocation7] ss:$16 sps:$4 sm:$0xff]  }
  0xc2   :  { %6934 = vst [vmem:[#allocation68_spill] sm:$0xff] %v5206_v0 }
  0xc3   :  { %1349 = vmatpush1.bf16.msra.mxu0 %v5182_v53  ;;  %v5210_v53 = vld [vmem:[#allocation7 + $0x8] ss:$16 sps:$4 sm:$0xff]  }
  0xc4   :  { %1390 = vmatpush1.bf16.msra.mxu1 %v5186_v31  ;;  %1350 = vmatprep.subr.bf16.mxu0 %v5188_v30  ;;  %6935 = vst [vmem:[#allocation69_spill] sm:$0xff] %v5210_v53 }
  0xc5   :  { %1391 = vmatprep.subr.bf16.mxu1 %v5191_v62  ;;  %v163_v62 = vlaneseq }
  0xc7   :  { %1351 = vmatpush1.bf16.msra.mxu0 %v5194_v35  ;;  %v5217_v35 = vshrl.u32 %v163_v62, 7 }
  0xc8   :  { %1392 = vmatpush1.bf16.msra.mxu1 %v5198_v28  ;;  %1352 = vmatprep.subr.bf16.mxu0 %v5200_v32 }
  0xc9   :  { %1393 = vmatprep.subr.bf16.mxu1 %v5203_v44  ;;  %6936 = vst [vmem:[#allocation70_spill] sm:$0xff] %v5217_v35  ;;  %v6676_v30 = vsub.s32 2, %v5217_v35  ;;  %v5221_v28 = vsub.s32 0, %v5217_v35  ;;  %v161_v44 = vld [vmem:[%s6587_s3] sm:$0xf]  ;;  %v5238_v29 = vsub.s32 1, %v5217_v35 }
  0xca   :  { %v6693_v24 = vsub.s32 3, %v5217_v35 }
  0xcb   :  { %1353 = vmatpush1.bf16.msra.mxu0 %v5206_v0  ;;  %6937 = vst [vmem:[#allocation71_spill] sm:$0xff] %v5221_v28  ;;  %6938 = vst [vmem:[#allocation72_spill] sm:$0xff] %v5238_v29 }
  0xcc   :  { %1394 = vmatpush1.bf16.msra.mxu1 %v5210_v53  ;;  %1446 = vmatprep.subr.bf16.mxu0 %v4899_v33  ;;  %v5230_v33 = vrot.slane %v161_v44, %v6676_v30  ;;  %v166_v53 = vrot.slane %v161_v44, %v5221_v28  ;;  %v5251_v28 = vrot.slane %v161_v44, %v5238_v29 }
  0xcd   :  { %1487 = vmatprep.subr.bf16.mxu1 %v4901_v34  ;;  %v5255_v18 = vrot.slane %v161_v44, %v6693_v24 }
 0x12d   :  { %v401_v32 = vpop.f32.mrf.mxu0  ;;  %v5226_v0 = vpop.f32.mrf.mxu1 }
 0x12f   :  { %v5232_v34 = vpop.f32.mrf.mxu0  ;;  %v5234_v62 = vpop.f32.mrf.mxu1 }
 0x131   :  { %v405_v31 = vpop.f32.mrf.mxu0  ;;  %v478_v26 = vpop.f32.mrf.mxu1 }
 0x132   :  { %v5241_v27 = vadd.f32 %v405_v31, %v166_v53  ;;  %v5244_v22 = vadd.f32 %v478_v26, %v5230_v33 }
 0x133   :  { %v5246_v30 = vpop.f32.mrf.mxu0  ;;  %v5248_v25 = vpop.f32.mrf.mxu1 }
 0x134   :  { %6939 = vst [vmem:[#allocation73_spill] sm:$0xff] %v5241_v27  ;;  %6940 = vst [vmem:[#allocation74_spill] sm:$0xff] %v5244_v22 }
 0x135   :  { %6941 = vst [vmem:[#allocation75_spill] sm:$0xff] %v5246_v30  ;;  %6942 = vst [vmem:[#allocation76_spill] sm:$0xff] %v5248_v25  ;;  %v411_v20 = vpop.f32.mrf.mxu0  ;;  %v484_v23 = vpop.f32.mrf.mxu1 }
 0x136   :  { %v5257_v21 = vadd.f32 %v411_v20, %v166_v53  ;;  %v5260_v31 = vadd.f32 %v484_v23, %v5230_v33 }
 0x137   :  { %v413_v26 = vpop.f32.mrf.mxu0  ;;  %v486_v22 = vpop.f32.mrf.mxu1 }
 0x138   :  { %6943 = vst [vmem:[#allocation77_spill] sm:$0xff] %v5257_v21  ;;  %6944 = vst [vmem:[#allocation78_spill] sm:$0xff] %v5260_v31  ;;  %v5263_v27 = vadd.f32 %v413_v26, %v5251_v28  ;;  %v5266_v25 = vadd.f32 %v486_v22, %v5255_v18 }
 0x139   :  { %v415_v30 = vpop.f32.mrf.mxu0  ;;  %v488_v29 = vpop.f32.mrf.mxu1 }
 0x13a   :  { %6945 = vst [vmem:[#allocation79_spill] sm:$0xff] %v5263_v27  ;;  %6946 = vst [vmem:[#allocation80_spill] sm:$0xff] %v5266_v25  ;;  %v5268_v16 = vadd.f32 %v415_v30, %v166_v53  ;;  %v5271_v44 = vadd.f32 %v488_v29, %v5230_v33 }
 0x13b   :  { %v417_v20 = vpop.f32.mrf.mxu0  ;;  %v490_v24 = vpop.f32.mrf.mxu1 }
 0x13c   :  { %6947 = vst [vmem:[#allocation81_spill] sm:$0xff] %v5268_v16  ;;  %6948 = vst [vmem:[#allocation82_spill] sm:$0xff] %v5271_v44  ;;  %v5274_v23 = vadd.f32 %v417_v20, %v5251_v28  ;;  %v5277_v31 = vadd.f32 %v490_v24, %v5255_v18 }
 0x13d   :  { %v421_v26 = vpop.f32.mrf.mxu0  ;;  %v494_v27 = vpop.f32.mrf.mxu1 }
 0x13e   :  { %6949 = vst [vmem:[#allocation83_spill] sm:$0xff] %v5274_v23  ;;  %6950 = vst [vmem:[#allocation84_spill] sm:$0xff] %v5277_v31  ;;  %v5279_v21 = vadd.f32 %v421_v26, %v166_v53  ;;  %v5282_v22 = vadd.f32 %v494_v27, %v5230_v33 }
 0x13f   :  { %v423_v30 = vpop.f32.mrf.mxu0  ;;  %v496_v16 = vpop.f32.mrf.mxu1 }
 0x140   :  { %6951 = vst [vmem:[#allocation85_spill] sm:$0xff] %v5279_v21  ;;  %6952 = vst [vmem:[#allocation86_spill] sm:$0xff] %v5282_v22  ;;  %v5285_v29 = vadd.f32 %v423_v30, %v5251_v28  ;;  %v5288_v44 = vadd.f32 %v496_v16, %v5255_v18 }
 0x141   :  { %v425_v20 = vpop.f32.mrf.mxu0  ;;  %v498_v23 = vpop.f32.mrf.mxu1 }
 0x142   :  { %6953 = vst [vmem:[#allocation87_spill] sm:$0xff] %v5285_v29  ;;  %6954 = vst [vmem:[#allocation88_spill] sm:$0xff] %v5288_v44  ;;  %v5290_v25 = vadd.f32 %v425_v20, %v166_v53  ;;  %v5293_v24 = vadd.f32 %v498_v23, %v5230_v33 }
 0x143   :  { %v427_v26 = vpop.f32.mrf.mxu0  ;;  %v500_v21 = vpop.f32.mrf.mxu1 }
 0x144   :  { %6955 = vst [vmem:[#allocation89_spill] sm:$0xff] %v5290_v25  ;;  %6956 = vst [vmem:[#allocation90_spill] sm:$0xff] %v5293_v24  ;;  %v5296_v27 = vadd.f32 %v427_v26, %v5251_v28  ;;  %v5299_v22 = vadd.f32 %v500_v21, %v5255_v18 }
 0x145   :  { %v431_v30 = vpop.f32.mrf.mxu0  ;;  %v504_v29 = vpop.f32.mrf.mxu1 }
 0x146   :  { %6957 = vst [vmem:[#allocation91_spill] sm:$0xff] %v5296_v27  ;;  %6958 = vst [vmem:[#allocation92_spill] sm:$0xff] %v5299_v22  ;;  %v5301_v31 = vadd.f32 %v431_v30, %v166_v53  ;;  %v5304_v16 = vadd.f32 %v504_v29, %v5230_v33  ;;  %v402_v22 = vadd.f32 %v401_v32, %v166_v53 }
 0x147   :  { %v433_v20 = vpop.f32.mrf.mxu0  ;;  %v506_v25 = vpop.f32.mrf.mxu1  ;;  %v477_v32 = vadd.f32 %v5234_v62, %v5255_v18 }
 0x148   :  { %6959 = vst [vmem:[#allocation93_spill] sm:$0xff] %v5301_v31  ;;  %6960 = vst [vmem:[#allocation94_spill] sm:$0xff] %v5304_v16  ;;  %v5307_v23 = vadd.f32 %v433_v20, %v5251_v28  ;;  %v5310_v24 = vadd.f32 %v506_v25, %v5255_v18  ;;  %v404_v25 = vadd.f32 %v5232_v34, %v5251_v28 }
 0x149   :  { %v435_v26 = vpop.f32.mrf.mxu0  ;;  %v508_v27 = vpop.f32.mrf.mxu1 }
 0x14a   :  { %6961 = vst [vmem:[#allocation95_spill] sm:$0xff] %v5307_v23  ;;  %6962 = vst [vmem:[#allocation96_spill] sm:$0xff] %v5310_v24  ;;  %v5312_v44 = vadd.f32 %v435_v26, %v166_v53  ;;  %v5315_v21 = vadd.f32 %v508_v27, %v5230_v33 }
 0x14b   :  { %v437_v30 = vpop.f32.mrf.mxu0  ;;  %v510_v31 = vpop.f32.mrf.mxu1 }
 0x14c   :  { %6963 = vst [vmem:[#allocation97_spill] sm:$0xff] %v5312_v44  ;;  %6964 = vst [vmem:[#allocation98_spill] sm:$0xff] %v5315_v21  ;;  %v5318_v29 = vadd.f32 %v437_v30, %v5251_v28  ;;  %v5321_v16 = vadd.f32 %v510_v31, %v5255_v18 }
 0x14d   :  { %v861_v20 = vpop.f32.mrf.mxu0  ;;  %v902_v23 = vpop.f32.mrf.mxu1 }
 0x14e   :  { %6965 = vst [vmem:[#allocation99_spill] sm:$0xff] %v5318_v29  ;;  %6966 = vst [vmem:[#allocation100_spill] sm:$0xff] %v5321_v16  ;;  %v909_v24 = vadd.f32 %v861_v20, %v402_v22  ;;  %v475_v29 = vadd.f32 %v5226_v0, %v5230_v33 }
 0x14f   :  { %v863_v26 = vpop.f32.mrf.mxu0  ;;  %v904_v44 = vpop.f32.mrf.mxu1 }
 0x150   :  { %v913_v35 = vmul.f32 0.5, %v909_v24  ;;  %v910_v27 = vadd.f32 %v863_v26, %v404_v25  ;;  %v912_v16 = vadd.f32 %v904_v44, %v477_v32  ;;  %v911_v34 = vadd.f32 %v902_v23, %v475_v29 }
 0x151   :  { %v865_v21 = vpop.f32.mrf.mxu0  ;;  %v906_v19 = vpop.f32.mrf.mxu1  ;;  %v6967_v29 = vmov 0  }
 0x152   :  { %4314 = vtanh.f32 %v913_v35  ;;  %v914_v53 = vmul.f32 0.5, %v910_v27  ;;  %v915_v22 = vmul.f32 0.5, %v911_v34  ;;  %v6991_v34 = vld [vmem:[#allocation71_spill] sm:$0xff] }
 0x153   :  { %v866_v30 = vpop.f32.mrf.mxu0  ;;  %v907_v31 = vpop.f32.mrf.mxu1 }
 0x154   :  { %4316 = vtanh.f32 %v914_v53  ;;  %v6990_v53 = vld [vmem:[#allocation39_spill] sm:$0xff]  ;;  %v641_v31 = vld [vmem:[%s6590_s6] sm:$0xf] }
 0x155   :  { %4318 = vtanh.f32 %v912_v16 }
 0x156   :  { %4320 = vtanh.f32 %v915_v22  ;;  %v5404_v22 = vrot.slane %v641_v31, %v6991_v34 }
 0x15f   :  { %v4315_v20 = vpop.eup %4314 }
 0x160   :  { %v919_v24 = vmul.f32 0.5, %v4315_v20  ;;  %v6993_v20 = vld [vmem:[#allocation72_spill] sm:$0xff] }
 0x161   :  { %v4317_v25 = vpop.eup %4316 }
 0x162   :  { %v922_v21 = vadd.f32 0.5, %v919_v24  ;;  %v920_v19 = vmul.f32 0.5, %v4317_v25  ;;  %v4319_v62 = vpop.eup %4318  ;;  %v5407_v24 = vrot.slane %v641_v31, %v6993_v20 }
 0x163   :  { %v4321_v44 = vpop.eup %4320 }
 0x164   :  { %v923_v26 = vadd.f32 0.5, %v920_v19  ;;  %v927_v27 = vmul.f32 %v4319_v62, %v922_v21  ;;  %v921_v32 = vmul.f32 0.5, %v4321_v44  ;;  %v6995_v21 = vld [vmem:[#allocation70_spill] sm:$0xff] }
 0x165   :  { %v6996_v19 = vsub.s32 3, %v6995_v21 }
 0x166   :  { %v926_v35 = vmul.f32 0.0, %v923_v26  ;;  %v924_v0 = vadd.f32 0.5, %v921_v32 }
 0x167   :  { %v5412_v26 = vrot.slane %v641_v31, %v6996_v19  ;;  %v6997_v19 = vsub.s32 2, %v6995_v21 }
 0x168   :  { %v5329_v30 = vadd.f32 %v927_v27, %v926_v35 }
 0x169   :  { %v5418_v34 = vrot.slane %v641_v31, %v6997_v19 }
 0x16a   :  { %4322 = vtanh.f32 %v5329_v30 }
 0x177   :  { %v4323_v33 = vpop.eup %4322 }
 0x178   :  { %v930_v16 = vmul.f32 %v4323_v33, %v924_v0 }
 0x17a   :  { %v1177_v23 = vpack.c.bf16 %v930_v16, %v930_v16 }
 0x17c   :  { %1371 = vmatmul.mubr.bf16.vlgmr.msra.gmra.mxu0 %v1177_v23  ;;  %1412 = vmatmul.mubr.bf16.vlgmr.msra.gmra.mxu1 %v1177_v23 }
 0x17d   :  { %1447 = vmatpush1.bf16.msra.mxu0 %v4906_v36  ;;  %1488 = vmatpush1.bf16.msra.mxu1 %v4908_v37  ;;  %v1125_v36 = vpop.f32.mrf.mxu0 }
 0x17e   :  { %1448 = vmatprep.subr.bf16.mxu0 %v4912_v38  ;;  %1489 = vmatprep.subr.bf16.mxu1 %v4914_v39  ;;  %v1173_v25 = vadd.f32 %v1125_v36, %v5404_v22 }
 0x17f   :  { %1478 = vmatprep.mubr.bf16.mxu0 %v6967_v29  ;;  %1519 = vmatprep.mubr.bf16.mxu1 %v6967_v29  ;;  %v1127_v37 = vpop.f32.mrf.mxu0 }
 0x180   :  { %v1174_v27 = vadd.f32 %v1127_v37, %v5407_v24 }
 0x181   :  { %1449 = vmatpush1.bf16.msra.mxu0 %v4916_v40  ;;  %1490 = vmatpush1.bf16.msra.mxu1 %v4920_v41  ;;  %v1129_v38 = vpop.f32.mrf.mxu0  ;;  %v1166_v40 = vpop.f32.mrf.mxu1 }
 0x182   :  { %1450 = vmatprep.subr.bf16.mxu0 %v4924_v42  ;;  %1491 = vmatprep.subr.bf16.mxu1 %v4926_v43  ;;  %v1175_v37 = vadd.f32 %v1166_v40, %v5418_v34  ;;  %v6999_v40 = vld [vmem:[#allocation75_spill] sm:$0xff] }
 0x183   :  { %v1130_v39 = vpop.f32.mrf.mxu0  ;;  %v1168_v41 = vpop.f32.mrf.mxu1 }
 0x184   :  { %v1176_v33 = vadd.f32 %v1168_v41, %v5412_v26 }
 0x185   :  { %1451 = vmatpush1.bf16.msra.mxu0 %v4933_v45  ;;  %1492 = vmatpush1.bf16.msra.mxu1 %v4935_v46  ;;  %v1170_v42 = vpop.f32.mrf.mxu1  ;;  %v6968_v45 = vld [vmem:[#allocation19_spill] sm:$0xff]  ;;  %v6969_v46 = vld [vmem:[#allocation17_spill] sm:$0xff] }
 0x186   :  { %1452 = vmatprep.subr.bf16.mxu0 %v4939_v47  ;;  %1493 = vmatprep.subr.bf16.mxu1 %v4943_v48  ;;  %v6970_v47 = vld [vmem:[#allocation21_spill] sm:$0xff]  ;;  %v6971_v48 = vld [vmem:[#allocation18_spill] sm:$0xff]  ;;  %6992 = vst [vmem:[#allocation19_spill] sm:$0xff] %v5404_v22  ;;  %6994 = vst [vmem:[#allocation17_spill] sm:$0xff] %v5407_v24 }
 0x187   :  { %v1171_v43 = vpop.f32.mrf.mxu1 }
 0x189   :  { %1453 = vmatpush1.bf16.msra.mxu0 %v4945_v49  ;;  %1494 = vmatpush1.bf16.msra.mxu1 %v4947_v50  ;;  %v6972_v49 = vld [vmem:[#allocation23_spill] sm:$0xff]  ;;  %v6973_v50 = vld [vmem:[#allocation20_spill] sm:$0xff] }
 0x18a   :  { %1454 = vmatprep.subr.bf16.mxu0 %v4951_v51  ;;  %1495 = vmatprep.subr.bf16.mxu1 %v4955_v52  ;;  %v6974_v51 = vld [vmem:[#allocation25_spill] sm:$0xff]  ;;  %v6975_v52 = vld [vmem:[#allocation22_spill] sm:$0xff] }
 0x18d   :  { %1455 = vmatpush1.bf16.msra.mxu0 %v4962_v54  ;;  %1496 = vmatpush1.bf16.msra.mxu1 %v4964_v55  ;;  %v6976_v54 = vld [vmem:[#allocation27_spill] sm:$0xff]  ;;  %v6977_v55 = vld [vmem:[#allocation24_spill] sm:$0xff] }
 0x18e   :  { %1456 = vmatprep.subr.bf16.mxu0 %v4966_v56  ;;  %1497 = vmatprep.subr.bf16.mxu1 %v4968_v57  ;;  %v6978_v56 = vld [vmem:[#allocation29_spill] sm:$0xff]  ;;  %v6979_v57 = vld [vmem:[#allocation26_spill] sm:$0xff] }
 0x191   :  { %1457 = vmatpush1.bf16.msra.mxu0 %v4974_v58  ;;  %1498 = vmatpush1.bf16.msra.mxu1 %v4976_v59  ;;  %v6980_v58 = vld [vmem:[#allocation31_spill] sm:$0xff]  ;;  %v6981_v59 = vld [vmem:[#allocation28_spill] sm:$0xff] }
 0x192   :  { %1458 = vmatprep.subr.bf16.mxu0 %v4978_v60  ;;  %1499 = vmatprep.subr.bf16.mxu1 %v4980_v61  ;;  %v6982_v60 = vld [vmem:[#allocation33_spill] sm:$0xff]  ;;  %v6983_v61 = vld [vmem:[#allocation30_spill] sm:$0xff] }
 0x195   :  { %1459 = vmatpush1.bf16.msra.mxu0 %v4991_v63  ;;  %1500 = vmatpush1.bf16.msra.mxu1 %v4993_v1  ;;  %v6984_v63 = vld [vmem:[#allocation35_spill] sm:$0xff]  ;;  %v6985_v1 = vld [vmem:[#allocation32_spill] sm:$0xff] }
 0x196   :  { %1460 = vmatprep.subr.bf16.mxu0 %v4995_v2  ;;  %1501 = vmatprep.subr.bf16.mxu1 %v4997_v3  ;;  %v6986_v2 = vld [vmem:[#allocation36_spill] sm:$0xff]  ;;  %v6987_v3 = vld [vmem:[#allocation34_spill] sm:$0xff] }
 0x199   :  { %1461 = vmatpush1.bf16.msra.mxu0 %v5003_v4  ;;  %1502 = vmatpush1.bf16.msra.mxu1 %v5005_v5  ;;  %v6988_v4 = vld [vmem:[#allocation37_spill] sm:$0xff]  ;;  %v6989_v5 = vld [vmem:[#allocation38_spill] sm:$0xff] }
 0x19a   :  { %1551 = vmatprep.subr.bf16.mxu0 %v5019_v6  ;;  %1592 = vmatprep.subr.bf16.mxu1 %v5027_v9 }
 0x19c   :  { %1479 = vmatmul.mubr.bf16.vlgmr.msra.gmra.mxu0 %v1177_v23  ;;  %1520 = vmatmul.mubr.bf16.vlgmr.msra.gmra.mxu1 %v1177_v23 }
 0x19d   :  { %1552 = vmatpush1.bf16.msra.mxu0 %v5021_v7  ;;  %1593 = vmatpush1.bf16.msra.mxu1 %v5032_v11 }
 0x19e   :  { %1553 = vmatprep.subr.bf16.mxu0 %v5025_v8  ;;  %1594 = vmatprep.subr.bf16.mxu1 %v5039_v13 }
 0x19f   :  { %1583 = vmatprep.mubr.bf16.mxu0 %v6967_v29  ;;  %1624 = vmatprep.mubr.bf16.mxu1 %v6967_v29 }
 0x1a1   :  { %1554 = vmatpush1.bf16.msra.mxu0 %v5029_v10  ;;  %1595 = vmatpush1.bf16.msra.mxu1 %v5044_v15 }
 0x1a2   :  { %1555 = vmatprep.subr.bf16.mxu0 %v5037_v12  ;;  %1596 = vmatprep.subr.bf16.mxu1 %v5051_v17 }
 0x1a5   :  { %1556 = vmatpush1.bf16.msra.mxu0 %v5041_v14  ;;  %1597 = vmatpush1.bf16.msra.mxu1 %v6968_v45 }
 0x1a6   :  { %1557 = vmatprep.subr.bf16.mxu0 %v6969_v46  ;;  %1598 = vmatprep.subr.bf16.mxu1 %v6970_v47 }
 0x1a9   :  { %1558 = vmatpush1.bf16.msra.mxu0 %v6971_v48  ;;  %1599 = vmatpush1.bf16.msra.mxu1 %v6972_v49 }
 0x1aa   :  { %1559 = vmatprep.subr.bf16.mxu0 %v6973_v50  ;;  %1600 = vmatprep.subr.bf16.mxu1 %v6974_v51 }
 0x1ad   :  { %1560 = vmatpush1.bf16.msra.mxu0 %v6975_v52  ;;  %1601 = vmatpush1.bf16.msra.mxu1 %v6976_v54 }
 0x1ae   :  { %1561 = vmatprep.subr.bf16.mxu0 %v6977_v55  ;;  %1602 = vmatprep.subr.bf16.mxu1 %v6978_v56 }
 0x1b1   :  { %1562 = vmatpush1.bf16.msra.mxu0 %v6979_v57  ;;  %1603 = vmatpush1.bf16.msra.mxu1 %v6980_v58 }
 0x1b2   :  { %1563 = vmatprep.subr.bf16.mxu0 %v6981_v59  ;;  %1604 = vmatprep.subr.bf16.mxu1 %v6982_v60 }
 0x1b5   :  { %1564 = vmatpush1.bf16.msra.mxu0 %v6983_v61  ;;  %1605 = vmatpush1.bf16.msra.mxu1 %v6984_v63 }
 0x1b6   :  { %1565 = vmatprep.subr.bf16.mxu0 %v6985_v1  ;;  %1606 = vmatprep.subr.bf16.mxu1 %v6986_v2 }
 0x1b9   :  { %1566 = vmatpush1.bf16.msra.mxu0 %v6987_v3  ;;  %1607 = vmatpush1.bf16.msra.mxu1 %v6988_v4 }
 0x1ba   :  { %1638 = vmatprep.subr.bf16.mxu0 %v6989_v5  ;;  %1679 = vmatprep.subr.bf16.mxu1 %v6990_v53 }
 0x23c   :  { %v1372_v62 = vpop.f32.mrf.mxu0  ;;  %v1413_v35 = vpop.f32.mrf.mxu1 }
 0x23d   :  { %v1420_v44 = vadd.f32 %v1372_v62, %v1173_v25  ;;  %v1422_v25 = vadd.f32 %v1413_v35, %v1175_v37  ;;  %v408_v35 = vadd.f32 %v6999_v40, %v5251_v28  ;;  %v7001_v37 = vld [vmem:[#allocation76_spill] sm:$0xff]  ;;  %v7002_v40 = vld [vmem:[#allocation74_spill] sm:$0xff] }
 0x23e   :  { %v1374_v32 = vpop.f32.mrf.mxu0  ;;  %v1415_v0 = vpop.f32.mrf.mxu1 }
 0x23f   :  { %v1424_v16 = vmul.f32 0.5, %v1420_v44  ;;  %v1421_v23 = vadd.f32 %v1374_v32, %v1174_v27  ;;  %v1423_v36 = vadd.f32 %v1415_v0, %v1176_v33  ;;  %v1426_v62 = vmul.f32 0.5, %v1422_v25 }
 0x240   :  { %v1376_v38 = vpop.f32.mrf.mxu0  ;;  %v1417_v39 = vpop.f32.mrf.mxu1  ;;  %v481_v25 = vadd.f32 %v7001_v37, %v5255_v18  ;;  %v7003_v18 = vld [vmem:[#allocation40_spill] sm:$0xff] }
 0x241   :  { %4324 = vtanh.f32 %v1424_v16  ;;  %v1425_v42 = vmul.f32 0.5, %v1421_v23  ;;  %v7000_v39 = vld [vmem:[#allocation73_spill] sm:$0xff] }
 0x242   :  { %v1377_v43 = vpop.f32.mrf.mxu0  ;;  %v1418_v20 = vpop.f32.mrf.mxu1 }
 0x243   :  { %4326 = vtanh.f32 %v1425_v42 }
 0x244   :  { %4328 = vtanh.f32 %v1423_v36 }
 0x245   :  { %4330 = vtanh.f32 %v1426_v62 }
 0x24e   :  { %v4325_v41 = vpop.eup %4324 }
 0x24f   :  { %v1430_v44 = vmul.f32 0.5, %v4325_v41 }
 0x250   :  { %v4327_v27 = vpop.eup %4326 }
 0x251   :  { %v1433_v32 = vadd.f32 0.5, %v1430_v44  ;;  %v1431_v16 = vmul.f32 0.5, %v4327_v27  ;;  %v4329_v23 = vpop.eup %4328 }
 0x252   :  { %v4331_v36 = vpop.eup %4330 }
 0x253   :  { %v1434_v0 = vadd.f32 0.5, %v1431_v16  ;;  %v1438_v33 = vmul.f32 %v4329_v23, %v1433_v32  ;;  %v1432_v32 = vmul.f32 0.5, %v4331_v36  ;;  %v7005_v36 = vld [vmem:[#allocation42_spill] sm:$0xff] }
 0x255   :  { %v1437_v20 = vmul.f32 0.0, %v1434_v0  ;;  %v1435_v28 = vadd.f32 0.5, %v1432_v32 }
 0x257   :  { %v5421_v38 = vadd.f32 %v1438_v33, %v1437_v20 }
 0x259   :  { %6998 = vst [vmem:[#allocation21_spill] sm:$0xff] %v5421_v38  ;;  %4332 = vtanh.f32 %v5421_v38 }
 0x25c   :  { %v1480_v31 = vpop.f32.mrf.mxu0  ;;  %v1521_v21 = vpop.f32.mrf.mxu1 }
 0x25d   :  { %v1528_v42 = vadd.f32 %v1480_v31, %v7000_v39  ;;  %v1530_v39 = vadd.f32 %v1521_v21, %v7002_v40  ;;  %v7007_v21 = vld [vmem:[#allocation44_spill] sm:$0xff] }
 0x25e   :  { %v1482_v43 = vpop.f32.mrf.mxu0  ;;  %v1523_v19 = vpop.f32.mrf.mxu1 }
 0x25f   :  { %v1532_v62 = vmul.f32 0.5, %v1528_v42  ;;  %v1529_v41 = vadd.f32 %v1482_v43, %v408_v35  ;;  %v1531_v23 = vadd.f32 %v1523_v19, %v481_v25  ;;  %v7004_v35 = vld [vmem:[#allocation41_spill] sm:$0xff]  ;;  %v1534_v42 = vmul.f32 0.5, %v1530_v39  ;;  %v7006_v43 = vld [vmem:[#allocation43_spill] sm:$0xff]  ;;  %v7015_v39 = vld [vmem:[#allocation52_spill] sm:$0xff] }
 0x260   :  { %v1484_v44 = vpop.f32.mrf.mxu0  ;;  %v1525_v27 = vpop.f32.mrf.mxu1 }
 0x261   :  { %4334 = vtanh.f32 %v1532_v62  ;;  %v1533_v16 = vmul.f32 0.5, %v1529_v41  ;;  %v7008_v62 = vld [vmem:[#allocation45_spill] sm:$0xff]  ;;  %v7009_v44 = vld [vmem:[#allocation46_spill] sm:$0xff]  ;;  %v7010_v27 = vld [vmem:[#allocation47_spill] sm:$0xff] }
 0x262   :  { %v1485_v0 = vpop.f32.mrf.mxu0  ;;  %v1526_v33 = vpop.f32.mrf.mxu1 }
 0x263   :  { %4336 = vtanh.f32 %v1533_v16  ;;  %v7011_v0 = vld [vmem:[#allocation48_spill] sm:$0xff]  ;;  %v7012_v33 = vld [vmem:[#allocation49_spill] sm:$0xff] }
 0x264   :  { %4338 = vtanh.f32 %v1531_v23 }
 0x265   :  { %4340 = vtanh.f32 %v1534_v42  ;;  %v7018_v42 = vld [vmem:[#allocation55_spill] sm:$0xff] }
 0x266   :  { %v4333_v20 = vpop.eup %4332 }
 0x267   :  { %v1441_v31 = vmul.f32 %v4333_v20, %v1435_v28  ;;  %v7013_v20 = vld [vmem:[#allocation50_spill] sm:$0xff] }
 0x269   :  { %v1550_v38 = vpack.c.bf16 %v1441_v31, %v1441_v31  ;;  %v7014_v31 = vld [vmem:[#allocation51_spill] sm:$0xff] }
 0x26b   :  { %1584 = vmatmul.mubr.bf16.vlgmr.msra.gmra.mxu0 %v1550_v38  ;;  %1625 = vmatmul.mubr.bf16.vlgmr.msra.gmra.mxu1 %v1550_v38 }
 0x26c   :  { %1639 = vmatpush1.bf16.msra.mxu0 %v7003_v18  ;;  %1680 = vmatpush1.bf16.msra.mxu1 %v7004_v35  ;;  %v7016_v18 = vld [vmem:[#allocation53_spill] sm:$0xff]  ;;  %v7017_v35 = vld [vmem:[#allocation54_spill] sm:$0xff] }
 0x26d   :  { %1640 = vmatprep.subr.bf16.mxu0 %v7005_v36  ;;  %1681 = vmatprep.subr.bf16.mxu1 %v7006_v43 }
 0x26e   :  { %v4335_v19 = vpop.eup %4334  ;;  %1670 = vmatprep.mubr.bf16.mxu0 %v6967_v29  ;;  %1711 = vmatprep.mubr.bf16.mxu1 %v6967_v29 }
 0x26f   :  { %v1538_v37 = vmul.f32 0.5, %v4335_v19  ;;  %v7019_v19 = vld [vmem:[#allocation56_spill] sm:$0xff] }
 0x270   :  { %v4337_v25 = vpop.eup %4336  ;;  %1641 = vmatpush1.bf16.msra.mxu0 %v7007_v21  ;;  %1682 = vmatpush1.bf16.msra.mxu1 %v7008_v62  ;;  %v7023_v62 = vld [vmem:[#allocation60_spill] sm:$0xff] }
 0x271   :  { %v1541_v38 = vadd.f32 0.5, %v1538_v37  ;;  %v1539_v41 = vmul.f32 0.5, %v4337_v25  ;;  %1642 = vmatprep.subr.bf16.mxu0 %v7009_v44  ;;  %1683 = vmatprep.subr.bf16.mxu1 %v7010_v27  ;;  %v4339_v32 = vpop.eup %4338  ;;  %v7020_v37 = vld [vmem:[#allocation57_spill] sm:$0xff]  ;;  %v7022_v25 = vld [vmem:[#allocation59_spill] sm:$0xff]  ;;  %v7025_v44 = vld [vmem:[#allocation62_spill] sm:$0xff] }
 0x272   :  { %v4341_v21 = vpop.eup %4340  ;;  %v7026_v27 = vld [vmem:[#allocation63_spill] sm:$0xff] }
 0x273   :  { %v1542_v16 = vadd.f32 0.5, %v1539_v41  ;;  %v1546_v23 = vmul.f32 %v4339_v32, %v1541_v38  ;;  %v7024_v38 = vld [vmem:[#allocation61_spill] sm:$0xff]  ;;  %v1540_v41 = vmul.f32 0.5, %v4341_v21  ;;  %v7027_v32 = vld [vmem:[#allocation64_spill] sm:$0xff] }
 0x274   :  { %1643 = vmatpush1.bf16.msra.mxu0 %v7011_v0  ;;  %1684 = vmatpush1.bf16.msra.mxu1 %v7012_v33  ;;  %v7029_v0 = vld [vmem:[#allocation66_spill] sm:$0xff]  ;;  %v7030_v33 = vld [vmem:[#allocation67_spill] sm:$0xff] }
 0x275   :  { %v1545_v28 = vmul.f32 %v1542_v16, %v5329_v30  ;;  %1644 = vmatprep.subr.bf16.mxu0 %v7013_v20  ;;  %1685 = vmatprep.subr.bf16.mxu1 %v7014_v31  ;;  %v7021_v30 = vld [vmem:[#allocation58_spill] sm:$0xff]  ;;  %v7028_v16 = vld [vmem:[#allocation65_spill] sm:$0xff]  ;;  %v7031_v31 = vld [vmem:[#allocation68_spill] sm:$0xff] }
 0x276   :  { %v5476_v21 = vld [vmem:[#allocation5 + $0xe0] ss:$16 sps:$4 sm:$0xff]  }
 0x277   :  { %v5445_v40 = vadd.f32 %v1546_v23, %v1545_v28  ;;  %v1543_v23 = vadd.f32 0.5, %v1540_v41  ;;  %7034 = vst [vmem:[#allocation23_spill] sm:$0xff] %v5476_v21  ;;  %v5479_v41 = vld [vmem:[#allocation5 + $0xe8] ss:$16 sps:$4 sm:$0xff]  }
 0x278   :  { %1645 = vmatpush1.bf16.msra.mxu0 %v7015_v39  ;;  %1686 = vmatpush1.bf16.msra.mxu1 %v7016_v18  ;;  %v7032_v39 = vld [vmem:[#allocation69_spill] sm:$0xff]  ;;  %7035 = vst [vmem:[#allocation20_spill] sm:$0xff] %v5479_v41 }
 0x279   :  { %4342 = vtanh.f32 %v5445_v40  ;;  %1646 = vmatprep.subr.bf16.mxu0 %v7017_v35  ;;  %1687 = vmatprep.subr.bf16.mxu1 %v7018_v42  ;;  %v5468_v35 = vld [vmem:[#allocation5 + $0xe4] ss:$16 sps:$4 sm:$0xff]   ;;  %v5471_v42 = vld [vmem:[#allocation5 + $0xec] ss:$16 sps:$4 sm:$0xff]  }
 0x27a   :  { %7033 = vst [vmem:[#allocation18_spill] sm:$0xff] %v5471_v42 }
 0x27c   :  { %1647 = vmatpush1.bf16.msra.mxu0 %v7019_v19  ;;  %1688 = vmatpush1.bf16.msra.mxu1 %v7020_v37 }
 0x27d   :  { %1648 = vmatprep.subr.bf16.mxu0 %v7021_v30  ;;  %1689 = vmatprep.subr.bf16.mxu1 %v7022_v25 }
 0x280   :  { %1649 = vmatpush1.bf16.msra.mxu0 %v7023_v62  ;;  %1690 = vmatpush1.bf16.msra.mxu1 %v7024_v38 }
 0x281   :  { %1650 = vmatprep.subr.bf16.mxu0 %v7025_v44  ;;  %1691 = vmatprep.subr.bf16.mxu1 %v7026_v27 }
 0x284   :  { %1651 = vmatpush1.bf16.msra.mxu0 %v7027_v32  ;;  %1692 = vmatpush1.bf16.msra.mxu1 %v7028_v16 }
 0x285   :  { %1652 = vmatprep.subr.bf16.mxu0 %v7029_v0  ;;  %1693 = vmatprep.subr.bf16.mxu1 %v7030_v33 }
 0x286   :  { %v4343_v28 = vpop.eup %4342 }
 0x287   :  { %v1549_v20 = vmul.f32 %v4343_v28, %v1543_v23  ;;  %v5482_v23 = vld [vmem:[#allocation5 + $0xc4] ss:$16 sps:$4 sm:$0xff]   ;;  %v5485_v28 = vld [vmem:[#allocation5 + $0xcc] ss:$16 sps:$4 sm:$0xff]  }
 0x288   :  { %1653 = vmatpush1.bf16.msra.mxu0 %v7031_v31  ;;  %1694 = vmatpush1.bf16.msra.mxu1 %v7032_v39  ;;  %7036 = vst [vmem:[#allocation25_spill] sm:$0xff] %v5482_v23  ;;  %7037 = vst [vmem:[#allocation22_spill] sm:$0xff] %v5485_v28 }
 0x289   :  { %v5466_v18 = vpack.c.bf16 %v1549_v20, %v1549_v20  ;;  %1746 = vmatprep.subr.bf16.mxu0 %v5468_v35  ;;  %1787 = vmatprep.subr.bf16.mxu1 %v5471_v42  ;;  %v5490_v20 = vld [vmem:[#allocation5 + $0xc0] ss:$16 sps:$4 sm:$0xff]   ;;  %v5505_v42 = vld [vmem:[#allocation5 + $0xa8] ss:$16 sps:$4 sm:$0xff]  }
 0x28a   :  { %7038 = vst [vmem:[#allocation27_spill] sm:$0xff] %v5490_v20  ;;  %7043 = vst [vmem:[#allocation28_spill] sm:$0xff] %v5505_v42 }
 0x28b   :  { %1671 = vmatmul.mubr.bf16.vlgmr.msra.gmra.mxu0 %v5466_v18  ;;  %1712 = vmatmul.mubr.bf16.vlgmr.msra.gmra.mxu1 %v5466_v18 }
 0x28c   :  { %1747 = vmatpush1.bf16.msra.mxu0 %v5476_v21  ;;  %1788 = vmatpush1.bf16.msra.mxu1 %v5479_v41  ;;  %v5493_v21 = vld [vmem:[#allocation5 + $0xc8] ss:$16 sps:$4 sm:$0xff]   ;;  %v5496_v41 = vld [vmem:[#allocation5 + $0xa4] ss:$16 sps:$4 sm:$0xff]  }
 0x28d   :  { %1748 = vmatprep.subr.bf16.mxu0 %v5482_v23  ;;  %1789 = vmatprep.subr.bf16.mxu1 %v5485_v28  ;;  %7039 = vst [vmem:[#allocation24_spill] sm:$0xff] %v5493_v21  ;;  %7040 = vst [vmem:[#allocation29_spill] sm:$0xff] %v5496_v41  ;;  %v5499_v23 = vld [vmem:[#allocation5 + $0xac] ss:$16 sps:$4 sm:$0xff]   ;;  %v5502_v28 = vld [vmem:[#allocation5 + $0xa0] ss:$16 sps:$4 sm:$0xff]  }
 0x28e   :  { %1778 = vmatprep.mubr.bf16.mxu0 %v6967_v29  ;;  %1819 = vmatprep.mubr.bf16.mxu1 %v6967_v29  ;;  %7041 = vst [vmem:[#allocation26_spill] sm:$0xff] %v5499_v23  ;;  %7042 = vst [vmem:[#allocation31_spill] sm:$0xff] %v5502_v28 }
 0x290   :  { %1749 = vmatpush1.bf16.msra.mxu0 %v5490_v20  ;;  %1790 = vmatpush1.bf16.msra.mxu1 %v5493_v21  ;;  %v5508_v20 = vld [vmem:[#allocation5 + $0x84] ss:$16 sps:$4 sm:$0xff]   ;;  %v5511_v21 = vld [vmem:[#allocation5 + $0x8c] ss:$16 sps:$4 sm:$0xff]  }
 0x291   :  { %1750 = vmatprep.subr.bf16.mxu0 %v5496_v41  ;;  %1791 = vmatprep.subr.bf16.mxu1 %v5499_v23  ;;  %7044 = vst [vmem:[#allocation33_spill] sm:$0xff] %v5508_v20  ;;  %7045 = vst [vmem:[#allocation30_spill] sm:$0xff] %v5511_v21  ;;  %v5514_v41 = vld [vmem:[#allocation5 + $0x80] ss:$16 sps:$4 sm:$0xff]   ;;  %v5517_v23 = vld [vmem:[#allocation5 + $0x88] ss:$16 sps:$4 sm:$0xff]  }
 0x292   :  { %7046 = vst [vmem:[#allocation35_spill] sm:$0xff] %v5514_v41  ;;  %7047 = vst [vmem:[#allocation32_spill] sm:$0xff] %v5517_v23 }
 0x294   :  { %1751 = vmatpush1.bf16.msra.mxu0 %v5502_v28  ;;  %1792 = vmatpush1.bf16.msra.mxu1 %v5505_v42  ;;  %v5520_v28 = vld [vmem:[#allocation5 + $0x64] ss:$16 sps:$4 sm:$0xff]   ;;  %v5523_v42 = vld [vmem:[#allocation5 + $0x6c] ss:$16 sps:$4 sm:$0xff]  }
 0x295   :  { %1752 = vmatprep.subr.bf16.mxu0 %v5508_v20  ;;  %1793 = vmatprep.subr.bf16.mxu1 %v5511_v21  ;;  %7048 = vst [vmem:[#allocation36_spill] sm:$0xff] %v5520_v28  ;;  %7049 = vst [vmem:[#allocation34_spill] sm:$0xff] %v5523_v42  ;;  %v5526_v20 = vld [vmem:[#allocation5 + $0x60] ss:$16 sps:$4 sm:$0xff]   ;;  %v5529_v21 = vld [vmem:[#allocation5 + $0x68] ss:$16 sps:$4 sm:$0xff]  }
 0x296   :  { %7050 = vst [vmem:[#allocation37_spill] sm:$0xff] %v5526_v20  ;;  %7051 = vst [vmem:[#allocation38_spill] sm:$0xff] %v5529_v21 }
 0x298   :  { %1753 = vmatpush1.bf16.msra.mxu0 %v5514_v41  ;;  %1794 = vmatpush1.bf16.msra.mxu1 %v5517_v23  ;;  %v5532_v41 = vld [vmem:[#allocation5 + $0x44] ss:$16 sps:$4 sm:$0xff]   ;;  %v5535_v23 = vld [vmem:[#allocation5 + $0x4c] ss:$16 sps:$4 sm:$0xff]  }
 0x299   :  { %1754 = vmatprep.subr.bf16.mxu0 %v5520_v28  ;;  %1795 = vmatprep.subr.bf16.mxu1 %v5523_v42  ;;  %7052 = vst [vmem:[#allocation39_spill] sm:$0xff] %v5532_v41  ;;  %7053 = vst [vmem:[#allocation70_spill] sm:$0xff] %v5535_v23  ;;  %v5538_v28 = vld [vmem:[#allocation5 + $0x40] ss:$16 sps:$4 sm:$0xff]   ;;  %v5541_v42 = vld [vmem:[#allocation5 + $0x48] ss:$16 sps:$4 sm:$0xff]  }
 0x29a   :  { %7054 = vst [vmem:[#allocation75_spill] sm:$0xff] %v5538_v28  ;;  %7055 = vst [vmem:[#allocation73_spill] sm:$0xff] %v5541_v42 }
 0x29c   :  { %1755 = vmatpush1.bf16.msra.mxu0 %v5526_v20  ;;  %1796 = vmatpush1.bf16.msra.mxu1 %v5529_v21  ;;  %v5544_v20 = vld [vmem:[#allocation5 + $0x24] ss:$16 sps:$4 sm:$0xff]   ;;  %v5547_v21 = vld [vmem:[#allocation5 + $0x2c] ss:$16 sps:$4 sm:$0xff]  }
 0x29d   :  { %1756 = vmatprep.subr.bf16.mxu0 %v5532_v41  ;;  %1797 = vmatprep.subr.bf16.mxu1 %v5535_v23  ;;  %7056 = vst [vmem:[#allocation76_spill] sm:$0xff] %v5544_v20  ;;  %7057 = vst [vmem:[#allocation74_spill] sm:$0xff] %v5547_v21  ;;  %v5550_v41 = vld [vmem:[#allocation5 + $0x20] ss:$16 sps:$4 sm:$0xff]   ;;  %v5553_v23 = vld [vmem:[#allocation5 + $0x28] ss:$16 sps:$4 sm:$0xff]  }
 0x29e   :  { %7058 = vst [vmem:[#allocation40_spill] sm:$0xff] %v5550_v41  ;;  %7059 = vst [vmem:[#allocation41_spill] sm:$0xff] %v5553_v23 }
 0x2a0   :  { %1757 = vmatpush1.bf16.msra.mxu0 %v5538_v28  ;;  %1798 = vmatpush1.bf16.msra.mxu1 %v5541_v42  ;;  %v5556_v28 = vld [vmem:[#allocation5 + $0x4] ss:$16 sps:$4 sm:$0xff]   ;;  %v5559_v42 = vld [vmem:[#allocation5 + $0xc] ss:$16 sps:$4 sm:$0xff]  }
 0x2a1   :  { %1758 = vmatprep.subr.bf16.mxu0 %v5544_v20  ;;  %1799 = vmatprep.subr.bf16.mxu1 %v5547_v21  ;;  %7060 = vst [vmem:[#allocation42_spill] sm:$0xff] %v5556_v28  ;;  %7061 = vst [vmem:[#allocation43_spill] sm:$0xff] %v5559_v42  ;;  %v5562_v20 = vld [vmem:[#allocation5] ss:$16 sps:$4 sm:$0xff]   ;;  %v5565_v21 = vld [vmem:[#allocation5 + $0x8] ss:$16 sps:$4 sm:$0xff]  }
 0x2a2   :  { %7062 = vst [vmem:[#allocation44_spill] sm:$0xff] %v5562_v20  ;;  %7063 = vst [vmem:[#allocation45_spill] sm:$0xff] %v5565_v21 }
 0x2a4   :  { %1759 = vmatpush1.bf16.msra.mxu0 %v5550_v41  ;;  %1800 = vmatpush1.bf16.msra.mxu1 %v5553_v23 }
 0x2a5   :  { %1760 = vmatprep.subr.bf16.mxu0 %v5556_v28  ;;  %1801 = vmatprep.subr.bf16.mxu1 %v5559_v42 }
 0x2a8   :  { %1761 = vmatpush1.bf16.msra.mxu0 %v5562_v20  ;;  %1802 = vmatpush1.bf16.msra.mxu1 %v5565_v21 }
 0x2a9   :  { %1851 = vmatprep.subr.bf16.mxu0 %v5019_v6  ;;  %1892 = vmatprep.subr.bf16.mxu1 %v5027_v9 }
 0x2ab   :  { %1779 = vmatmul.mubr.bf16.vlgmr.msra.gmra.mxu0 %v5466_v18  ;;  %1820 = vmatmul.mubr.bf16.vlgmr.msra.gmra.mxu1 %v5466_v18  ;;  %v7064_v18 = vld [vmem:[#allocation21_spill] sm:$0xff] }
 0x2ac   :  { %1852 = vmatpush1.bf16.msra.mxu0 %v5021_v7  ;;  %1893 = vmatpush1.bf16.msra.mxu1 %v5032_v11 }
 0x2ad   :  { %1853 = vmatprep.subr.bf16.mxu0 %v5025_v8  ;;  %1894 = vmatprep.subr.bf16.mxu1 %v5039_v13 }
 0x2ae   :  { %1883 = vmatprep.mubr.bf16.mxu0 %v6967_v29  ;;  %1924 = vmatprep.mubr.bf16.mxu1 %v6967_v29 }
 0x2b0   :  { %1854 = vmatpush1.bf16.msra.mxu0 %v5029_v10  ;;  %1895 = vmatpush1.bf16.msra.mxu1 %v5044_v15 }
 0x2b1   :  { %1855 = vmatprep.subr.bf16.mxu0 %v5037_v12  ;;  %1896 = vmatprep.subr.bf16.mxu1 %v5051_v17 }
 0x2b4   :  { %1856 = vmatpush1.bf16.msra.mxu0 %v5041_v14  ;;  %1897 = vmatpush1.bf16.msra.mxu1 %v6968_v45 }
 0x2b5   :  { %1857 = vmatprep.subr.bf16.mxu0 %v6969_v46  ;;  %1898 = vmatprep.subr.bf16.mxu1 %v6970_v47 }
 0x2b8   :  { %1858 = vmatpush1.bf16.msra.mxu0 %v6971_v48  ;;  %1899 = vmatpush1.bf16.msra.mxu1 %v6972_v49 }
 0x2b9   :  { %1859 = vmatprep.subr.bf16.mxu0 %v6973_v50  ;;  %1900 = vmatprep.subr.bf16.mxu1 %v6974_v51 }
 0x2bc   :  { %1860 = vmatpush1.bf16.msra.mxu0 %v6975_v52  ;;  %1901 = vmatpush1.bf16.msra.mxu1 %v6976_v54 }
 0x2bd   :  { %1861 = vmatprep.subr.bf16.mxu0 %v6977_v55  ;;  %1902 = vmatprep.subr.bf16.mxu1 %v6978_v56 }
 0x2c0   :  { %1862 = vmatpush1.bf16.msra.mxu0 %v6979_v57  ;;  %1903 = vmatpush1.bf16.msra.mxu1 %v6980_v58 }
 0x2c1   :  { %1863 = vmatprep.subr.bf16.mxu0 %v6981_v59  ;;  %1904 = vmatprep.subr.bf16.mxu1 %v6982_v60 }
 0x2c4   :  { %1864 = vmatpush1.bf16.msra.mxu0 %v6983_v61  ;;  %1905 = vmatpush1.bf16.msra.mxu1 %v6984_v63 }
 0x2c5   :  { %1865 = vmatprep.subr.bf16.mxu0 %v6985_v1  ;;  %1906 = vmatprep.subr.bf16.mxu1 %v6986_v2 }
 0x2c8   :  { %1866 = vmatpush1.bf16.msra.mxu0 %v6987_v3  ;;  %1907 = vmatpush1.bf16.msra.mxu1 %v6988_v4 }
 0x2c9   :  { %1938 = vmatprep.subr.bf16.mxu0 %v6989_v5  ;;  %1979 = vmatprep.subr.bf16.mxu1 %v6990_v53 }
 0x32b   :  { %v1585_v6 = vpop.f32.mrf.mxu0  ;;  %v1626_v7 = vpop.f32.mrf.mxu1 }
 0x32c   :  { %v1633_v14 = vadd.f32 %v1585_v6, %v5404_v22  ;;  %v1635_v59 = vadd.f32 %v1626_v7, %v5418_v34 }
 0x32d   :  { %v1587_v8 = vpop.f32.mrf.mxu0  ;;  %v1628_v9 = vpop.f32.mrf.mxu1 }
 0x32e   :  { %v1634_v45 = vadd.f32 %v1587_v8, %v5407_v24  ;;  %v1636_v54 = vadd.f32 %v1628_v9, %v5412_v26 }
 0x32f   :  { %v1589_v10 = vpop.f32.mrf.mxu0  ;;  %v1630_v11 = vpop.f32.mrf.mxu1 }
 0x330   :  { %v7065_v11 = vld [vmem:[#allocation77_spill] sm:$0xff] }
 0x331   :  { %v1590_v12 = vpop.f32.mrf.mxu0  ;;  %v1631_v13 = vpop.f32.mrf.mxu1 }
 0x34b   :  { %v1672_v15 = vpop.f32.mrf.mxu0  ;;  %v1713_v17 = vpop.f32.mrf.mxu1 }
 0x34c   :  { %v1720_v46 = vadd.f32 %v1672_v15, %v1633_v14  ;;  %v1722_v60 = vadd.f32 %v1713_v17, %v1635_v59  ;;  %v7068_v59 = vld [vmem:[#allocation78_spill] sm:$0xff] }
 0x34d   :  { %v1674_v47 = vpop.f32.mrf.mxu0  ;;  %v1715_v48 = vpop.f32.mrf.mxu1 }
 0x34e   :  { %v1724_v49 = vmul.f32 0.5, %v1720_v46  ;;  %v1721_v50 = vadd.f32 %v1674_v47, %v1634_v45  ;;  %v1723_v58 = vadd.f32 %v1715_v48, %v1636_v54  ;;  %v1726_v61 = vmul.f32 0.5, %v1722_v60  ;;  %v7066_v45 = vld [vmem:[#allocation79_spill] sm:$0xff] }
 0x34f   :  { %v1676_v51 = vpop.f32.mrf.mxu0  ;;  %v1717_v52 = vpop.f32.mrf.mxu1 }
 0x350   :  { %4344 = vtanh.f32 %v1724_v49  ;;  %v1725_v55 = vmul.f32 0.5, %v1721_v50  ;;  %v7067_v51 = vld [vmem:[#allocation80_spill] sm:$0xff] }
 0x351   :  { %v1677_v56 = vpop.f32.mrf.mxu0  ;;  %v1718_v57 = vpop.f32.mrf.mxu1 }
 0x352   :  { %4346 = vtanh.f32 %v1725_v55 }
 0x353   :  { %4348 = vtanh.f32 %v1723_v58 }
 0x354   :  { %4350 = vtanh.f32 %v1726_v61 }
 0x35d   :  { %v4345_v63 = vpop.eup %4344 }
 0x35e   :  { %v1730_v1 = vmul.f32 0.5, %v4345_v63  ;;  %v5618_v63 = vld [vmem:[#allocation7 + $0xe0] ss:$16 sps:$4 sm:$0xff]  }
 0x35f   :  { %v4347_v2 = vpop.eup %4346 }
 0x360   :  { %v1733_v3 = vadd.f32 0.5, %v1730_v1  ;;  %v1731_v4 = vmul.f32 0.5, %v4347_v2  ;;  %v4349_v53 = vpop.eup %4348  ;;  %v5621_v1 = vld [vmem:[#allocation7 + $0xe8] ss:$16 sps:$4 sm:$0xff]  }
 0x361   :  { %v4351_v13 = vpop.eup %4350 }
 0x362   :  { %v1734_v5 = vadd.f32 0.5, %v1731_v4  ;;  %v1738_v8 = vmul.f32 %v4349_v53, %v1733_v3  ;;  %v1732_v49 = vmul.f32 0.5, %v4351_v13  ;;  %v5628_v53 = vld [vmem:[#allocation7 + $0xc0] ss:$16 sps:$4 sm:$0xff]   ;;  %v5643_v13 = vld [vmem:[#allocation7 + $0xa8] ss:$16 sps:$4 sm:$0xff]  }
 0x364   :  { %v1737_v6 = vmul.f32 %v1734_v5, %v7064_v18  ;;  %v1735_v56 = vadd.f32 0.5, %v1732_v49  ;;  %v5631_v18 = vld [vmem:[#allocation7 + $0xc8] ss:$16 sps:$4 sm:$0xff]  }
 0x366   :  { %v5611_v9 = vadd.f32 %v1738_v8, %v1737_v6  ;;  %v5634_v8 = vld [vmem:[#allocation7 + $0xa4] ss:$16 sps:$4 sm:$0xff]  }
 0x368   :  { %4352 = vtanh.f32 %v5611_v9 }
 0x36b   :  { %v1780_v10 = vpop.f32.mrf.mxu0  ;;  %v1821_v7 = vpop.f32.mrf.mxu1 }
 0x36c   :  { %v1828_v12 = vadd.f32 %v1780_v10, %v7065_v11  ;;  %v1830_v60 = vadd.f32 %v1821_v7, %v7068_v59  ;;  %v7086_v59 = vld [vmem:[#allocation37_spill] sm:$0xff] }
 0x36d   :  { %v1782_v14 = vpop.f32.mrf.mxu0  ;;  %v1823_v15 = vpop.f32.mrf.mxu1 }
 0x36e   :  { %v1832_v17 = vmul.f32 0.5, %v1828_v12  ;;  %v1829_v46 = vadd.f32 %v1782_v14, %v7066_v45  ;;  %v1831_v52 = vadd.f32 %v1823_v15, %v7067_v51  ;;  %v1834_v2 = vmul.f32 0.5, %v1830_v60  ;;  %v5640_v12 = vld [vmem:[#allocation7 + $0xa0] ss:$16 sps:$4 sm:$0xff]   ;;  %v5647_v15 = vld [vmem:[#allocation7 + $0x84] ss:$16 sps:$4 sm:$0xff]  }
 0x36f   :  { %v1784_v47 = vpop.f32.mrf.mxu0  ;;  %v1825_v48 = vpop.f32.mrf.mxu1  ;;  %v7079_v51 = vld [vmem:[#allocation28_spill] sm:$0xff]  ;;  %v7087_v60 = vld [vmem:[#allocation38_spill] sm:$0xff] }
 0x370   :  { %4354 = vtanh.f32 %v1832_v17  ;;  %v1833_v50 = vmul.f32 0.5, %v1829_v46  ;;  %v5650_v17 = vld [vmem:[#allocation7 + $0x8c] ss:$16 sps:$4 sm:$0xff]   ;;  %v5655_v46 = vld [vmem:[#allocation7 + $0x80] ss:$16 sps:$4 sm:$0xff]  }
 0x371   :  { %v1785_v54 = vpop.f32.mrf.mxu0  ;;  %v1826_v55 = vpop.f32.mrf.mxu1  ;;  %v5658_v47 = vld [vmem:[#allocation7 + $0x88] ss:$16 sps:$4 sm:$0xff]   ;;  %v5665_v48 = vld [vmem:[#allocation7 + $0x6c] ss:$16 sps:$4 sm:$0xff]  }
 0x372   :  { %4356 = vtanh.f32 %v1833_v50  ;;  %v7081_v54 = vld [vmem:[#allocation30_spill] sm:$0xff]  ;;  %v7082_v55 = vld [vmem:[#allocation35_spill] sm:$0xff] }
 0x373   :  { %4358 = vtanh.f32 %v1831_v52  ;;  %v7080_v52 = vld [vmem:[#allocation33_spill] sm:$0xff] }
 0x374   :  { %4360 = vtanh.f32 %v1834_v2  ;;  %v7089_v2 = vld [vmem:[#allocation70_spill] sm:$0xff] }
 0x375   :  { %v4353_v57 = vpop.eup %4352 }
 0x376   :  { %v1741_v58 = vmul.f32 %v4353_v57, %v1735_v56  ;;  %v7083_v56 = vld [vmem:[#allocation32_spill] sm:$0xff] }
 0x377   :  { %v7084_v57 = vld [vmem:[#allocation36_spill] sm:$0xff] }
 0x378   :  { %v1850_v61 = vpack.c.bf16 %v1741_v58, %v1741_v58  ;;  %v7085_v58 = vld [vmem:[#allocation34_spill] sm:$0xff] }
 0x37a   :  { %1884 = vmatmul.mubr.bf16.vlgmr.msra.gmra.mxu0 %v1850_v61  ;;  %1925 = vmatmul.mubr.bf16.vlgmr.msra.gmra.mxu1 %v1850_v61  ;;  %v7088_v61 = vld [vmem:[#allocation39_spill] sm:$0xff] }
 0x37b   :  { %1939 = vmatpush1.bf16.msra.mxu0 %v5618_v63  ;;  %1980 = vmatpush1.bf16.msra.mxu1 %v5621_v1 }
 0x37c   :  { %1940 = vmatprep.subr.bf16.mxu0 %v7005_v36  ;;  %1981 = vmatprep.subr.bf16.mxu1 %v7006_v43  ;;  %v5637_v43 = vld [vmem:[#allocation7 + $0xac] ss:$16 sps:$4 sm:$0xff]  }
 0x37d   :  { %v4355_v3 = vpop.eup %4354  ;;  %1970 = vmatprep.mubr.bf16.mxu0 %v6967_v29  ;;  %2011 = vmatprep.mubr.bf16.mxu1 %v6967_v29 }
 0x37e   :  { %v1838_v4 = vmul.f32 0.5, %v4355_v3  ;;  %v7090_v3 = vld [vmem:[#allocation75_spill] sm:$0xff] }
 0x37f   :  { %v4357_v5 = vpop.eup %4356  ;;  %1941 = vmatpush1.bf16.msra.mxu0 %v5628_v53  ;;  %1982 = vmatpush1.bf16.msra.mxu1 %v5631_v18 }
 0x380   :  { %v1841_v6 = vadd.f32 0.5, %v1838_v4  ;;  %v1839_v36 = vmul.f32 0.5, %v4357_v5  ;;  %1942 = vmatprep.subr.bf16.mxu0 %v5634_v8  ;;  %1983 = vmatprep.subr.bf16.mxu1 %v5637_v43  ;;  %v4359_v10 = vpop.eup %4358  ;;  %v7091_v4 = vld [vmem:[#allocation73_spill] sm:$0xff]  ;;  %v7092_v5 = vld [vmem:[#allocation76_spill] sm:$0xff] }
 0x381   :  { %v4361_v49 = vpop.eup %4360 }
 0x382   :  { %v1842_v7 = vadd.f32 0.5, %v1839_v36  ;;  %v1846_v11 = vmul.f32 %v4359_v10, %v1841_v6  ;;  %v1840_v50 = vmul.f32 0.5, %v4361_v49  ;;  %v7093_v6 = vld [vmem:[#allocation74_spill] sm:$0xff]  ;;  %v5716_v36 = vld [vmem:[#allocation8 + $0xe4] ss:$16 sps:$4 sm:$0xff]  }
 0x383   :  { %1943 = vmatpush1.bf16.msra.mxu0 %v5640_v12  ;;  %1984 = vmatpush1.bf16.msra.mxu1 %v5643_v13  ;;  %7094 = vst [vmem:[#allocation46_spill] sm:$0xff] %v5716_v36  ;;  %v5719_v10 = vld [vmem:[#allocation8 + $0xec] ss:$16 sps:$4 sm:$0xff]  }
 0x384   :  { %v1845_v14 = vmul.f32 %v1842_v7, %v5445_v40  ;;  %1944 = vmatprep.subr.bf16.mxu0 %v5647_v15  ;;  %1985 = vmatprep.subr.bf16.mxu1 %v5650_v17  ;;  %v5662_v40 = vld [vmem:[#allocation7 + $0x64] ss:$16 sps:$4 sm:$0xff]   ;;  %7095 = vst [vmem:[#allocation47_spill] sm:$0xff] %v5719_v10  ;;  %v5722_v7 = vld [vmem:[#allocation8 + $0xe0] ss:$16 sps:$4 sm:$0xff]  }
 0x385   :  { %7096 = vst [vmem:[#allocation48_spill] sm:$0xff] %v5722_v7  ;;  %v5731_v49 = vld [vmem:[#allocation8 + $0xcc] ss:$16 sps:$4 sm:$0xff]  }
 0x386   :  { %v5653_v45 = vadd.f32 %v1846_v11, %v1845_v14  ;;  %v5725_v11 = vld [vmem:[#allocation8 + $0xe8] ss:$16 sps:$4 sm:$0xff]   ;;  %v5728_v14 = vld [vmem:[#allocation8 + $0xc4] ss:$16 sps:$4 sm:$0xff]   ;;  %7099 = vst [vmem:[#allocation51_spill] sm:$0xff] %v5731_v49 }
 0x387   :  { %1945 = vmatpush1.bf16.msra.mxu0 %v5655_v46  ;;  %1986 = vmatpush1.bf16.msra.mxu1 %v5658_v47  ;;  %7097 = vst [vmem:[#allocation49_spill] sm:$0xff] %v5725_v11  ;;  %7098 = vst [vmem:[#allocation50_spill] sm:$0xff] %v5728_v14 }
 0x388   :  { %4362 = vtanh.f32 %v5653_v45  ;;  %1946 = vmatprep.subr.bf16.mxu0 %v5662_v40  ;;  %1987 = vmatprep.subr.bf16.mxu1 %v5665_v48 }
 0x38b   :  { %1947 = vmatpush1.bf16.msra.mxu0 %v7019_v19  ;;  %1988 = vmatpush1.bf16.msra.mxu1 %v7020_v37  ;;  %v1843_v19 = vadd.f32 0.5, %v1840_v50  ;;  %v5736_v50 = vld [vmem:[#allocation8 + $0xc0] ss:$16 sps:$4 sm:$0xff]  }
 0x38c   :  { %1948 = vmatprep.subr.bf16.mxu0 %v7021_v30  ;;  %1989 = vmatprep.subr.bf16.mxu1 %v7022_v25  ;;  %v7069_v25 = vld [vmem:[#allocation18_spill] sm:$0xff]  ;;  %7100 = vst [vmem:[#allocation52_spill] sm:$0xff] %v5736_v50 }
 0x38f   :  { %1949 = vmatpush1.bf16.msra.mxu0 %v7023_v62  ;;  %1990 = vmatpush1.bf16.msra.mxu1 %v7024_v38  ;;  %v7070_v38 = vld [vmem:[#allocation23_spill] sm:$0xff] }
 0x390   :  { %1950 = vmatprep.subr.bf16.mxu0 %v7025_v44  ;;  %1991 = vmatprep.subr.bf16.mxu1 %v7026_v27  ;;  %v7071_v44 = vld [vmem:[#allocation20_spill] sm:$0xff]  ;;  %v7072_v27 = vld [vmem:[#allocation25_spill] sm:$0xff] }
 0x393   :  { %1951 = vmatpush1.bf16.msra.mxu0 %v7027_v32  ;;  %1992 = vmatpush1.bf16.msra.mxu1 %v7028_v16  ;;  %v7073_v32 = vld [vmem:[#allocation22_spill] sm:$0xff]  ;;  %v7074_v16 = vld [vmem:[#allocation27_spill] sm:$0xff] }
 0x394   :  { %1952 = vmatprep.subr.bf16.mxu0 %v7029_v0  ;;  %1993 = vmatprep.subr.bf16.mxu1 %v7030_v33  ;;  %v7075_v0 = vld [vmem:[#allocation24_spill] sm:$0xff]  ;;  %v7076_v33 = vld [vmem:[#allocation29_spill] sm:$0xff] }
 0x395   :  { %v4363_v37 = vpop.eup %4362 }
 0x396   :  { %v1849_v30 = vmul.f32 %v4363_v37, %v1843_v19  ;;  %v5739_v19 = vld [vmem:[#allocation8 + $0xc8] ss:$16 sps:$4 sm:$0xff]   ;;  %v5742_v37 = vld [vmem:[#allocation8 + $0xa4] ss:$16 sps:$4 sm:$0xff]  }
 0x397   :  { %1953 = vmatpush1.bf16.msra.mxu0 %v7031_v31  ;;  %1994 = vmatpush1.bf16.msra.mxu1 %v7032_v39  ;;  %v7077_v31 = vld [vmem:[#allocation26_spill] sm:$0xff]  ;;  %v7078_v39 = vld [vmem:[#allocation31_spill] sm:$0xff]  ;;  %7101 = vst [vmem:[#allocation53_spill] sm:$0xff] %v5739_v19  ;;  %7102 = vst [vmem:[#allocation54_spill] sm:$0xff] %v5742_v37 }
 0x398   :  { %2046 = vmatprep.subr.bf16.mxu0 %v5468_v35  ;;  %2087 = vmatprep.subr.bf16.mxu1 %v7069_v25  ;;  %v1937_v62 = vpack.c.bf16 %v1849_v30, %v1849_v30  ;;  %v5745_v30 = vld [vmem:[#allocation8 + $0xac] ss:$16 sps:$4 sm:$0xff]  }
 0x399   :  { %7103 = vst [vmem:[#allocation55_spill] sm:$0xff] %v5745_v30 }
 0x39a   :  { %1971 = vmatmul.mubr.bf16.vlgmr.msra.gmra.mxu0 %v1937_v62  ;;  %2012 = vmatmul.mubr.bf16.vlgmr.msra.gmra.mxu1 %v1937_v62 }
 0x39b   :  { %2047 = vmatpush1.bf16.msra.mxu0 %v7070_v38  ;;  %2088 = vmatpush1.bf16.msra.mxu1 %v7071_v44 }
 0x39c   :  { %2048 = vmatprep.subr.bf16.mxu0 %v7072_v27  ;;  %2089 = vmatprep.subr.bf16.mxu1 %v7073_v32 }
 0x39d   :  { %2078 = vmatprep.mubr.bf16.mxu0 %v6967_v29  ;;  %2119 = vmatprep.mubr.bf16.mxu1 %v6967_v29 }
 0x39f   :  { %2049 = vmatpush1.bf16.msra.mxu0 %v7074_v16  ;;  %2090 = vmatpush1.bf16.msra.mxu1 %v7075_v0 }
 0x3a0   :  { %2050 = vmatprep.subr.bf16.mxu0 %v7076_v33  ;;  %2091 = vmatprep.subr.bf16.mxu1 %v7077_v31 }
 0x3a3   :  { %2051 = vmatpush1.bf16.msra.mxu0 %v7078_v39  ;;  %2092 = vmatpush1.bf16.msra.mxu1 %v7079_v51 }
 0x3a4   :  { %2052 = vmatprep.subr.bf16.mxu0 %v7080_v52  ;;  %2093 = vmatprep.subr.bf16.mxu1 %v7081_v54 }
 0x3a7   :  { %2053 = vmatpush1.bf16.msra.mxu0 %v7082_v55  ;;  %2094 = vmatpush1.bf16.msra.mxu1 %v7083_v56 }
 0x3a8   :  { %2054 = vmatprep.subr.bf16.mxu0 %v7084_v57  ;;  %2095 = vmatprep.subr.bf16.mxu1 %v7085_v58 }
 0x3ab   :  { %2055 = vmatpush1.bf16.msra.mxu0 %v7086_v59  ;;  %2096 = vmatpush1.bf16.msra.mxu1 %v7087_v60 }
 0x3ac   :  { %2056 = vmatprep.subr.bf16.mxu0 %v7088_v61  ;;  %2097 = vmatprep.subr.bf16.mxu1 %v7089_v2 }
 0x3af   :  { %2057 = vmatpush1.bf16.msra.mxu0 %v7090_v3  ;;  %2098 = vmatpush1.bf16.msra.mxu1 %v7091_v4 }
 0x3b0   :  { %2058 = vmatprep.subr.bf16.mxu0 %v7092_v5  ;;  %2099 = vmatprep.subr.bf16.mxu1 %v7093_v6 }
 0x3b3   :  { %2059 = vmatpush1.bf16.msra.mxu0 %v5550_v41  ;;  %2100 = vmatpush1.bf16.msra.mxu1 %v5553_v23 }
 0x3b4   :  { %2060 = vmatprep.subr.bf16.mxu0 %v5556_v28  ;;  %2101 = vmatprep.subr.bf16.mxu1 %v5559_v42 }
 0x3b7   :  { %2061 = vmatpush1.bf16.msra.mxu0 %v5562_v20  ;;  %2102 = vmatpush1.bf16.msra.mxu1 %v5565_v21 }
 0x3b8   :  { %2151 = vmatprep.subr.bf16.mxu0 %v5716_v36  ;;  %2192 = vmatprep.subr.bf16.mxu1 %v5719_v10 }
 0x3ba   :  { %2079 = vmatmul.mubr.bf16.vlgmr.msra.gmra.mxu0 %v1937_v62  ;;  %2120 = vmatmul.mubr.bf16.vlgmr.msra.gmra.mxu1 %v1937_v62  ;;  %v5748_v62 = vld [vmem:[#allocation8 + $0xa0] ss:$16 sps:$4 sm:$0xff]  }
 0x3bb   :  { %2152 = vmatpush1.bf16.msra.mxu0 %v5722_v7  ;;  %2193 = vmatpush1.bf16.msra.mxu1 %v5725_v11  ;;  %7104 = vst [vmem:[#allocation56_spill] sm:$0xff] %v5748_v62 }
 0x3bc   :  { %2153 = vmatprep.subr.bf16.mxu0 %v5728_v14  ;;  %2194 = vmatprep.subr.bf16.mxu1 %v5731_v49  ;;  %v5751_v49 = vld [vmem:[#allocation8 + $0xa8] ss:$16 sps:$4 sm:$0xff]  }
 0x3bd   :  { %2183 = vmatprep.mubr.bf16.mxu0 %v6967_v29  ;;  %2224 = vmatprep.mubr.bf16.mxu1 %v6967_v29  ;;  %7105 = vst [vmem:[#allocation57_spill] sm:$0xff] %v5751_v49 }
 0x3bf   :  { %2154 = vmatpush1.bf16.msra.mxu0 %v5736_v50  ;;  %2195 = vmatpush1.bf16.msra.mxu1 %v5739_v19  ;;  %v5754_v50 = vld [vmem:[#allocation8 + $0x84] ss:$16 sps:$4 sm:$0xff]   ;;  %v5757_v19 = vld [vmem:[#allocation8 + $0x8c] ss:$16 sps:$4 sm:$0xff]  }
 0x3c0   :  { %2155 = vmatprep.subr.bf16.mxu0 %v5742_v37  ;;  %2196 = vmatprep.subr.bf16.mxu1 %v5745_v30  ;;  %7106 = vst [vmem:[#allocation58_spill] sm:$0xff] %v5754_v50  ;;  %7107 = vst [vmem:[#allocation59_spill] sm:$0xff] %v5757_v19  ;;  %v5760_v37 = vld [vmem:[#allocation8 + $0x80] ss:$16 sps:$4 sm:$0xff]   ;;  %v5763_v30 = vld [vmem:[#allocation8 + $0x88] ss:$16 sps:$4 sm:$0xff]  }
 0x3c1   :  { %7108 = vst [vmem:[#allocation60_spill] sm:$0xff] %v5760_v37  ;;  %7109 = vst [vmem:[#allocation61_spill] sm:$0xff] %v5763_v30 }
 0x3c3   :  { %2156 = vmatpush1.bf16.msra.mxu0 %v5748_v62  ;;  %2197 = vmatpush1.bf16.msra.mxu1 %v5751_v49  ;;  %v5766_v62 = vld [vmem:[#allocation8 + $0x64] ss:$16 sps:$4 sm:$0xff]   ;;  %v5769_v49 = vld [vmem:[#allocation8 + $0x6c] ss:$16 sps:$4 sm:$0xff]  }
 0x3c4   :  { %2157 = vmatprep.subr.bf16.mxu0 %v5754_v50  ;;  %2198 = vmatprep.subr.bf16.mxu1 %v5757_v19  ;;  %7110 = vst [vmem:[#allocation62_spill] sm:$0xff] %v5766_v62  ;;  %7111 = vst [vmem:[#allocation63_spill] sm:$0xff] %v5769_v49  ;;  %v5772_v50 = vld [vmem:[#allocation8 + $0x60] ss:$16 sps:$4 sm:$0xff]   ;;  %v5775_v19 = vld [vmem:[#allocation8 + $0x68] ss:$16 sps:$4 sm:$0xff]  }
 0x3c5   :  { %7112 = vst [vmem:[#allocation64_spill] sm:$0xff] %v5772_v50  ;;  %7113 = vst [vmem:[#allocation65_spill] sm:$0xff] %v5775_v19 }
 0x3c7   :  { %2158 = vmatpush1.bf16.msra.mxu0 %v5760_v37  ;;  %2199 = vmatpush1.bf16.msra.mxu1 %v5763_v30  ;;  %v5778_v37 = vld [vmem:[#allocation8 + $0x44] ss:$16 sps:$4 sm:$0xff]   ;;  %v5781_v30 = vld [vmem:[#allocation8 + $0x4c] ss:$16 sps:$4 sm:$0xff]  }
 0x3c8   :  { %2159 = vmatprep.subr.bf16.mxu0 %v5766_v62  ;;  %2200 = vmatprep.subr.bf16.mxu1 %v5769_v49  ;;  %7114 = vst [vmem:[#allocation66_spill] sm:$0xff] %v5778_v37  ;;  %7115 = vst [vmem:[#allocation67_spill] sm:$0xff] %v5781_v30  ;;  %v5784_v62 = vld [vmem:[#allocation8 + $0x40] ss:$16 sps:$4 sm:$0xff]   ;;  %v5787_v49 = vld [vmem:[#allocation8 + $0x48] ss:$16 sps:$4 sm:$0xff]  }
 0x3c9   :  { %7116 = vst [vmem:[#allocation68_spill] sm:$0xff] %v5784_v62  ;;  %7117 = vst [vmem:[#allocation69_spill] sm:$0xff] %v5787_v49 }
 0x3cb   :  { %2160 = vmatpush1.bf16.msra.mxu0 %v5772_v50  ;;  %2201 = vmatpush1.bf16.msra.mxu1 %v5775_v19  ;;  %v5790_v50 = vld [vmem:[#allocation8 + $0x24] ss:$16 sps:$4 sm:$0xff]   ;;  %v5793_v19 = vld [vmem:[#allocation8 + $0x2c] ss:$16 sps:$4 sm:$0xff]  }
 0x3cc   :  { %2161 = vmatprep.subr.bf16.mxu0 %v5778_v37  ;;  %2202 = vmatprep.subr.bf16.mxu1 %v5781_v30  ;;  %7118 = vst [vmem:[#allocation21_spill] sm:$0xff] %v5790_v50  ;;  %7119 = vst [vmem:[#allocation77_spill] sm:$0xff] %v5793_v19  ;;  %v5796_v37 = vld [vmem:[#allocation8 + $0x20] ss:$16 sps:$4 sm:$0xff]   ;;  %v5799_v30 = vld [vmem:[#allocation8 + $0x28] ss:$16 sps:$4 sm:$0xff]  }
 0x3cd   :  { %7120 = vst [vmem:[#allocation79_spill] sm:$0xff] %v5796_v37  ;;  %7121 = vst [vmem:[#allocation80_spill] sm:$0xff] %v5799_v30 }
 0x3cf   :  { %2162 = vmatpush1.bf16.msra.mxu0 %v5784_v62  ;;  %2203 = vmatpush1.bf16.msra.mxu1 %v5787_v49  ;;  %v5802_v62 = vld [vmem:[#allocation8 + $0x4] ss:$16 sps:$4 sm:$0xff]   ;;  %v5805_v49 = vld [vmem:[#allocation8 + $0xc] ss:$16 sps:$4 sm:$0xff]  }
 0x3d0   :  { %2163 = vmatprep.subr.bf16.mxu0 %v5790_v50  ;;  %2204 = vmatprep.subr.bf16.mxu1 %v5793_v19  ;;  %7122 = vst [vmem:[#allocation78_spill] sm:$0xff] %v5802_v62  ;;  %7123 = vst [vmem:[#allocation18_spill] sm:$0xff] %v5805_v49  ;;  %v5808_v50 = vld [vmem:[#allocation8] ss:$16 sps:$4 sm:$0xff]   ;;  %v5811_v19 = vld [vmem:[#allocation8 + $0x8] ss:$16 sps:$4 sm:$0xff]  }
 0x3d1   :  { %7124 = vst [vmem:[#allocation23_spill] sm:$0xff] %v5808_v50  ;;  %7125 = vst [vmem:[#allocation20_spill] sm:$0xff] %v5811_v19 }
 0x3d3   :  { %2164 = vmatpush1.bf16.msra.mxu0 %v5796_v37  ;;  %2205 = vmatpush1.bf16.msra.mxu1 %v5799_v30  ;;  %v5814_v37 = vld [vmem:[#allocation7 + $0xe4] ss:$16 sps:$4 sm:$0xff]   ;;  %v5817_v30 = vld [vmem:[#allocation7 + $0xec] ss:$16 sps:$4 sm:$0xff]  }
 0x3d4   :  { %2165 = vmatprep.subr.bf16.mxu0 %v5802_v62  ;;  %2206 = vmatprep.subr.bf16.mxu1 %v5805_v49  ;;  %7126 = vst [vmem:[#allocation25_spill] sm:$0xff] %v5814_v37  ;;  %7127 = vst [vmem:[#allocation22_spill] sm:$0xff] %v5817_v30 }
 0x3d7   :  { %2166 = vmatpush1.bf16.msra.mxu0 %v5808_v50  ;;  %2207 = vmatpush1.bf16.msra.mxu1 %v5811_v19 }
 0x3d8   :  { %2238 = vmatprep.subr.bf16.mxu0 %v5814_v37  ;;  %2279 = vmatprep.subr.bf16.mxu1 %v5817_v30 }
 0x43a   :  { %v1885_v62 = vpop.f32.mrf.mxu0  ;;  %v1926_v14 = vpop.f32.mrf.mxu1 }
 0x43b   :  { %v1933_v21 = vadd.f32 %v1885_v62, %v5404_v22  ;;  %v1935_v62 = vadd.f32 %v1926_v14, %v5418_v34  ;;  %v7128_v14 = vld [vmem:[#allocation81_spill] sm:$0xff] }
 0x43c   :  { %v1887_v11 = vpop.f32.mrf.mxu0  ;;  %v1928_v49 = vpop.f32.mrf.mxu1 }
 0x43d   :  { %v1934_v42 = vadd.f32 %v1887_v11, %v5407_v24  ;;  %v1936_v4 = vadd.f32 %v1928_v49, %v5412_v26 }
 0x43e   :  { %v1889_v7 = vpop.f32.mrf.mxu0  ;;  %v1930_v10 = vpop.f32.mrf.mxu1 }
 0x440   :  { %v1890_v36 = vpop.f32.mrf.mxu0  ;;  %v1931_v50 = vpop.f32.mrf.mxu1 }
 0x45a   :  { %v1972_v20 = vpop.f32.mrf.mxu0  ;;  %v2013_v19 = vpop.f32.mrf.mxu1 }
 0x45b   :  { %v2020_v28 = vadd.f32 %v1972_v20, %v1933_v21  ;;  %v2022_v22 = vadd.f32 %v2013_v19, %v1935_v62 }
 0x45c   :  { %v1974_v37 = vpop.f32.mrf.mxu0  ;;  %v2015_v23 = vpop.f32.mrf.mxu1 }
 0x45d   :  { %v2024_v41 = vmul.f32 0.5, %v2020_v28  ;;  %v2021_v6 = vadd.f32 %v1974_v37, %v1934_v42  ;;  %v2023_v50 = vadd.f32 %v2015_v23, %v1936_v4  ;;  %v2026_v11 = vmul.f32 0.5, %v2022_v22 }
 0x45e   :  { %v1976_v30 = vpop.f32.mrf.mxu0  ;;  %v2017_v5 = vpop.f32.mrf.mxu1 }
 0x45f   :  { %4364 = vtanh.f32 %v2024_v41  ;;  %v2025_v7 = vmul.f32 0.5, %v2021_v6 }
 0x460   :  { %v1977_v10 = vpop.f32.mrf.mxu0  ;;  %v2018_v36 = vpop.f32.mrf.mxu1 }
 0x461   :  { %4366 = vtanh.f32 %v2025_v7  ;;  %v7129_v36 = vld [vmem:[#allocation83_spill] sm:$0xff] }
 0x462   :  { %4368 = vtanh.f32 %v2023_v50 }
 0x463   :  { %4370 = vtanh.f32 %v2026_v11 }
 0x46c   :  { %v4365_v21 = vpop.eup %4364 }
 0x46d   :  { %v2030_v20 = vmul.f32 0.5, %v4365_v21  ;;  %v7130_v21 = vld [vmem:[#allocation84_spill] sm:$0xff] }
 0x46e   :  { %v4367_v24 = vpop.eup %4366 }
 0x46f   :  { %v2033_v28 = vadd.f32 0.5, %v2030_v20  ;;  %v2031_v42 = vmul.f32 0.5, %v4367_v24  ;;  %v4369_v37 = vpop.eup %4368 }
 0x470   :  { %v4371_v22 = vpop.eup %4370 }
 0x471   :  { %v2034_v5 = vadd.f32 0.5, %v2031_v42  ;;  %v2038_v6 = vmul.f32 %v4369_v37, %v2033_v28  ;;  %v2032_v11 = vmul.f32 0.5, %v4371_v22  ;;  %v5834_v22 = vld [vmem:[#allocation7 + $0xc4] ss:$16 sps:$4 sm:$0xff]  }
 0x473   :  { %v2037_v41 = vmul.f32 %v2034_v5, %v5611_v9  ;;  %v2035_v5 = vadd.f32 0.5, %v2032_v11 }
 0x475   :  { %v5825_v49 = vadd.f32 %v2038_v6, %v2037_v41  ;;  %v7131_v6 = vld [vmem:[#allocation82_spill] sm:$0xff] }
 0x477   :  { %4372 = vtanh.f32 %v5825_v49 }
 0x47a   :  { %v2080_v23 = vpop.f32.mrf.mxu0  ;;  %v2121_v4 = vpop.f32.mrf.mxu1 }
 0x47b   :  { %v2128_v19 = vadd.f32 %v2080_v23, %v7128_v14  ;;  %v2130_v23 = vadd.f32 %v2121_v4, %v7131_v6 }
 0x47c   :  { %v2082_v30 = vpop.f32.mrf.mxu0  ;;  %v2123_v7 = vpop.f32.mrf.mxu1 }
 0x47d   :  { %v2132_v10 = vmul.f32 0.5, %v2128_v19  ;;  %v2129_v50 = vadd.f32 %v2082_v30, %v7129_v36  ;;  %v2131_v20 = vadd.f32 %v2123_v7, %v7130_v21  ;;  %v2134_v19 = vmul.f32 0.5, %v2130_v23  ;;  %v5837_v30 = vld [vmem:[#allocation7 + $0xcc] ss:$16 sps:$4 sm:$0xff]   ;;  %v5876_v23 = vld [vmem:[#allocation7 + $0x24] ss:$16 sps:$4 sm:$0xff]  }
 0x47e   :  { %v2084_v24 = vpop.f32.mrf.mxu0  ;;  %v2125_v62 = vpop.f32.mrf.mxu1 }
 0x47f   :  { %4374 = vtanh.f32 %v2132_v10  ;;  %v2133_v9 = vmul.f32 0.5, %v2129_v50 }
 0x480   :  { %v2085_v28 = vpop.f32.mrf.mxu0  ;;  %v2126_v42 = vpop.f32.mrf.mxu1 }
 0x481   :  { %4376 = vtanh.f32 %v2133_v9  ;;  %v5864_v28 = vld [vmem:[#allocation7 + $0x44] ss:$16 sps:$4 sm:$0xff]   ;;  %v5867_v42 = vld [vmem:[#allocation7 + $0x4c] ss:$16 sps:$4 sm:$0xff]  }
 0x482   :  { %4378 = vtanh.f32 %v2131_v20  ;;  %v5858_v20 = vld [vmem:[#allocation7 + $0x60] ss:$16 sps:$4 sm:$0xff]  }
 0x483   :  { %4380 = vtanh.f32 %v2134_v19  ;;  %v5882_v19 = vld [vmem:[#allocation7 + $0x20] ss:$16 sps:$4 sm:$0xff]  }
 0x484   :  { %v4373_v37 = vpop.eup %4372 }
 0x485   :  { %v2041_v41 = vmul.f32 %v4373_v37, %v2035_v5  ;;  %v5870_v37 = vld [vmem:[#allocation7 + $0x40] ss:$16 sps:$4 sm:$0xff]  }
 0x487   :  { %v2150_v14 = vpack.c.bf16 %v2041_v41, %v2041_v41  ;;  %v5873_v41 = vld [vmem:[#allocation7 + $0x48] ss:$16 sps:$4 sm:$0xff]  }
 0x489   :  { %2184 = vmatmul.mubr.bf16.vlgmr.msra.gmra.mxu0 %v2150_v14  ;;  %2225 = vmatmul.mubr.bf16.vlgmr.msra.gmra.mxu1 %v2150_v14  ;;  %v5879_v14 = vld [vmem:[#allocation7 + $0x2c] ss:$16 sps:$4 sm:$0xff]  }
 0x48a   :  { %2239 = vmatpush1.bf16.msra.mxu0 %v5618_v63  ;;  %2280 = vmatpush1.bf16.msra.mxu1 %v5621_v1 }
 0x48b   :  { %2240 = vmatprep.subr.bf16.mxu0 %v5834_v22  ;;  %2281 = vmatprep.subr.bf16.mxu1 %v5837_v30 }
 0x48c   :  { %v4375_v7 = vpop.eup %4374  ;;  %2270 = vmatprep.mubr.bf16.mxu0 %v6967_v29  ;;  %2311 = vmatprep.mubr.bf16.mxu1 %v6967_v29 }
 0x48d   :  { %v2138_v4 = vmul.f32 0.5, %v4375_v7  ;;  %v5885_v7 = vld [vmem:[#allocation7 + $0x28] ss:$16 sps:$4 sm:$0xff]  }
 0x48e   :  { %v4377_v10 = vpop.eup %4376  ;;  %2241 = vmatpush1.bf16.msra.mxu0 %v5628_v53  ;;  %2282 = vmatpush1.bf16.msra.mxu1 %v5631_v18 }
 0x48f   :  { %v2141_v36 = vadd.f32 0.5, %v2138_v4  ;;  %v2139_v50 = vmul.f32 0.5, %v4377_v10  ;;  %2242 = vmatprep.subr.bf16.mxu0 %v5634_v8  ;;  %2283 = vmatprep.subr.bf16.mxu1 %v5637_v43  ;;  %v4379_v24 = vpop.eup %4378  ;;  %v5888_v10 = vld [vmem:[#allocation7 + $0x4] ss:$16 sps:$4 sm:$0xff]  }
 0x490   :  { %v4381_v5 = vpop.eup %4380 }
 0x491   :  { %v2142_v62 = vadd.f32 0.5, %v2139_v50  ;;  %v2146_v11 = vmul.f32 %v4379_v24, %v2141_v36  ;;  %v2140_v6 = vmul.f32 0.5, %v4381_v5  ;;  %v5891_v36 = vld [vmem:[#allocation7 + $0xc] ss:$16 sps:$4 sm:$0xff]  }
 0x492   :  { %2243 = vmatpush1.bf16.msra.mxu0 %v5640_v12  ;;  %2284 = vmatpush1.bf16.msra.mxu1 %v5643_v13  ;;  %v7155_v5 = vld [vmem:[#allocation60_spill] sm:$0xff] }
 0x493   :  { %v2145_v9 = vmul.f32 %v2142_v62, %v5653_v45  ;;  %2244 = vmatprep.subr.bf16.mxu0 %v5647_v15  ;;  %2285 = vmatprep.subr.bf16.mxu1 %v5650_v17  ;;  %v5861_v45 = vld [vmem:[#allocation7 + $0x68] ss:$16 sps:$4 sm:$0xff]   ;;  %v2143_v4 = vadd.f32 0.5, %v2140_v6  ;;  %v5894_v62 = vld [vmem:[#allocation7] ss:$16 sps:$4 sm:$0xff]  }
 0x494   :  { %v7156_v6 = vld [vmem:[#allocation61_spill] sm:$0xff] }
 0x495   :  { %v5851_v21 = vadd.f32 %v2146_v11, %v2145_v9  ;;  %v5897_v11 = vld [vmem:[#allocation7 + $0x8] ss:$16 sps:$4 sm:$0xff]  }
 0x496   :  { %2245 = vmatpush1.bf16.msra.mxu0 %v5655_v46  ;;  %2286 = vmatpush1.bf16.msra.mxu1 %v5658_v47 }
 0x497   :  { %4382 = vtanh.f32 %v5851_v21  ;;  %2246 = vmatprep.subr.bf16.mxu0 %v5662_v40  ;;  %2287 = vmatprep.subr.bf16.mxu1 %v5665_v48 }
 0x49a   :  { %2247 = vmatpush1.bf16.msra.mxu0 %v5858_v20  ;;  %2288 = vmatpush1.bf16.msra.mxu1 %v5861_v45 }
 0x49b   :  { %2248 = vmatprep.subr.bf16.mxu0 %v5864_v28  ;;  %2289 = vmatprep.subr.bf16.mxu1 %v5867_v42 }
 0x49e   :  { %2249 = vmatpush1.bf16.msra.mxu0 %v5870_v37  ;;  %2290 = vmatpush1.bf16.msra.mxu1 %v5873_v41 }
 0x49f   :  { %2250 = vmatprep.subr.bf16.mxu0 %v5876_v23  ;;  %2291 = vmatprep.subr.bf16.mxu1 %v5879_v14 }
 0x4a2   :  { %2251 = vmatpush1.bf16.msra.mxu0 %v5882_v19  ;;  %2292 = vmatpush1.bf16.msra.mxu1 %v5885_v7 }
 0x4a3   :  { %2252 = vmatprep.subr.bf16.mxu0 %v5888_v10  ;;  %2293 = vmatprep.subr.bf16.mxu1 %v5891_v36 }
 0x4a4   :  { %v4383_v50 = vpop.eup %4382 }
 0x4a5   :  { %v2149_v24 = vmul.f32 %v4383_v50, %v2143_v4  ;;  %v7157_v4 = vld [vmem:[#allocation62_spill] sm:$0xff]  ;;  %v7158_v50 = vld [vmem:[#allocation63_spill] sm:$0xff] }
 0x4a6   :  { %2253 = vmatpush1.bf16.msra.mxu0 %v5894_v62  ;;  %2294 = vmatpush1.bf16.msra.mxu1 %v5897_v11 }
 0x4a7   :  { %v2237_v9 = vpack.c.bf16 %v2149_v24, %v2149_v24  ;;  %2346 = vmatprep.subr.bf16.mxu0 %v5468_v35  ;;  %2387 = vmatprep.subr.bf16.mxu1 %v7069_v25  ;;  %v7132_v35 = vld [vmem:[#allocation73_spill] sm:$0xff]  ;;  %v7133_v25 = vld [vmem:[#allocation76_spill] sm:$0xff] }
 0x4a8   :  { %v7159_v24 = vld [vmem:[#allocation64_spill] sm:$0xff] }
 0x4a9   :  { %2271 = vmatmul.mubr.bf16.vlgmr.msra.gmra.mxu0 %v2237_v9  ;;  %2312 = vmatmul.mubr.bf16.vlgmr.msra.gmra.mxu1 %v2237_v9 }
 0x4aa   :  { %2347 = vmatpush1.bf16.msra.mxu0 %v7070_v38  ;;  %2388 = vmatpush1.bf16.msra.mxu1 %v7071_v44  ;;  %v7134_v38 = vld [vmem:[#allocation74_spill] sm:$0xff]  ;;  %v7135_v44 = vld [vmem:[#allocation40_spill] sm:$0xff] }
 0x4ab   :  { %2348 = vmatprep.subr.bf16.mxu0 %v7072_v27  ;;  %2389 = vmatprep.subr.bf16.mxu1 %v7073_v32  ;;  %v7136_v27 = vld [vmem:[#allocation41_spill] sm:$0xff]  ;;  %v7137_v32 = vld [vmem:[#allocation42_spill] sm:$0xff] }
 0x4ac   :  { %2378 = vmatprep.mubr.bf16.mxu0 %v6967_v29  ;;  %2419 = vmatprep.mubr.bf16.mxu1 %v6967_v29 }
 0x4ae   :  { %2349 = vmatpush1.bf16.msra.mxu0 %v7074_v16  ;;  %2390 = vmatpush1.bf16.msra.mxu1 %v7075_v0  ;;  %v7138_v16 = vld [vmem:[#allocation43_spill] sm:$0xff]  ;;  %v7139_v0 = vld [vmem:[#allocation44_spill] sm:$0xff] }
 0x4af   :  { %2350 = vmatprep.subr.bf16.mxu0 %v7076_v33  ;;  %2391 = vmatprep.subr.bf16.mxu1 %v7077_v31  ;;  %v7140_v33 = vld [vmem:[#allocation45_spill] sm:$0xff]  ;;  %v7141_v31 = vld [vmem:[#allocation46_spill] sm:$0xff] }
 0x4b2   :  { %2351 = vmatpush1.bf16.msra.mxu0 %v7078_v39  ;;  %2392 = vmatpush1.bf16.msra.mxu1 %v7079_v51  ;;  %v7142_v39 = vld [vmem:[#allocation47_spill] sm:$0xff]  ;;  %v7143_v51 = vld [vmem:[#allocation48_spill] sm:$0xff] }
 0x4b3   :  { %2352 = vmatprep.subr.bf16.mxu0 %v7080_v52  ;;  %2393 = vmatprep.subr.bf16.mxu1 %v7081_v54  ;;  %v7144_v52 = vld [vmem:[#allocation49_spill] sm:$0xff]  ;;  %v7145_v54 = vld [vmem:[#allocation50_spill] sm:$0xff] }
 0x4b6   :  { %2353 = vmatpush1.bf16.msra.mxu0 %v7082_v55  ;;  %2394 = vmatpush1.bf16.msra.mxu1 %v7083_v56  ;;  %v7146_v55 = vld [vmem:[#allocation51_spill] sm:$0xff]  ;;  %v7147_v56 = vld [vmem:[#allocation52_spill] sm:$0xff] }
 0x4b7   :  { %2354 = vmatprep.subr.bf16.mxu0 %v7084_v57  ;;  %2395 = vmatprep.subr.bf16.mxu1 %v7085_v58  ;;  %v7148_v57 = vld [vmem:[#allocation53_spill] sm:$0xff]  ;;  %v7149_v58 = vld [vmem:[#allocation54_spill] sm:$0xff] }
 0x4ba   :  { %2355 = vmatpush1.bf16.msra.mxu0 %v7086_v59  ;;  %2396 = vmatpush1.bf16.msra.mxu1 %v7087_v60  ;;  %v7150_v59 = vld [vmem:[#allocation55_spill] sm:$0xff]  ;;  %v7151_v60 = vld [vmem:[#allocation56_spill] sm:$0xff] }
 0x4bb   :  { %2356 = vmatprep.subr.bf16.mxu0 %v7088_v61  ;;  %2397 = vmatprep.subr.bf16.mxu1 %v7089_v2  ;;  %v7152_v61 = vld [vmem:[#allocation57_spill] sm:$0xff]  ;;  %v7153_v2 = vld [vmem:[#allocation58_spill] sm:$0xff] }
 0x4be   :  { %2357 = vmatpush1.bf16.msra.mxu0 %v7090_v3  ;;  %2398 = vmatpush1.bf16.msra.mxu1 %v7132_v35  ;;  %v7154_v3 = vld [vmem:[#allocation59_spill] sm:$0xff]  ;;  %v7161_v35 = vld [vmem:[#allocation66_spill] sm:$0xff] }
 0x4bf   :  { %2358 = vmatprep.subr.bf16.mxu0 %v7133_v25  ;;  %2399 = vmatprep.subr.bf16.mxu1 %v7134_v38  ;;  %v7162_v25 = vld [vmem:[#allocation67_spill] sm:$0xff]  ;;  %v7163_v38 = vld [vmem:[#allocation68_spill] sm:$0xff] }
 0x4c2   :  { %2359 = vmatpush1.bf16.msra.mxu0 %v7135_v44  ;;  %2400 = vmatpush1.bf16.msra.mxu1 %v7136_v27  ;;  %v7164_v44 = vld [vmem:[#allocation69_spill] sm:$0xff] }
 0x4c3   :  { %2360 = vmatprep.subr.bf16.mxu0 %v7137_v32  ;;  %2401 = vmatprep.subr.bf16.mxu1 %v7138_v16  ;;  %v7165_v27 = vld [vmem:[#allocation21_spill] sm:$0xff]  ;;  %v7167_v16 = vld [vmem:[#allocation79_spill] sm:$0xff] }
 0x4c4   :  { %v7166_v32 = vld [vmem:[#allocation77_spill] sm:$0xff] }
 0x4c6   :  { %2361 = vmatpush1.bf16.msra.mxu0 %v7139_v0  ;;  %2402 = vmatpush1.bf16.msra.mxu1 %v7140_v33  ;;  %v7168_v0 = vld [vmem:[#allocation80_spill] sm:$0xff]  ;;  %v7169_v33 = vld [vmem:[#allocation78_spill] sm:$0xff] }
 0x4c7   :  { %2451 = vmatprep.subr.bf16.mxu0 %v7141_v31  ;;  %2492 = vmatprep.subr.bf16.mxu1 %v7142_v39 }
 0x4c9   :  { %2379 = vmatmul.mubr.bf16.vlgmr.msra.gmra.mxu0 %v2237_v9  ;;  %2420 = vmatmul.mubr.bf16.vlgmr.msra.gmra.mxu1 %v2237_v9  ;;  %v7160_v9 = vld [vmem:[#allocation65_spill] sm:$0xff] }
 0x4ca   :  { %2452 = vmatpush1.bf16.msra.mxu0 %v7143_v51  ;;  %2493 = vmatpush1.bf16.msra.mxu1 %v7144_v52 }
 0x4cb   :  { %2453 = vmatprep.subr.bf16.mxu0 %v7145_v54  ;;  %2494 = vmatprep.subr.bf16.mxu1 %v7146_v55 }
 0x4cc   :  { %2483 = vmatprep.mubr.bf16.mxu0 %v6967_v29  ;;  %2524 = vmatprep.mubr.bf16.mxu1 %v6967_v29 }
 0x4ce   :  { %2454 = vmatpush1.bf16.msra.mxu0 %v7147_v56  ;;  %2495 = vmatpush1.bf16.msra.mxu1 %v7148_v57 }
 0x4cf   :  { %2455 = vmatprep.subr.bf16.mxu0 %v7149_v58  ;;  %2496 = vmatprep.subr.bf16.mxu1 %v7150_v59 }
 0x4d2   :  { %2456 = vmatpush1.bf16.msra.mxu0 %v7151_v60  ;;  %2497 = vmatpush1.bf16.msra.mxu1 %v7152_v61 }
 0x4d3   :  { %2457 = vmatprep.subr.bf16.mxu0 %v7153_v2  ;;  %2498 = vmatprep.subr.bf16.mxu1 %v7154_v3  ;;  %v7176_v2 = vld [vmem:[#allocation17_spill] sm:$0xff] }
 0x4d6   :  { %2458 = vmatpush1.bf16.msra.mxu0 %v7155_v5  ;;  %2499 = vmatpush1.bf16.msra.mxu1 %v7156_v6  ;;  %v7175_v5 = vld [vmem:[#allocation19_spill] sm:$0xff] }
 0x4d7   :  { %2459 = vmatprep.subr.bf16.mxu0 %v7157_v4  ;;  %2500 = vmatprep.subr.bf16.mxu1 %v7158_v50 }
 0x4da   :  { %2460 = vmatpush1.bf16.msra.mxu0 %v7159_v24  ;;  %2501 = vmatpush1.bf16.msra.mxu1 %v7160_v9  ;;  %v7170_v24 = vld [vmem:[#allocation18_spill] sm:$0xff]  ;;  %v7171_v9 = vld [vmem:[#allocation23_spill] sm:$0xff] }
 0x4db   :  { %2461 = vmatprep.subr.bf16.mxu0 %v7161_v35  ;;  %2502 = vmatprep.subr.bf16.mxu1 %v7162_v25  ;;  %v7172_v35 = vld [vmem:[#allocation20_spill] sm:$0xff]  ;;  %v7173_v25 = vld [vmem:[#allocation25_spill] sm:$0xff] }
 0x4de   :  { %2462 = vmatpush1.bf16.msra.mxu0 %v7163_v38  ;;  %2503 = vmatpush1.bf16.msra.mxu1 %v7164_v44  ;;  %v7174_v38 = vld [vmem:[#allocation22_spill] sm:$0xff] }
 0x4df   :  { %2463 = vmatprep.subr.bf16.mxu0 %v7165_v27  ;;  %2504 = vmatprep.subr.bf16.mxu1 %v7166_v32 }
 0x4e2   :  { %2464 = vmatpush1.bf16.msra.mxu0 %v7167_v16  ;;  %2505 = vmatpush1.bf16.msra.mxu1 %v7168_v0 }
 0x4e3   :  { %2465 = vmatprep.subr.bf16.mxu0 %v7169_v33  ;;  %2506 = vmatprep.subr.bf16.mxu1 %v7170_v24 }
 0x4e6   :  { %2466 = vmatpush1.bf16.msra.mxu0 %v7171_v9  ;;  %2507 = vmatpush1.bf16.msra.mxu1 %v7172_v35 }
 0x4e7   :  { %2538 = vmatprep.subr.bf16.mxu0 %v7173_v25  ;;  %2579 = vmatprep.subr.bf16.mxu1 %v7174_v38 }
 0x549   :  { %v2185_v44 = vpop.f32.mrf.mxu0  ;;  %v2226_v27 = vpop.f32.mrf.mxu1 }
 0x54a   :  { %v2233_v33 = vadd.f32 %v2185_v44, %v7175_v5  ;;  %v2235_v44 = vadd.f32 %v2226_v27, %v5418_v34  ;;  %v7177_v27 = vld [vmem:[#allocation85_spill] sm:$0xff] }
 0x54b   :  { %v2187_v50 = vpop.f32.mrf.mxu0  ;;  %v2228_v32 = vpop.f32.mrf.mxu1 }
 0x54c   :  { %v2234_v9 = vadd.f32 %v2187_v50, %v7176_v2  ;;  %v2236_v57 = vadd.f32 %v2228_v32, %v5412_v26 }
 0x54d   :  { %v2189_v4 = vpop.f32.mrf.mxu0  ;;  %v2230_v16 = vpop.f32.mrf.mxu1 }
 0x54f   :  { %v2190_v6 = vpop.f32.mrf.mxu0  ;;  %v2231_v0 = vpop.f32.mrf.mxu1 }
 0x569   :  { %v2272_v3 = vpop.f32.mrf.mxu0  ;;  %v2313_v24 = vpop.f32.mrf.mxu1 }
 0x56a   :  { %v2320_v61 = vadd.f32 %v2272_v3, %v2233_v33  ;;  %v2322_v5 = vadd.f32 %v2313_v24, %v2235_v44 }
 0x56b   :  { %v2274_v35 = vpop.f32.mrf.mxu0  ;;  %v2315_v60 = vpop.f32.mrf.mxu1 }
 0x56c   :  { %v2324_v25 = vmul.f32 0.5, %v2320_v61  ;;  %v2321_v59 = vadd.f32 %v2274_v35, %v2234_v9  ;;  %v2323_v0 = vadd.f32 %v2315_v60, %v2236_v57  ;;  %v2326_v50 = vmul.f32 0.5, %v2322_v5 }
 0x56d   :  { %v2276_v38 = vpop.f32.mrf.mxu0  ;;  %v2317_v58 = vpop.f32.mrf.mxu1 }
 0x56e   :  { %4384 = vtanh.f32 %v2324_v25  ;;  %v2325_v4 = vmul.f32 0.5, %v2321_v59 }
 0x56f   :  { %v2277_v16 = vpop.f32.mrf.mxu0  ;;  %v2318_v6 = vpop.f32.mrf.mxu1 }
 0x570   :  { %4386 = vtanh.f32 %v2325_v4  ;;  %v7178_v6 = vld [vmem:[#allocation87_spill] sm:$0xff] }
 0x571   :  { %4388 = vtanh.f32 %v2323_v0 }
 0x572   :  { %4390 = vtanh.f32 %v2326_v50 }
 0x57b   :  { %v4385_v3 = vpop.eup %4384 }
 0x57c   :  { %v2330_v33 = vmul.f32 0.5, %v4385_v3  ;;  %v7179_v3 = vld [vmem:[#allocation88_spill] sm:$0xff] }
 0x57d   :  { %v4387_v2 = vpop.eup %4386 }
 0x57e   :  { %v2333_v61 = vadd.f32 0.5, %v2330_v33  ;;  %v2331_v9 = vmul.f32 0.5, %v4387_v2  ;;  %v4389_v35 = vpop.eup %4388 }
 0x57f   :  { %v4391_v5 = vpop.eup %4390 }
 0x580   :  { %v2334_v58 = vadd.f32 0.5, %v2331_v9  ;;  %v2338_v59 = vmul.f32 %v4389_v35, %v2333_v61  ;;  %v2332_v50 = vmul.f32 0.5, %v4391_v5 }
 0x582   :  { %v2337_v25 = vmul.f32 %v2334_v58, %v5825_v49  ;;  %v2335_v58 = vadd.f32 0.5, %v2332_v50  ;;  %v6048_v50 = vld [vmem:[#allocation5 + $0xa4] ss:$16 sps:$4 sm:$0xff]  }
 0x584   :  { %v5975_v38 = vadd.f32 %v2338_v59, %v2337_v25  ;;  %v7180_v59 = vld [vmem:[#allocation86_spill] sm:$0xff] }
 0x586   :  { %4392 = vtanh.f32 %v5975_v38 }
 0x589   :  { %v2380_v57 = vpop.f32.mrf.mxu0  ;;  %v2421_v60 = vpop.f32.mrf.mxu1 }
 0x58a   :  { %v2428_v24 = vadd.f32 %v2380_v57, %v7177_v27  ;;  %v2430_v57 = vadd.f32 %v2421_v60, %v7180_v59  ;;  %v6075_v59 = vld [vmem:[#allocation5 + $0x6c] ss:$16 sps:$4 sm:$0xff]  }
 0x58b   :  { %v2382_v32 = vpop.f32.mrf.mxu0  ;;  %v2423_v4 = vpop.f32.mrf.mxu1 }
 0x58c   :  { %v2432_v16 = vmul.f32 0.5, %v2428_v24  ;;  %v2429_v0 = vadd.f32 %v2382_v32, %v7178_v6  ;;  %v2431_v33 = vadd.f32 %v2423_v4, %v7179_v3  ;;  %v2434_v24 = vmul.f32 0.5, %v2430_v57  ;;  %v6054_v3 = vld [vmem:[#allocation5 + $0xa0] ss:$16 sps:$4 sm:$0xff]  }
 0x58d   :  { %v2384_v2 = vpop.f32.mrf.mxu0  ;;  %v2425_v44 = vpop.f32.mrf.mxu1  ;;  %v6078_v57 = vld [vmem:[#allocation5 + $0x60] ss:$16 sps:$4 sm:$0xff]  }
 0x58e   :  { %4394 = vtanh.f32 %v2432_v16  ;;  %v2433_v49 = vmul.f32 0.5, %v2429_v0  ;;  %v6042_v2 = vld [vmem:[#allocation5 + $0xc0] ss:$16 sps:$4 sm:$0xff]   ;;  %v6045_v44 = vld [vmem:[#allocation5 + $0xc8] ss:$16 sps:$4 sm:$0xff]  }
 0x58f   :  { %v2385_v61 = vpop.f32.mrf.mxu0  ;;  %v2426_v9 = vpop.f32.mrf.mxu1 }
 0x590   :  { %4396 = vtanh.f32 %v2433_v49  ;;  %v6051_v49 = vld [vmem:[#allocation5 + $0xac] ss:$16 sps:$4 sm:$0xff]   ;;  %v6060_v61 = vld [vmem:[#allocation5 + $0x84] ss:$16 sps:$4 sm:$0xff]  }
 0x591   :  { %4398 = vtanh.f32 %v2431_v33  ;;  %v6057_v33 = vld [vmem:[#allocation5 + $0xa8] ss:$16 sps:$4 sm:$0xff]   ;;  %v6063_v9 = vld [vmem:[#allocation5 + $0x8c] ss:$16 sps:$4 sm:$0xff]  }
 0x592   :  { %4400 = vtanh.f32 %v2434_v24  ;;  %v6084_v24 = vld [vmem:[#allocation5 + $0x44] ss:$16 sps:$4 sm:$0xff]  }
 0x593   :  { %v4393_v35 = vpop.eup %4392 }
 0x594   :  { %v2341_v25 = vmul.f32 %v4393_v35, %v2335_v58  ;;  %v6066_v58 = vld [vmem:[#allocation5 + $0x80] ss:$16 sps:$4 sm:$0xff]   ;;  %v6069_v35 = vld [vmem:[#allocation5 + $0x88] ss:$16 sps:$4 sm:$0xff]  }
 0x596   :  { %v2450_v27 = vpack.c.bf16 %v2341_v25, %v2341_v25  ;;  %v6072_v25 = vld [vmem:[#allocation5 + $0x64] ss:$16 sps:$4 sm:$0xff]  }
 0x598   :  { %2484 = vmatmul.mubr.bf16.vlgmr.msra.gmra.mxu0 %v2450_v27  ;;  %2525 = vmatmul.mubr.bf16.vlgmr.msra.gmra.mxu1 %v2450_v27  ;;  %v6081_v27 = vld [vmem:[#allocation5 + $0x68] ss:$16 sps:$4 sm:$0xff]  }
 0x599   :  { %2539 = vmatpush1.bf16.msra.mxu0 %v5618_v63  ;;  %2580 = vmatpush1.bf16.msra.mxu1 %v5621_v1 }
 0x59a   :  { %2540 = vmatprep.subr.bf16.mxu0 %v5834_v22  ;;  %2581 = vmatprep.subr.bf16.mxu1 %v5837_v30 }
 0x59b   :  { %v4395_v5 = vpop.eup %4394  ;;  %2570 = vmatprep.mubr.bf16.mxu0 %v6967_v29  ;;  %2611 = vmatprep.mubr.bf16.mxu1 %v6967_v29 }
 0x59c   :  { %v2438_v32 = vmul.f32 0.5, %v4395_v5  ;;  %v6087_v5 = vld [vmem:[#allocation5 + $0x4c] ss:$16 sps:$4 sm:$0xff]  }
 0x59d   :  { %v4397_v4 = vpop.eup %4396  ;;  %2541 = vmatpush1.bf16.msra.mxu0 %v5628_v53  ;;  %2582 = vmatpush1.bf16.msra.mxu1 %v5631_v18  ;;  %7181 = vst [vmem:[#allocation27_spill] sm:$0xff] %v6087_v5 }
 0x59e   :  { %v2441_v60 = vadd.f32 0.5, %v2438_v32  ;;  %v2439_v63 = vmul.f32 0.5, %v4397_v4  ;;  %2542 = vmatprep.subr.bf16.mxu0 %v5634_v8  ;;  %2583 = vmatprep.subr.bf16.mxu1 %v5637_v43  ;;  %v4399_v1 = vpop.eup %4398  ;;  %v6090_v32 = vld [vmem:[#allocation5 + $0x40] ss:$16 sps:$4 sm:$0xff]   ;;  %v6093_v4 = vld [vmem:[#allocation5 + $0x48] ss:$16 sps:$4 sm:$0xff]  }
 0x59f   :  { %v4401_v18 = vpop.eup %4400  ;;  %7182 = vst [vmem:[#allocation24_spill] sm:$0xff] %v6090_v32  ;;  %7183 = vst [vmem:[#allocation29_spill] sm:$0xff] %v6093_v4 }
 0x5a0   :  { %v2442_v16 = vadd.f32 0.5, %v2439_v63  ;;  %v2446_v6 = vmul.f32 %v4399_v1, %v2441_v60  ;;  %v2440_v8 = vmul.f32 0.5, %v4401_v18  ;;  %v6096_v60 = vld [vmem:[#allocation5 + $0x24] ss:$16 sps:$4 sm:$0xff]   ;;  %v6099_v63 = vld [vmem:[#allocation5 + $0x2c] ss:$16 sps:$4 sm:$0xff]  }
 0x5a1   :  { %2543 = vmatpush1.bf16.msra.mxu0 %v5640_v12  ;;  %2584 = vmatpush1.bf16.msra.mxu1 %v5643_v13  ;;  %7184 = vst [vmem:[#allocation26_spill] sm:$0xff] %v6096_v60  ;;  %7185 = vst [vmem:[#allocation31_spill] sm:$0xff] %v6099_v63  ;;  %v6102_v1 = vld [vmem:[#allocation5 + $0x20] ss:$16 sps:$4 sm:$0xff]  }
 0x5a2   :  { %v2445_v0 = vmul.f32 %v2442_v16, %v5851_v21  ;;  %2544 = vmatprep.subr.bf16.mxu0 %v5647_v15  ;;  %2585 = vmatprep.subr.bf16.mxu1 %v5650_v17  ;;  %v2443_v43 = vadd.f32 0.5, %v2440_v8  ;;  %v6018_v15 = vld [vmem:[#allocation5 + $0xe4] ss:$16 sps:$4 sm:$0xff]   ;;  %v6021_v17 = vld [vmem:[#allocation5 + $0xec] ss:$16 sps:$4 sm:$0xff]   ;;  %7186 = vst [vmem:[#allocation28_spill] sm:$0xff] %v6102_v1 }
 0x5a3   :  { %v6037_v21 = vld [vmem:[#allocation5 + $0xcc] ss:$16 sps:$4 sm:$0xff]   ;;  %v6105_v16 = vld [vmem:[#allocation5 + $0x28] ss:$16 sps:$4 sm:$0xff]   ;;  %v6114_v18 = vld [vmem:[#allocation5] ss:$16 sps:$4 sm:$0xff]  }
 0x5a4   :  { %v5997_v53 = vadd.f32 %v2446_v6, %v2445_v0  ;;  %7187 = vst [vmem:[#allocation33_spill] sm:$0xff] %v6105_v16  ;;  %v6108_v6 = vld [vmem:[#allocation5 + $0x4] ss:$16 sps:$4 sm:$0xff]   ;;  %v6111_v0 = vld [vmem:[#allocation5 + $0xc] ss:$16 sps:$4 sm:$0xff]   ;;  %7190 = vst [vmem:[#allocation32_spill] sm:$0xff] %v6114_v18 }
 0x5a5   :  { %2545 = vmatpush1.bf16.msra.mxu0 %v5655_v46  ;;  %2586 = vmatpush1.bf16.msra.mxu1 %v5658_v47  ;;  %v6028_v47 = vld [vmem:[#allocation5 + $0xe0] ss:$16 sps:$4 sm:$0xff]   ;;  %7188 = vst [vmem:[#allocation30_spill] sm:$0xff] %v6108_v6  ;;  %7189 = vst [vmem:[#allocation35_spill] sm:$0xff] %v6111_v0  ;;  %v6117_v8 = vld [vmem:[#allocation5 + $0x8] ss:$16 sps:$4 sm:$0xff]  }
 0x5a6   :  { %4402 = vtanh.f32 %v5997_v53  ;;  %2546 = vmatprep.subr.bf16.mxu0 %v5662_v40  ;;  %2587 = vmatprep.subr.bf16.mxu1 %v5665_v48  ;;  %v6031_v40 = vld [vmem:[#allocation5 + $0xe8] ss:$16 sps:$4 sm:$0xff]   ;;  %v6034_v48 = vld [vmem:[#allocation5 + $0xc4] ss:$16 sps:$4 sm:$0xff]   ;;  %7191 = vst [vmem:[#allocation36_spill] sm:$0xff] %v6117_v8 }
 0x5a9   :  { %2547 = vmatpush1.bf16.msra.mxu0 %v5858_v20  ;;  %2588 = vmatpush1.bf16.msra.mxu1 %v5861_v45 }
 0x5aa   :  { %2548 = vmatprep.subr.bf16.mxu0 %v5864_v28  ;;  %2589 = vmatprep.subr.bf16.mxu1 %v5867_v42 }
 0x5ad   :  { %2549 = vmatpush1.bf16.msra.mxu0 %v5870_v37  ;;  %2590 = vmatpush1.bf16.msra.mxu1 %v5873_v41 }
 0x5ae   :  { %2550 = vmatprep.subr.bf16.mxu0 %v5876_v23  ;;  %2591 = vmatprep.subr.bf16.mxu1 %v5879_v14 }
 0x5b1   :  { %2551 = vmatpush1.bf16.msra.mxu0 %v5882_v19  ;;  %2592 = vmatpush1.bf16.msra.mxu1 %v5885_v7 }
 0x5b2   :  { %2552 = vmatprep.subr.bf16.mxu0 %v5888_v10  ;;  %2593 = vmatprep.subr.bf16.mxu1 %v5891_v36 }
 0x5b3   :  { %v4403_v12 = vpop.eup %4402 }
 0x5b4   :  { %v2449_v13 = vmul.f32 %v4403_v12, %v2443_v43  ;;  %v7194_v43 = vld [vmem:[#allocation55_spill] sm:$0xff]  ;;  %v7195_v12 = vld [vmem:[#allocation56_spill] sm:$0xff] }
 0x5b5   :  { %2553 = vmatpush1.bf16.msra.mxu0 %v5894_v62  ;;  %2594 = vmatpush1.bf16.msra.mxu1 %v5897_v11 }
 0x5b6   :  { %2646 = vmatprep.subr.bf16.mxu0 %v6018_v15  ;;  %2687 = vmatprep.subr.bf16.mxu1 %v6021_v17  ;;  %v6024_v46 = vpack.c.bf16 %v2449_v13, %v2449_v13  ;;  %v7200_v13 = vld [vmem:[#allocation61_spill] sm:$0xff] }
 0x5b8   :  { %2571 = vmatmul.mubr.bf16.vlgmr.msra.gmra.mxu0 %v6024_v46  ;;  %2612 = vmatmul.mubr.bf16.vlgmr.msra.gmra.mxu1 %v6024_v46 }
 0x5b9   :  { %2647 = vmatpush1.bf16.msra.mxu0 %v6028_v47  ;;  %2688 = vmatpush1.bf16.msra.mxu1 %v6031_v40 }
 0x5ba   :  { %2648 = vmatprep.subr.bf16.mxu0 %v6034_v48  ;;  %2689 = vmatprep.subr.bf16.mxu1 %v6037_v21 }
 0x5bb   :  { %2678 = vmatprep.mubr.bf16.mxu0 %v6967_v29  ;;  %2719 = vmatprep.mubr.bf16.mxu1 %v6967_v29 }
 0x5bd   :  { %2649 = vmatpush1.bf16.msra.mxu0 %v6042_v2  ;;  %2690 = vmatpush1.bf16.msra.mxu1 %v6045_v44 }
 0x5be   :  { %2650 = vmatprep.subr.bf16.mxu0 %v6048_v50  ;;  %2691 = vmatprep.subr.bf16.mxu1 %v6051_v49 }
 0x5c1   :  { %2651 = vmatpush1.bf16.msra.mxu0 %v6054_v3  ;;  %2692 = vmatpush1.bf16.msra.mxu1 %v6057_v33 }
 0x5c2   :  { %2652 = vmatprep.subr.bf16.mxu0 %v6060_v61  ;;  %2693 = vmatprep.subr.bf16.mxu1 %v6063_v9 }
 0x5c5   :  { %2653 = vmatpush1.bf16.msra.mxu0 %v6066_v58  ;;  %2694 = vmatpush1.bf16.msra.mxu1 %v6069_v35 }
 0x5c6   :  { %2654 = vmatprep.subr.bf16.mxu0 %v6072_v25  ;;  %2695 = vmatprep.subr.bf16.mxu1 %v6075_v59 }
 0x5c9   :  { %2655 = vmatpush1.bf16.msra.mxu0 %v6078_v57  ;;  %2696 = vmatpush1.bf16.msra.mxu1 %v6081_v27 }
 0x5ca   :  { %2656 = vmatprep.subr.bf16.mxu0 %v6084_v24  ;;  %2697 = vmatprep.subr.bf16.mxu1 %v6087_v5 }
 0x5cd   :  { %2657 = vmatpush1.bf16.msra.mxu0 %v6090_v32  ;;  %2698 = vmatpush1.bf16.msra.mxu1 %v6093_v4 }
 0x5ce   :  { %2658 = vmatprep.subr.bf16.mxu0 %v6096_v60  ;;  %2699 = vmatprep.subr.bf16.mxu1 %v6099_v63 }
 0x5d1   :  { %2659 = vmatpush1.bf16.msra.mxu0 %v6102_v1  ;;  %2700 = vmatpush1.bf16.msra.mxu1 %v6105_v16  ;;  %v7220_v1 = vld [vmem:[#allocation17_spill] sm:$0xff] }
 0x5d2   :  { %2660 = vmatprep.subr.bf16.mxu0 %v6108_v6  ;;  %2701 = vmatprep.subr.bf16.mxu1 %v6111_v0  ;;  %v7219_v6 = vld [vmem:[#allocation19_spill] sm:$0xff] }
 0x5d5   :  { %2661 = vmatpush1.bf16.msra.mxu0 %v6114_v18  ;;  %2702 = vmatpush1.bf16.msra.mxu1 %v6117_v8 }
 0x5d6   :  { %2751 = vmatprep.subr.bf16.mxu0 %v7141_v31  ;;  %2792 = vmatprep.subr.bf16.mxu1 %v7142_v39  ;;  %v7192_v31 = vld [vmem:[#allocation53_spill] sm:$0xff]  ;;  %v7193_v39 = vld [vmem:[#allocation54_spill] sm:$0xff] }
 0x5d8   :  { %2679 = vmatmul.mubr.bf16.vlgmr.msra.gmra.mxu0 %v6024_v46  ;;  %2720 = vmatmul.mubr.bf16.vlgmr.msra.gmra.mxu1 %v6024_v46  ;;  %v7201_v46 = vld [vmem:[#allocation62_spill] sm:$0xff] }
 0x5d9   :  { %2752 = vmatpush1.bf16.msra.mxu0 %v7143_v51  ;;  %2793 = vmatpush1.bf16.msra.mxu1 %v7144_v52  ;;  %v7196_v51 = vld [vmem:[#allocation57_spill] sm:$0xff]  ;;  %v7197_v52 = vld [vmem:[#allocation58_spill] sm:$0xff] }
 0x5da   :  { %2753 = vmatprep.subr.bf16.mxu0 %v7145_v54  ;;  %2794 = vmatprep.subr.bf16.mxu1 %v7146_v55  ;;  %v7198_v54 = vld [vmem:[#allocation59_spill] sm:$0xff]  ;;  %v7199_v55 = vld [vmem:[#allocation60_spill] sm:$0xff] }
 0x5db   :  { %2783 = vmatprep.mubr.bf16.mxu0 %v6967_v29  ;;  %2824 = vmatprep.mubr.bf16.mxu1 %v6967_v29 }
 0x5dd   :  { %2754 = vmatpush1.bf16.msra.mxu0 %v7147_v56  ;;  %2795 = vmatpush1.bf16.msra.mxu1 %v7192_v31  ;;  %v7202_v56 = vld [vmem:[#allocation63_spill] sm:$0xff]  ;;  %v7203_v31 = vld [vmem:[#allocation64_spill] sm:$0xff] }
 0x5de   :  { %2755 = vmatprep.subr.bf16.mxu0 %v7193_v39  ;;  %2796 = vmatprep.subr.bf16.mxu1 %v7194_v43  ;;  %v7204_v39 = vld [vmem:[#allocation65_spill] sm:$0xff]  ;;  %v7205_v43 = vld [vmem:[#allocation66_spill] sm:$0xff] }
 0x5e1   :  { %2756 = vmatpush1.bf16.msra.mxu0 %v7195_v12  ;;  %2797 = vmatpush1.bf16.msra.mxu1 %v7196_v51  ;;  %v7206_v12 = vld [vmem:[#allocation67_spill] sm:$0xff]  ;;  %v7207_v51 = vld [vmem:[#allocation68_spill] sm:$0xff] }
 0x5e2   :  { %2757 = vmatprep.subr.bf16.mxu0 %v7197_v52  ;;  %2798 = vmatprep.subr.bf16.mxu1 %v7198_v54  ;;  %v7208_v52 = vld [vmem:[#allocation69_spill] sm:$0xff] }
 0x5e3   :  { %v7209_v54 = vld [vmem:[#allocation21_spill] sm:$0xff] }
 0x5e5   :  { %2758 = vmatpush1.bf16.msra.mxu0 %v7199_v55  ;;  %2799 = vmatpush1.bf16.msra.mxu1 %v7200_v13  ;;  %v7210_v55 = vld [vmem:[#allocation77_spill] sm:$0xff]  ;;  %v7211_v13 = vld [vmem:[#allocation79_spill] sm:$0xff] }
 0x5e6   :  { %2759 = vmatprep.subr.bf16.mxu0 %v7201_v46  ;;  %2800 = vmatprep.subr.bf16.mxu1 %v7202_v56  ;;  %v7212_v46 = vld [vmem:[#allocation80_spill] sm:$0xff]  ;;  %v7213_v56 = vld [vmem:[#allocation78_spill] sm:$0xff] }
 0x5e9   :  { %2760 = vmatpush1.bf16.msra.mxu0 %v7203_v31  ;;  %2801 = vmatpush1.bf16.msra.mxu1 %v7204_v39  ;;  %v7214_v31 = vld [vmem:[#allocation18_spill] sm:$0xff]  ;;  %v7215_v39 = vld [vmem:[#allocation23_spill] sm:$0xff] }
 0x5ea   :  { %2761 = vmatprep.subr.bf16.mxu0 %v7205_v43  ;;  %2802 = vmatprep.subr.bf16.mxu1 %v7206_v12  ;;  %v7216_v43 = vld [vmem:[#allocation20_spill] sm:$0xff]  ;;  %v7217_v12 = vld [vmem:[#allocation25_spill] sm:$0xff] }
 0x5ed   :  { %2762 = vmatpush1.bf16.msra.mxu0 %v7207_v51  ;;  %2803 = vmatpush1.bf16.msra.mxu1 %v7208_v52  ;;  %v7218_v51 = vld [vmem:[#allocation22_spill] sm:$0xff] }
 0x5ee   :  { %2763 = vmatprep.subr.bf16.mxu0 %v7209_v54  ;;  %2804 = vmatprep.subr.bf16.mxu1 %v7210_v55 }
 0x5f1   :  { %2764 = vmatpush1.bf16.msra.mxu0 %v7211_v13  ;;  %2805 = vmatpush1.bf16.msra.mxu1 %v7212_v46 }
 0x5f2   :  { %2765 = vmatprep.subr.bf16.mxu0 %v7213_v56  ;;  %2806 = vmatprep.subr.bf16.mxu1 %v7214_v31 }
 0x5f5   :  { %2766 = vmatpush1.bf16.msra.mxu0 %v7215_v39  ;;  %2807 = vmatpush1.bf16.msra.mxu1 %v7216_v43 }
 0x5f6   :  { %2838 = vmatprep.subr.bf16.mxu0 %v7217_v12  ;;  %2879 = vmatprep.subr.bf16.mxu1 %v7218_v51 }
 0x658   :  { %v2485_v52 = vpop.f32.mrf.mxu0  ;;  %v2526_v54 = vpop.f32.mrf.mxu1 }
 0x659   :  { %v2533_v56 = vadd.f32 %v2485_v52, %v7219_v6  ;;  %v2535_v52 = vadd.f32 %v2526_v54, %v5418_v34  ;;  %v7221_v54 = vld [vmem:[#allocation89_spill] sm:$0xff] }
 0x65a   :  { %v2487_v8 = vpop.f32.mrf.mxu0  ;;  %v2528_v55 = vpop.f32.mrf.mxu1 }
 0x65b   :  { %v2534_v39 = vadd.f32 %v2487_v8, %v7220_v1  ;;  %v2536_v5 = vadd.f32 %v2528_v55, %v5412_v26 }
 0x65c   :  { %v2489_v18 = vpop.f32.mrf.mxu0  ;;  %v2530_v13 = vpop.f32.mrf.mxu1 }
 0x65e   :  { %v2490_v0 = vpop.f32.mrf.mxu0  ;;  %v2531_v46 = vpop.f32.mrf.mxu1 }
 0x678   :  { %v2572_v16 = vpop.f32.mrf.mxu0  ;;  %v2613_v31 = vpop.f32.mrf.mxu1 }
 0x679   :  { %v2620_v63 = vadd.f32 %v2572_v16, %v2533_v56  ;;  %v2622_v6 = vadd.f32 %v2613_v31, %v2535_v52 }
 0x67a   :  { %v2574_v43 = vpop.f32.mrf.mxu0  ;;  %v2615_v60 = vpop.f32.mrf.mxu1 }
 0x67b   :  { %v2624_v12 = vmul.f32 0.5, %v2620_v63  ;;  %v2621_v4 = vadd.f32 %v2574_v43, %v2534_v39  ;;  %v2623_v46 = vadd.f32 %v2615_v60, %v2536_v5  ;;  %v2626_v8 = vmul.f32 0.5, %v2622_v6 }
 0x67c   :  { %v2576_v51 = vpop.f32.mrf.mxu0  ;;  %v2617_v32 = vpop.f32.mrf.mxu1 }
 0x67d   :  { %4404 = vtanh.f32 %v2624_v12  ;;  %v2625_v18 = vmul.f32 0.5, %v2621_v4 }
 0x67e   :  { %v2577_v13 = vpop.f32.mrf.mxu0  ;;  %v2618_v0 = vpop.f32.mrf.mxu1 }
 0x67f   :  { %4406 = vtanh.f32 %v2625_v18  ;;  %v7222_v0 = vld [vmem:[#allocation91_spill] sm:$0xff] }
 0x680   :  { %4408 = vtanh.f32 %v2623_v46 }
 0x681   :  { %4410 = vtanh.f32 %v2626_v8 }
 0x68a   :  { %v4405_v16 = vpop.eup %4404 }
 0x68b   :  { %v2630_v56 = vmul.f32 0.5, %v4405_v16  ;;  %v7223_v16 = vld [vmem:[#allocation92_spill] sm:$0xff] }
 0x68c   :  { %v4407_v1 = vpop.eup %4406 }
 0x68d   :  { %v2633_v63 = vadd.f32 0.5, %v2630_v56  ;;  %v2631_v39 = vmul.f32 0.5, %v4407_v1  ;;  %v4409_v43 = vpop.eup %4408 }
 0x68e   :  { %v4411_v6 = vpop.eup %4410 }
 0x68f   :  { %v2634_v32 = vadd.f32 0.5, %v2631_v39  ;;  %v2638_v4 = vmul.f32 %v4409_v43, %v2633_v63  ;;  %v2632_v8 = vmul.f32 0.5, %v4411_v6  ;;  %v6173_v6 = vld [vmem:[#allocation7 + $0xe8] ss:$16 sps:$4 sm:$0xff]  }
 0x691   :  { %v2637_v55 = vmul.f32 %v2634_v32, %v5975_v38  ;;  %v2635_v32 = vadd.f32 0.5, %v2632_v8 }
 0x693   :  { %v6163_v12 = vadd.f32 %v2638_v4, %v2637_v55  ;;  %v7224_v4 = vld [vmem:[#allocation90_spill] sm:$0xff] }
 0x695   :  { %4412 = vtanh.f32 %v6163_v12 }
 0x698   :  { %v2680_v5 = vpop.f32.mrf.mxu0  ;;  %v2721_v60 = vpop.f32.mrf.mxu1 }
 0x699   :  { %v2728_v31 = vadd.f32 %v2680_v5, %v7221_v54  ;;  %v2730_v5 = vadd.f32 %v2721_v60, %v7224_v4  ;;  %v6207_v4 = vld [vmem:[#allocation7 + $0x80] ss:$16 sps:$4 sm:$0xff]  }
 0x69a   :  { %v2682_v51 = vpop.f32.mrf.mxu0  ;;  %v2723_v18 = vpop.f32.mrf.mxu1 }
 0x69b   :  { %v2732_v13 = vmul.f32 0.5, %v2728_v31  ;;  %v2729_v46 = vadd.f32 %v2682_v51, %v7222_v0  ;;  %v2731_v56 = vadd.f32 %v2723_v18, %v7223_v16  ;;  %v6170_v31 = vld [vmem:[#allocation7 + $0xe0] ss:$16 sps:$4 sm:$0xff]   ;;  %v2734_v51 = vmul.f32 0.5, %v2730_v5  ;;  %v6210_v5 = vld [vmem:[#allocation7 + $0x88] ss:$16 sps:$4 sm:$0xff]  }
 0x69c   :  { %v2684_v1 = vpop.f32.mrf.mxu0  ;;  %v2725_v52 = vpop.f32.mrf.mxu1  ;;  %v6180_v0 = vld [vmem:[#allocation7 + $0xc0] ss:$16 sps:$4 sm:$0xff]  }
 0x69d   :  { %4414 = vtanh.f32 %v2732_v13  ;;  %v2733_v38 = vmul.f32 0.5, %v2729_v46  ;;  %v6183_v46 = vld [vmem:[#allocation7 + $0xc8] ss:$16 sps:$4 sm:$0xff]   ;;  %v6186_v52 = vld [vmem:[#allocation7 + $0xa4] ss:$16 sps:$4 sm:$0xff]  }
 0x69e   :  { %v2685_v63 = vpop.f32.mrf.mxu0  ;;  %v2726_v39 = vpop.f32.mrf.mxu1 }
 0x69f   :  { %4416 = vtanh.f32 %v2733_v38  ;;  %v6195_v63 = vld [vmem:[#allocation7 + $0xa8] ss:$16 sps:$4 sm:$0xff]  }
 0x6a0   :  { %4418 = vtanh.f32 %v2731_v56  ;;  %v6192_v56 = vld [vmem:[#allocation7 + $0xa0] ss:$16 sps:$4 sm:$0xff]  }
 0x6a1   :  { %4420 = vtanh.f32 %v2734_v51 }
 0x6a2   :  { %v4413_v43 = vpop.eup %4412 }
 0x6a3   :  { %v2641_v55 = vmul.f32 %v4413_v43, %v2635_v32  ;;  %v6199_v32 = vld [vmem:[#allocation7 + $0x84] ss:$16 sps:$4 sm:$0xff]   ;;  %v6202_v43 = vld [vmem:[#allocation7 + $0x8c] ss:$16 sps:$4 sm:$0xff]  }
 0x6a5   :  { %v2750_v54 = vpack.c.bf16 %v2641_v55, %v2641_v55 }
 0x6a7   :  { %2784 = vmatmul.mubr.bf16.vlgmr.msra.gmra.mxu0 %v2750_v54  ;;  %2825 = vmatmul.mubr.bf16.vlgmr.msra.gmra.mxu1 %v2750_v54  ;;  %v6217_v54 = vld [vmem:[#allocation7 + $0x6c] ss:$16 sps:$4 sm:$0xff]  }
 0x6a8   :  { %2839 = vmatpush1.bf16.msra.mxu0 %v6170_v31  ;;  %2880 = vmatpush1.bf16.msra.mxu1 %v6173_v6 }
 0x6a9   :  { %2840 = vmatprep.subr.bf16.mxu0 %v5834_v22  ;;  %2881 = vmatprep.subr.bf16.mxu1 %v5837_v30  ;;  %v6189_v30 = vld [vmem:[#allocation7 + $0xac] ss:$16 sps:$4 sm:$0xff]  }
 0x6aa   :  { %v4415_v18 = vpop.eup %4414  ;;  %2870 = vmatprep.mubr.bf16.mxu0 %v6967_v29  ;;  %2911 = vmatprep.mubr.bf16.mxu1 %v6967_v29 }
 0x6ab   :  { %v2738_v60 = vmul.f32 0.5, %v4415_v18 }
 0x6ac   :  { %v4417_v13 = vpop.eup %4416  ;;  %2841 = vmatpush1.bf16.msra.mxu0 %v6180_v0  ;;  %2882 = vmatpush1.bf16.msra.mxu1 %v6183_v46 }
 0x6ad   :  { %v2741_v1 = vadd.f32 0.5, %v2738_v60  ;;  %v2739_v22 = vmul.f32 0.5, %v4417_v13  ;;  %2842 = vmatprep.subr.bf16.mxu0 %v6186_v52  ;;  %2883 = vmatprep.subr.bf16.mxu1 %v6189_v30  ;;  %v4419_v8 = vpop.eup %4418  ;;  %v7235_v60 = vld [vmem:[#allocation36_spill] sm:$0xff]  ;;  %v6268_v13 = vld [vmem:[#allocation8 + $0xe4] ss:$16 sps:$4 sm:$0xff]  }
 0x6ae   :  { %v4421_v51 = vpop.eup %4420  ;;  %7236 = vst [vmem:[#allocation34_spill] sm:$0xff] %v6268_v13 }
 0x6af   :  { %v2742_v38 = vadd.f32 0.5, %v2739_v22  ;;  %v2746_v16 = vmul.f32 %v4419_v8, %v2741_v1  ;;  %v2740_v18 = vmul.f32 0.5, %v4421_v51  ;;  %v6271_v1 = vld [vmem:[#allocation8 + $0xec] ss:$16 sps:$4 sm:$0xff]   ;;  %v6274_v22 = vld [vmem:[#allocation8 + $0xe0] ss:$16 sps:$4 sm:$0xff]  }
 0x6b0   :  { %2843 = vmatpush1.bf16.msra.mxu0 %v6192_v56  ;;  %2884 = vmatpush1.bf16.msra.mxu1 %v6195_v63  ;;  %7237 = vst [vmem:[#allocation37_spill] sm:$0xff] %v6271_v1  ;;  %7238 = vst [vmem:[#allocation38_spill] sm:$0xff] %v6274_v22  ;;  %v6277_v8 = vld [vmem:[#allocation8 + $0xe8] ss:$16 sps:$4 sm:$0xff]  }
 0x6b1   :  { %v2745_v39 = vmul.f32 %v2742_v38, %v5997_v53  ;;  %2844 = vmatprep.subr.bf16.mxu0 %v6199_v32  ;;  %2885 = vmatprep.subr.bf16.mxu1 %v6202_v43  ;;  %v6214_v53 = vld [vmem:[#allocation7 + $0x64] ss:$16 sps:$4 sm:$0xff]   ;;  %7239 = vst [vmem:[#allocation39_spill] sm:$0xff] %v6277_v8  ;;  %v6291_v51 = vld [vmem:[#allocation8 + $0xc8] ss:$16 sps:$4 sm:$0xff]  }
 0x6b2   :  { %v6280_v38 = vld [vmem:[#allocation8 + $0xc4] ss:$16 sps:$4 sm:$0xff]   ;;  %7243 = vst [vmem:[#allocation83_spill] sm:$0xff] %v6291_v51 }
 0x6b3   :  { %v6205_v55 = vadd.f32 %v2746_v16, %v2745_v39  ;;  %7240 = vst [vmem:[#allocation70_spill] sm:$0xff] %v6280_v38  ;;  %v6283_v16 = vld [vmem:[#allocation8 + $0xcc] ss:$16 sps:$4 sm:$0xff]   ;;  %v6288_v39 = vld [vmem:[#allocation8 + $0xc0] ss:$16 sps:$4 sm:$0xff]  }
 0x6b4   :  { %2845 = vmatpush1.bf16.msra.mxu0 %v6207_v4  ;;  %2886 = vmatpush1.bf16.msra.mxu1 %v6210_v5  ;;  %7241 = vst [vmem:[#allocation75_spill] sm:$0xff] %v6283_v16  ;;  %7242 = vst [vmem:[#allocation81_spill] sm:$0xff] %v6288_v39 }
 0x6b5   :  { %4422 = vtanh.f32 %v6205_v55  ;;  %2846 = vmatprep.subr.bf16.mxu0 %v6214_v53  ;;  %2887 = vmatprep.subr.bf16.mxu1 %v6217_v54 }
 0x6b8   :  { %2847 = vmatpush1.bf16.msra.mxu0 %v5858_v20  ;;  %2888 = vmatpush1.bf16.msra.mxu1 %v5861_v45  ;;  %v2743_v20 = vadd.f32 0.5, %v2740_v18  ;;  %v6294_v18 = vld [vmem:[#allocation8 + $0xa4] ss:$16 sps:$4 sm:$0xff]  }
 0x6b9   :  { %2848 = vmatprep.subr.bf16.mxu0 %v5864_v28  ;;  %2889 = vmatprep.subr.bf16.mxu1 %v5867_v42  ;;  %7244 = vst [vmem:[#allocation84_spill] sm:$0xff] %v6294_v18 }
 0x6bc   :  { %2849 = vmatpush1.bf16.msra.mxu0 %v5870_v37  ;;  %2890 = vmatpush1.bf16.msra.mxu1 %v5873_v41  ;;  %v7225_v37 = vld [vmem:[#allocation27_spill] sm:$0xff]  ;;  %v7226_v41 = vld [vmem:[#allocation24_spill] sm:$0xff] }
 0x6bd   :  { %2850 = vmatprep.subr.bf16.mxu0 %v5876_v23  ;;  %2891 = vmatprep.subr.bf16.mxu1 %v5879_v14  ;;  %v7227_v23 = vld [vmem:[#allocation29_spill] sm:$0xff]  ;;  %v7228_v14 = vld [vmem:[#allocation26_spill] sm:$0xff] }
 0x6c0   :  { %2851 = vmatpush1.bf16.msra.mxu0 %v5882_v19  ;;  %2892 = vmatpush1.bf16.msra.mxu1 %v5885_v7  ;;  %v7229_v19 = vld [vmem:[#allocation31_spill] sm:$0xff]  ;;  %v7230_v7 = vld [vmem:[#allocation28_spill] sm:$0xff] }
 0x6c1   :  { %2852 = vmatprep.subr.bf16.mxu0 %v5888_v10  ;;  %2893 = vmatprep.subr.bf16.mxu1 %v5891_v36  ;;  %v7231_v10 = vld [vmem:[#allocation33_spill] sm:$0xff]  ;;  %v7232_v36 = vld [vmem:[#allocation30_spill] sm:$0xff] }
 0x6c2   :  { %v4423_v45 = vpop.eup %4422 }
 0x6c3   :  { %v2749_v28 = vmul.f32 %v4423_v45, %v2743_v20  ;;  %v6297_v20 = vld [vmem:[#allocation8 + $0xac] ss:$16 sps:$4 sm:$0xff]   ;;  %v6300_v45 = vld [vmem:[#allocation8 + $0xa0] ss:$16 sps:$4 sm:$0xff]  }
 0x6c4   :  { %2853 = vmatpush1.bf16.msra.mxu0 %v5894_v62  ;;  %2894 = vmatpush1.bf16.msra.mxu1 %v5897_v11  ;;  %v7233_v62 = vld [vmem:[#allocation35_spill] sm:$0xff]  ;;  %v7234_v11 = vld [vmem:[#allocation32_spill] sm:$0xff]  ;;  %7245 = vst [vmem:[#allocation82_spill] sm:$0xff] %v6297_v20  ;;  %7246 = vst [vmem:[#allocation73_spill] sm:$0xff] %v6300_v45 }
 0x6c5   :  { %v2837_v42 = vpack.c.bf16 %v2749_v28, %v2749_v28  ;;  %2946 = vmatprep.subr.bf16.mxu0 %v6018_v15  ;;  %2987 = vmatprep.subr.bf16.mxu1 %v6021_v17  ;;  %v6303_v28 = vld [vmem:[#allocation8 + $0xa8] ss:$16 sps:$4 sm:$0xff]  }
 0x6c6   :  { %7247 = vst [vmem:[#allocation76_spill] sm:$0xff] %v6303_v28 }
 0x6c7   :  { %2871 = vmatmul.mubr.bf16.vlgmr.msra.gmra.mxu0 %v2837_v42  ;;  %2912 = vmatmul.mubr.bf16.vlgmr.msra.gmra.mxu1 %v2837_v42 }
 0x6c8   :  { %2947 = vmatpush1.bf16.msra.mxu0 %v6028_v47  ;;  %2988 = vmatpush1.bf16.msra.mxu1 %v6031_v40 }
 0x6c9   :  { %2948 = vmatprep.subr.bf16.mxu0 %v6034_v48  ;;  %2989 = vmatprep.subr.bf16.mxu1 %v6037_v21 }
 0x6ca   :  { %2978 = vmatprep.mubr.bf16.mxu0 %v6967_v29  ;;  %3019 = vmatprep.mubr.bf16.mxu1 %v6967_v29 }
 0x6cc   :  { %2949 = vmatpush1.bf16.msra.mxu0 %v6042_v2  ;;  %2990 = vmatpush1.bf16.msra.mxu1 %v6045_v44 }
 0x6cd   :  { %2950 = vmatprep.subr.bf16.mxu0 %v6048_v50  ;;  %2991 = vmatprep.subr.bf16.mxu1 %v6051_v49 }
 0x6d0   :  { %2951 = vmatpush1.bf16.msra.mxu0 %v6054_v3  ;;  %2992 = vmatpush1.bf16.msra.mxu1 %v6057_v33 }
 0x6d1   :  { %2952 = vmatprep.subr.bf16.mxu0 %v6060_v61  ;;  %2993 = vmatprep.subr.bf16.mxu1 %v6063_v9 }
 0x6d4   :  { %2953 = vmatpush1.bf16.msra.mxu0 %v6066_v58  ;;  %2994 = vmatpush1.bf16.msra.mxu1 %v6069_v35 }
 0x6d5   :  { %2954 = vmatprep.subr.bf16.mxu0 %v6072_v25  ;;  %2995 = vmatprep.subr.bf16.mxu1 %v6075_v59 }
 0x6d8   :  { %2955 = vmatpush1.bf16.msra.mxu0 %v6078_v57  ;;  %2996 = vmatpush1.bf16.msra.mxu1 %v6081_v27 }
 0x6d9   :  { %2956 = vmatprep.subr.bf16.mxu0 %v6084_v24  ;;  %2997 = vmatprep.subr.bf16.mxu1 %v7225_v37 }
 0x6dc   :  { %2957 = vmatpush1.bf16.msra.mxu0 %v7226_v41  ;;  %2998 = vmatpush1.bf16.msra.mxu1 %v7227_v23 }
 0x6dd   :  { %2958 = vmatprep.subr.bf16.mxu0 %v7228_v14  ;;  %2999 = vmatprep.subr.bf16.mxu1 %v7229_v19 }
 0x6e0   :  { %2959 = vmatpush1.bf16.msra.mxu0 %v7230_v7  ;;  %3000 = vmatpush1.bf16.msra.mxu1 %v7231_v10 }
 0x6e1   :  { %2960 = vmatprep.subr.bf16.mxu0 %v7232_v36  ;;  %3001 = vmatprep.subr.bf16.mxu1 %v7233_v62 }
 0x6e4   :  { %2961 = vmatpush1.bf16.msra.mxu0 %v7234_v11  ;;  %3002 = vmatpush1.bf16.msra.mxu1 %v7235_v60  ;;  %v7271_v11 = vld [vmem:[#allocation17_spill] sm:$0xff] }
 0x6e5   :  { %3051 = vmatprep.subr.bf16.mxu0 %v6268_v13  ;;  %3092 = vmatprep.subr.bf16.mxu1 %v6271_v1  ;;  %v7270_v1 = vld [vmem:[#allocation19_spill] sm:$0xff] }
 0x6e7   :  { %2979 = vmatmul.mubr.bf16.vlgmr.msra.gmra.mxu0 %v2837_v42  ;;  %3020 = vmatmul.mubr.bf16.vlgmr.msra.gmra.mxu1 %v2837_v42  ;;  %v6306_v42 = vld [vmem:[#allocation8 + $0x84] ss:$16 sps:$4 sm:$0xff]  }
 0x6e8   :  { %3052 = vmatpush1.bf16.msra.mxu0 %v6274_v22  ;;  %3093 = vmatpush1.bf16.msra.mxu1 %v6277_v8  ;;  %7248 = vst [vmem:[#allocation74_spill] sm:$0xff] %v6306_v42 }
 0x6e9   :  { %3053 = vmatprep.subr.bf16.mxu0 %v6280_v38  ;;  %3094 = vmatprep.subr.bf16.mxu1 %v6283_v16 }
 0x6ea   :  { %3083 = vmatprep.mubr.bf16.mxu0 %v6967_v29  ;;  %3124 = vmatprep.mubr.bf16.mxu1 %v6967_v29 }
 0x6ec   :  { %3054 = vmatpush1.bf16.msra.mxu0 %v6288_v39  ;;  %3095 = vmatpush1.bf16.msra.mxu1 %v6291_v51  ;;  %v6309_v51 = vld [vmem:[#allocation8 + $0x8c] ss:$16 sps:$4 sm:$0xff]  }
 0x6ed   :  { %3055 = vmatprep.subr.bf16.mxu0 %v6294_v18  ;;  %3096 = vmatprep.subr.bf16.mxu1 %v6297_v20  ;;  %7249 = vst [vmem:[#allocation40_spill] sm:$0xff] %v6309_v51  ;;  %v6312_v18 = vld [vmem:[#allocation8 + $0x80] ss:$16 sps:$4 sm:$0xff]   ;;  %v6315_v20 = vld [vmem:[#allocation8 + $0x88] ss:$16 sps:$4 sm:$0xff]  }
 0x6ee   :  { %7250 = vst [vmem:[#allocation41_spill] sm:$0xff] %v6312_v18  ;;  %7251 = vst [vmem:[#allocation42_spill] sm:$0xff] %v6315_v20 }
 0x6f0   :  { %3056 = vmatpush1.bf16.msra.mxu0 %v6300_v45  ;;  %3097 = vmatpush1.bf16.msra.mxu1 %v6303_v28  ;;  %v6318_v45 = vld [vmem:[#allocation8 + $0x64] ss:$16 sps:$4 sm:$0xff]   ;;  %v6321_v28 = vld [vmem:[#allocation8 + $0x6c] ss:$16 sps:$4 sm:$0xff]  }
 0x6f1   :  { %3057 = vmatprep.subr.bf16.mxu0 %v6306_v42  ;;  %3098 = vmatprep.subr.bf16.mxu1 %v6309_v51  ;;  %7252 = vst [vmem:[#allocation43_spill] sm:$0xff] %v6318_v45  ;;  %7253 = vst [vmem:[#allocation44_spill] sm:$0xff] %v6321_v28  ;;  %v6324_v42 = vld [vmem:[#allocation8 + $0x60] ss:$16 sps:$4 sm:$0xff]   ;;  %v6327_v51 = vld [vmem:[#allocation8 + $0x68] ss:$16 sps:$4 sm:$0xff]  }
 0x6f2   :  { %7254 = vst [vmem:[#allocation45_spill] sm:$0xff] %v6324_v42  ;;  %7255 = vst [vmem:[#allocation46_spill] sm:$0xff] %v6327_v51 }
 0x6f4   :  { %3058 = vmatpush1.bf16.msra.mxu0 %v6312_v18  ;;  %3099 = vmatpush1.bf16.msra.mxu1 %v6315_v20  ;;  %v6330_v18 = vld [vmem:[#allocation8 + $0x44] ss:$16 sps:$4 sm:$0xff]   ;;  %v6333_v20 = vld [vmem:[#allocation8 + $0x4c] ss:$16 sps:$4 sm:$0xff]  }
 0x6f5   :  { %3059 = vmatprep.subr.bf16.mxu0 %v6318_v45  ;;  %3100 = vmatprep.subr.bf16.mxu1 %v6321_v28  ;;  %7256 = vst [vmem:[#allocation47_spill] sm:$0xff] %v6330_v18  ;;  %7257 = vst [vmem:[#allocation48_spill] sm:$0xff] %v6333_v20  ;;  %v6336_v45 = vld [vmem:[#allocation8 + $0x40] ss:$16 sps:$4 sm:$0xff]   ;;  %v6339_v28 = vld [vmem:[#allocation8 + $0x48] ss:$16 sps:$4 sm:$0xff]  }
 0x6f6   :  { %7258 = vst [vmem:[#allocation49_spill] sm:$0xff] %v6336_v45  ;;  %7259 = vst [vmem:[#allocation50_spill] sm:$0xff] %v6339_v28 }
 0x6f8   :  { %3060 = vmatpush1.bf16.msra.mxu0 %v6324_v42  ;;  %3101 = vmatpush1.bf16.msra.mxu1 %v6327_v51  ;;  %v6342_v42 = vld [vmem:[#allocation8 + $0x24] ss:$16 sps:$4 sm:$0xff]   ;;  %v6345_v51 = vld [vmem:[#allocation8 + $0x2c] ss:$16 sps:$4 sm:$0xff]  }
 0x6f9   :  { %3061 = vmatprep.subr.bf16.mxu0 %v6330_v18  ;;  %3102 = vmatprep.subr.bf16.mxu1 %v6333_v20  ;;  %7260 = vst [vmem:[#allocation51_spill] sm:$0xff] %v6342_v42  ;;  %7261 = vst [vmem:[#allocation52_spill] sm:$0xff] %v6345_v51  ;;  %v6348_v18 = vld [vmem:[#allocation8 + $0x20] ss:$16 sps:$4 sm:$0xff]   ;;  %v6351_v20 = vld [vmem:[#allocation8 + $0x28] ss:$16 sps:$4 sm:$0xff]  }
 0x6fa   :  { %7262 = vst [vmem:[#allocation85_spill] sm:$0xff] %v6348_v18  ;;  %7263 = vst [vmem:[#allocation87_spill] sm:$0xff] %v6351_v20 }
 0x6fc   :  { %3062 = vmatpush1.bf16.msra.mxu0 %v6336_v45  ;;  %3103 = vmatpush1.bf16.msra.mxu1 %v6339_v28  ;;  %v6354_v45 = vld [vmem:[#allocation8 + $0x4] ss:$16 sps:$4 sm:$0xff]   ;;  %v6357_v28 = vld [vmem:[#allocation8 + $0xc] ss:$16 sps:$4 sm:$0xff]  }
 0x6fd   :  { %3063 = vmatprep.subr.bf16.mxu0 %v6342_v42  ;;  %3104 = vmatprep.subr.bf16.mxu1 %v6345_v51  ;;  %7264 = vst [vmem:[#allocation88_spill] sm:$0xff] %v6354_v45  ;;  %7265 = vst [vmem:[#allocation86_spill] sm:$0xff] %v6357_v28  ;;  %v6360_v42 = vld [vmem:[#allocation8] ss:$16 sps:$4 sm:$0xff]   ;;  %v6363_v51 = vld [vmem:[#allocation8 + $0x8] ss:$16 sps:$4 sm:$0xff]  }
 0x6fe   :  { %7266 = vst [vmem:[#allocation53_spill] sm:$0xff] %v6360_v42  ;;  %7267 = vst [vmem:[#allocation54_spill] sm:$0xff] %v6363_v51 }
 0x700   :  { %3064 = vmatpush1.bf16.msra.mxu0 %v6348_v18  ;;  %3105 = vmatpush1.bf16.msra.mxu1 %v6351_v20  ;;  %v6366_v18 = vld [vmem:[#allocation7 + $0xe4] ss:$16 sps:$4 sm:$0xff]   ;;  %v6369_v20 = vld [vmem:[#allocation7 + $0xec] ss:$16 sps:$4 sm:$0xff]  }
 0x701   :  { %3065 = vmatprep.subr.bf16.mxu0 %v6354_v45  ;;  %3106 = vmatprep.subr.bf16.mxu1 %v6357_v28  ;;  %7268 = vst [vmem:[#allocation55_spill] sm:$0xff] %v6366_v18  ;;  %7269 = vst [vmem:[#allocation56_spill] sm:$0xff] %v6369_v20 }
 0x704   :  { %3066 = vmatpush1.bf16.msra.mxu0 %v6360_v42  ;;  %3107 = vmatpush1.bf16.msra.mxu1 %v6363_v51 }
 0x705   :  { %3138 = vmatprep.subr.bf16.mxu0 %v6366_v18  ;;  %3179 = vmatprep.subr.bf16.mxu1 %v6369_v20 }
 0x767   :  { %v2785_v45 = vpop.f32.mrf.mxu0  ;;  %v2826_v39 = vpop.f32.mrf.mxu1 }
 0x768   :  { %v2833_v13 = vadd.f32 %v2785_v45, %v7270_v1  ;;  %v2835_v45 = vadd.f32 %v2826_v39, %v5418_v34  ;;  %v7272_v39 = vld [vmem:[#allocation93_spill] sm:$0xff] }
 0x769   :  { %v2787_v16 = vpop.f32.mrf.mxu0  ;;  %v2828_v28 = vpop.f32.mrf.mxu1 }
 0x76a   :  { %v2834_v62 = vadd.f32 %v2787_v16, %v7271_v11  ;;  %v2836_v23 = vadd.f32 %v2828_v28, %v5412_v26 }
 0x76b   :  { %v2789_v38 = vpop.f32.mrf.mxu0  ;;  %v2830_v8 = vpop.f32.mrf.mxu1 }
 0x76d   :  { %v2790_v22 = vpop.f32.mrf.mxu0  ;;  %v2831_v42 = vpop.f32.mrf.mxu1 }
 0x787   :  { %v2872_v60 = vpop.f32.mrf.mxu0  ;;  %v2913_v51 = vpop.f32.mrf.mxu1 }
 0x788   :  { %v2920_v36 = vadd.f32 %v2872_v60, %v2833_v13  ;;  %v2922_v1 = vadd.f32 %v2913_v51, %v2835_v45 }
 0x789   :  { %v2874_v18 = vpop.f32.mrf.mxu0  ;;  %v2915_v10 = vpop.f32.mrf.mxu1 }
 0x78a   :  { %v2924_v7 = vmul.f32 0.5, %v2920_v36  ;;  %v2921_v19 = vadd.f32 %v2874_v18, %v2834_v62  ;;  %v2923_v42 = vadd.f32 %v2915_v10, %v2836_v23  ;;  %v2926_v16 = vmul.f32 0.5, %v2922_v1 }
 0x78b   :  { %v2876_v20 = vpop.f32.mrf.mxu0  ;;  %v2917_v14 = vpop.f32.mrf.mxu1 }
 0x78c   :  { %4424 = vtanh.f32 %v2924_v7  ;;  %v2925_v38 = vmul.f32 0.5, %v2921_v19 }
 0x78d   :  { %v2877_v8 = vpop.f32.mrf.mxu0  ;;  %v2918_v22 = vpop.f32.mrf.mxu1 }
 0x78e   :  { %4426 = vtanh.f32 %v2925_v38  ;;  %v7273_v22 = vld [vmem:[#allocation95_spill] sm:$0xff] }
 0x78f   :  { %4428 = vtanh.f32 %v2923_v42 }
 0x790   :  { %4430 = vtanh.f32 %v2926_v16 }
 0x799   :  { %v4425_v60 = vpop.eup %4424 }
 0x79a   :  { %v2930_v13 = vmul.f32 0.5, %v4425_v60  ;;  %v7274_v60 = vld [vmem:[#allocation96_spill] sm:$0xff] }
 0x79b   :  { %v4427_v11 = vpop.eup %4426 }
 0x79c   :  { %v2933_v36 = vadd.f32 0.5, %v2930_v13  ;;  %v2931_v62 = vmul.f32 0.5, %v4427_v11  ;;  %v4429_v18 = vpop.eup %4428 }
 0x79d   :  { %v4431_v1 = vpop.eup %4430 }
 0x79e   :  { %v2934_v14 = vadd.f32 0.5, %v2931_v62  ;;  %v2938_v19 = vmul.f32 %v4429_v18, %v2933_v36  ;;  %v2932_v16 = vmul.f32 0.5, %v4431_v1  ;;  %v6386_v1 = vld [vmem:[#allocation7 + $0xc4] ss:$16 sps:$4 sm:$0xff]  }
 0x7a0   :  { %v2937_v7 = vmul.f32 %v2934_v14, %v6163_v12  ;;  %v2935_v14 = vadd.f32 0.5, %v2932_v16 }
 0x7a2   :  { %v6377_v20 = vadd.f32 %v2938_v19, %v2937_v7  ;;  %v7275_v19 = vld [vmem:[#allocation94_spill] sm:$0xff] }
 0x7a4   :  { %4432 = vtanh.f32 %v6377_v20 }
 0x7a7   :  { %v2980_v23 = vpop.f32.mrf.mxu0  ;;  %v3021_v10 = vpop.f32.mrf.mxu1 }
 0x7a8   :  { %v3028_v51 = vadd.f32 %v2980_v23, %v7272_v39  ;;  %v3030_v23 = vadd.f32 %v3021_v10, %v7275_v19 }
 0x7a9   :  { %v2982_v28 = vpop.f32.mrf.mxu0  ;;  %v3023_v38 = vpop.f32.mrf.mxu1 }
 0x7aa   :  { %v3032_v8 = vmul.f32 0.5, %v3028_v51  ;;  %v3029_v42 = vadd.f32 %v2982_v28, %v7273_v22  ;;  %v3031_v13 = vadd.f32 %v3023_v38, %v7274_v60  ;;  %v3034_v51 = vmul.f32 0.5, %v3030_v23  ;;  %v6389_v28 = vld [vmem:[#allocation7 + $0xcc] ss:$16 sps:$4 sm:$0xff]   ;;  %v6428_v23 = vld [vmem:[#allocation7 + $0x24] ss:$16 sps:$4 sm:$0xff]  }
 0x7ab   :  { %v2984_v11 = vpop.f32.mrf.mxu0  ;;  %v3025_v45 = vpop.f32.mrf.mxu1 }
 0x7ac   :  { %4434 = vtanh.f32 %v3032_v8  ;;  %v3033_v12 = vmul.f32 0.5, %v3029_v42 }
 0x7ad   :  { %v2985_v36 = vpop.f32.mrf.mxu0  ;;  %v3026_v62 = vpop.f32.mrf.mxu1 }
 0x7ae   :  { %4436 = vtanh.f32 %v3033_v12  ;;  %v6416_v36 = vld [vmem:[#allocation7 + $0x44] ss:$16 sps:$4 sm:$0xff]   ;;  %v6419_v62 = vld [vmem:[#allocation7 + $0x4c] ss:$16 sps:$4 sm:$0xff]  }
 0x7af   :  { %4438 = vtanh.f32 %v3031_v13  ;;  %v6410_v13 = vld [vmem:[#allocation7 + $0x60] ss:$16 sps:$4 sm:$0xff]  }
 0x7b0   :  { %4440 = vtanh.f32 %v3034_v51  ;;  %v6434_v51 = vld [vmem:[#allocation7 + $0x20] ss:$16 sps:$4 sm:$0xff]  }
 0x7b1   :  { %v4433_v18 = vpop.eup %4432 }
 0x7b2   :  { %v2941_v7 = vmul.f32 %v4433_v18, %v2935_v14  ;;  %v6422_v18 = vld [vmem:[#allocation7 + $0x40] ss:$16 sps:$4 sm:$0xff]  }
 0x7b4   :  { %v3050_v39 = vpack.c.bf16 %v2941_v7, %v2941_v7  ;;  %v6425_v7 = vld [vmem:[#allocation7 + $0x48] ss:$16 sps:$4 sm:$0xff]  }
 0x7b6   :  { %3084 = vmatmul.mubr.bf16.vlgmr.msra.gmra.mxu0 %v3050_v39  ;;  %3125 = vmatmul.mubr.bf16.vlgmr.msra.gmra.mxu1 %v3050_v39  ;;  %v6431_v39 = vld [vmem:[#allocation7 + $0x2c] ss:$16 sps:$4 sm:$0xff]  }
 0x7b7   :  { %3139 = vmatpush1.bf16.msra.mxu0 %v6170_v31  ;;  %3180 = vmatpush1.bf16.msra.mxu1 %v6173_v6 }
 0x7b8   :  { %3140 = vmatprep.subr.bf16.mxu0 %v6386_v1  ;;  %3181 = vmatprep.subr.bf16.mxu1 %v6389_v28 }
 0x7b9   :  { %v4435_v38 = vpop.eup %4434  ;;  %3170 = vmatprep.mubr.bf16.mxu0 %v6967_v29  ;;  %3211 = vmatprep.mubr.bf16.mxu1 %v6967_v29 }
 0x7ba   :  { %v3038_v10 = vmul.f32 0.5, %v4435_v38  ;;  %v6437_v38 = vld [vmem:[#allocation7 + $0x28] ss:$16 sps:$4 sm:$0xff]  }
 0x7bb   :  { %v4437_v8 = vpop.eup %4436  ;;  %3141 = vmatpush1.bf16.msra.mxu0 %v6180_v0  ;;  %3182 = vmatpush1.bf16.msra.mxu1 %v6183_v46 }
 0x7bc   :  { %v3041_v22 = vadd.f32 0.5, %v3038_v10  ;;  %v3039_v42 = vmul.f32 0.5, %v4437_v8  ;;  %3142 = vmatprep.subr.bf16.mxu0 %v6186_v52  ;;  %3183 = vmatprep.subr.bf16.mxu1 %v6189_v30  ;;  %v4439_v11 = vpop.eup %4438  ;;  %v6440_v8 = vld [vmem:[#allocation7 + $0x4] ss:$16 sps:$4 sm:$0xff]  }
 0x7bd   :  { %v4441_v14 = vpop.eup %4440 }
 0x7be   :  { %v3042_v45 = vadd.f32 0.5, %v3039_v42  ;;  %v3046_v16 = vmul.f32 %v4439_v11, %v3041_v22  ;;  %v3040_v19 = vmul.f32 0.5, %v4441_v14  ;;  %v6443_v22 = vld [vmem:[#allocation7 + $0xc] ss:$16 sps:$4 sm:$0xff]   ;;  %v7299_v14 = vld [vmem:[#allocation41_spill] sm:$0xff] }
 0x7bf   :  { %3143 = vmatpush1.bf16.msra.mxu0 %v6192_v56  ;;  %3184 = vmatpush1.bf16.msra.mxu1 %v6195_v63 }
 0x7c0   :  { %v3045_v12 = vmul.f32 %v3042_v45, %v6205_v55  ;;  %3144 = vmatprep.subr.bf16.mxu0 %v6199_v32  ;;  %3185 = vmatprep.subr.bf16.mxu1 %v6202_v43  ;;  %v6413_v55 = vld [vmem:[#allocation7 + $0x68] ss:$16 sps:$4 sm:$0xff]   ;;  %v3043_v10 = vadd.f32 0.5, %v3040_v19  ;;  %v6446_v45 = vld [vmem:[#allocation7] ss:$16 sps:$4 sm:$0xff]  }
 0x7c1   :  { %v7300_v19 = vld [vmem:[#allocation42_spill] sm:$0xff] }
 0x7c2   :  { %v6403_v60 = vadd.f32 %v3046_v16, %v3045_v12  ;;  %v6449_v16 = vld [vmem:[#allocation7 + $0x8] ss:$16 sps:$4 sm:$0xff]  }
 0x7c3   :  { %3145 = vmatpush1.bf16.msra.mxu0 %v6207_v4  ;;  %3186 = vmatpush1.bf16.msra.mxu1 %v6210_v5 }
 0x7c4   :  { %4442 = vtanh.f32 %v6403_v60  ;;  %3146 = vmatprep.subr.bf16.mxu0 %v6214_v53  ;;  %3187 = vmatprep.subr.bf16.mxu1 %v6217_v54 }
 0x7c7   :  { %3147 = vmatpush1.bf16.msra.mxu0 %v6410_v13  ;;  %3188 = vmatpush1.bf16.msra.mxu1 %v6413_v55 }
 0x7c8   :  { %3148 = vmatprep.subr.bf16.mxu0 %v6416_v36  ;;  %3189 = vmatprep.subr.bf16.mxu1 %v6419_v62 }
 0x7cb   :  { %3149 = vmatpush1.bf16.msra.mxu0 %v6422_v18  ;;  %3190 = vmatpush1.bf16.msra.mxu1 %v6425_v7 }
 0x7cc   :  { %3150 = vmatprep.subr.bf16.mxu0 %v6428_v23  ;;  %3191 = vmatprep.subr.bf16.mxu1 %v6431_v39 }
 0x7cf   :  { %3151 = vmatpush1.bf16.msra.mxu0 %v6434_v51  ;;  %3192 = vmatpush1.bf16.msra.mxu1 %v6437_v38 }
 0x7d0   :  { %3152 = vmatprep.subr.bf16.mxu0 %v6440_v8  ;;  %3193 = vmatprep.subr.bf16.mxu1 %v6443_v22 }
 0x7d1   :  { %v4443_v42 = vpop.eup %4442 }
 0x7d2   :  { %v3049_v11 = vmul.f32 %v4443_v42, %v3043_v10  ;;  %v7301_v10 = vld [vmem:[#allocation43_spill] sm:$0xff]  ;;  %v7302_v42 = vld [vmem:[#allocation44_spill] sm:$0xff] }
 0x7d3   :  { %3153 = vmatpush1.bf16.msra.mxu0 %v6446_v45  ;;  %3194 = vmatpush1.bf16.msra.mxu1 %v6449_v16 }
 0x7d4   :  { %3246 = vmatprep.subr.bf16.mxu0 %v6018_v15  ;;  %3287 = vmatprep.subr.bf16.mxu1 %v6021_v17  ;;  %v3137_v12 = vpack.c.bf16 %v3049_v11, %v3049_v11  ;;  %v7276_v15 = vld [vmem:[#allocation29_spill] sm:$0xff]  ;;  %v7277_v17 = vld [vmem:[#allocation26_spill] sm:$0xff] }
 0x7d5   :  { %v7303_v11 = vld [vmem:[#allocation45_spill] sm:$0xff] }
 0x7d6   :  { %3171 = vmatmul.mubr.bf16.vlgmr.msra.gmra.mxu0 %v3137_v12  ;;  %3212 = vmatmul.mubr.bf16.vlgmr.msra.gmra.mxu1 %v3137_v12 }
 0x7d7   :  { %3247 = vmatpush1.bf16.msra.mxu0 %v6028_v47  ;;  %3288 = vmatpush1.bf16.msra.mxu1 %v6031_v40  ;;  %v7278_v47 = vld [vmem:[#allocation31_spill] sm:$0xff]  ;;  %v7279_v40 = vld [vmem:[#allocation28_spill] sm:$0xff] }
 0x7d8   :  { %3248 = vmatprep.subr.bf16.mxu0 %v6034_v48  ;;  %3289 = vmatprep.subr.bf16.mxu1 %v6037_v21  ;;  %v7280_v48 = vld [vmem:[#allocation33_spill] sm:$0xff]  ;;  %v7281_v21 = vld [vmem:[#allocation30_spill] sm:$0xff] }
 0x7d9   :  { %3278 = vmatprep.mubr.bf16.mxu0 %v6967_v29  ;;  %3319 = vmatprep.mubr.bf16.mxu1 %v6967_v29 }
 0x7db   :  { %3249 = vmatpush1.bf16.msra.mxu0 %v6042_v2  ;;  %3290 = vmatpush1.bf16.msra.mxu1 %v6045_v44  ;;  %v7282_v2 = vld [vmem:[#allocation35_spill] sm:$0xff]  ;;  %v7283_v44 = vld [vmem:[#allocation32_spill] sm:$0xff] }
 0x7dc   :  { %3250 = vmatprep.subr.bf16.mxu0 %v6048_v50  ;;  %3291 = vmatprep.subr.bf16.mxu1 %v6051_v49  ;;  %v7284_v50 = vld [vmem:[#allocation36_spill] sm:$0xff]  ;;  %v7285_v49 = vld [vmem:[#allocation34_spill] sm:$0xff] }
 0x7df   :  { %3251 = vmatpush1.bf16.msra.mxu0 %v6054_v3  ;;  %3292 = vmatpush1.bf16.msra.mxu1 %v6057_v33  ;;  %v7286_v3 = vld [vmem:[#allocation37_spill] sm:$0xff]  ;;  %v7287_v33 = vld [vmem:[#allocation38_spill] sm:$0xff] }
 0x7e0   :  { %3252 = vmatprep.subr.bf16.mxu0 %v6060_v61  ;;  %3293 = vmatprep.subr.bf16.mxu1 %v6063_v9  ;;  %v7288_v61 = vld [vmem:[#allocation39_spill] sm:$0xff]  ;;  %v7289_v9 = vld [vmem:[#allocation70_spill] sm:$0xff] }
 0x7e3   :  { %3253 = vmatpush1.bf16.msra.mxu0 %v6066_v58  ;;  %3294 = vmatpush1.bf16.msra.mxu1 %v6069_v35  ;;  %v7290_v58 = vld [vmem:[#allocation75_spill] sm:$0xff]  ;;  %v7291_v35 = vld [vmem:[#allocation81_spill] sm:$0xff] }
 0x7e4   :  { %3254 = vmatprep.subr.bf16.mxu0 %v6072_v25  ;;  %3295 = vmatprep.subr.bf16.mxu1 %v6075_v59  ;;  %v7292_v25 = vld [vmem:[#allocation83_spill] sm:$0xff]  ;;  %v7293_v59 = vld [vmem:[#allocation84_spill] sm:$0xff] }
 0x7e7   :  { %3255 = vmatpush1.bf16.msra.mxu0 %v6078_v57  ;;  %3296 = vmatpush1.bf16.msra.mxu1 %v6081_v27  ;;  %v7294_v57 = vld [vmem:[#allocation82_spill] sm:$0xff]  ;;  %v7295_v27 = vld [vmem:[#allocation73_spill] sm:$0xff] }
 0x7e8   :  { %3256 = vmatprep.subr.bf16.mxu0 %v6084_v24  ;;  %3297 = vmatprep.subr.bf16.mxu1 %v7225_v37  ;;  %v7296_v24 = vld [vmem:[#allocation76_spill] sm:$0xff]  ;;  %v7297_v37 = vld [vmem:[#allocation74_spill] sm:$0xff] }
 0x7eb   :  { %3257 = vmatpush1.bf16.msra.mxu0 %v7226_v41  ;;  %3298 = vmatpush1.bf16.msra.mxu1 %v7276_v15  ;;  %v7298_v41 = vld [vmem:[#allocation40_spill] sm:$0xff]  ;;  %v7305_v15 = vld [vmem:[#allocation47_spill] sm:$0xff] }
 0x7ec   :  { %3258 = vmatprep.subr.bf16.mxu0 %v7277_v17  ;;  %3299 = vmatprep.subr.bf16.mxu1 %v7278_v47  ;;  %v7306_v17 = vld [vmem:[#allocation48_spill] sm:$0xff]  ;;  %v7307_v47 = vld [vmem:[#allocation49_spill] sm:$0xff] }
 0x7ef   :  { %3259 = vmatpush1.bf16.msra.mxu0 %v7279_v40  ;;  %3300 = vmatpush1.bf16.msra.mxu1 %v7280_v48  ;;  %v7308_v40 = vld [vmem:[#allocation50_spill] sm:$0xff]  ;;  %v7309_v48 = vld [vmem:[#allocation51_spill] sm:$0xff] }
 0x7f0   :  { %3260 = vmatprep.subr.bf16.mxu0 %v7281_v21  ;;  %3301 = vmatprep.subr.bf16.mxu1 %v7282_v2  ;;  %v7310_v21 = vld [vmem:[#allocation52_spill] sm:$0xff]  ;;  %v7311_v2 = vld [vmem:[#allocation85_spill] sm:$0xff] }
 0x7f3   :  { %3261 = vmatpush1.bf16.msra.mxu0 %v7283_v44  ;;  %3302 = vmatpush1.bf16.msra.mxu1 %v7284_v50  ;;  %v7312_v44 = vld [vmem:[#allocation87_spill] sm:$0xff]  ;;  %v7313_v50 = vld [vmem:[#allocation88_spill] sm:$0xff] }
 0x7f4   :  { %3351 = vmatprep.subr.bf16.mxu0 %v7285_v49  ;;  %3392 = vmatprep.subr.bf16.mxu1 %v7286_v3  ;;  %v7314_v49 = vld [vmem:[#allocation86_spill] sm:$0xff]  ;;  %v7315_v3 = vld [vmem:[#allocation53_spill] sm:$0xff] }
 0x7f6   :  { %3279 = vmatmul.mubr.bf16.vlgmr.msra.gmra.mxu0 %v3137_v12  ;;  %3320 = vmatmul.mubr.bf16.vlgmr.msra.gmra.mxu1 %v3137_v12  ;;  %v7304_v12 = vld [vmem:[#allocation46_spill] sm:$0xff] }
 0x7f7   :  { %3352 = vmatpush1.bf16.msra.mxu0 %v7287_v33  ;;  %3393 = vmatpush1.bf16.msra.mxu1 %v7288_v61  ;;  %v7316_v33 = vld [vmem:[#allocation54_spill] sm:$0xff]  ;;  %v7317_v61 = vld [vmem:[#allocation55_spill] sm:$0xff] }
 0x7f8   :  { %3353 = vmatprep.subr.bf16.mxu0 %v7289_v9  ;;  %3394 = vmatprep.subr.bf16.mxu1 %v7290_v58  ;;  %v7318_v9 = vld [vmem:[#allocation56_spill] sm:$0xff] }
 0x7f9   :  { %3383 = vmatprep.mubr.bf16.mxu0 %v6967_v29  ;;  %3424 = vmatprep.mubr.bf16.mxu1 %v6967_v29 }
 0x7fb   :  { %3354 = vmatpush1.bf16.msra.mxu0 %v7291_v35  ;;  %3395 = vmatpush1.bf16.msra.mxu1 %v7292_v25 }
 0x7fc   :  { %3355 = vmatprep.subr.bf16.mxu0 %v7293_v59  ;;  %3396 = vmatprep.subr.bf16.mxu1 %v7294_v57 }
 0x7ff   :  { %3356 = vmatpush1.bf16.msra.mxu0 %v7295_v27  ;;  %3397 = vmatpush1.bf16.msra.mxu1 %v7296_v24 }
 0x800   :  { %3357 = vmatprep.subr.bf16.mxu0 %v7297_v37  ;;  %3398 = vmatprep.subr.bf16.mxu1 %v7298_v41  ;;  %v7319_v41 = vld [vmem:[#allocation19_spill] sm:$0xff] }
 0x803   :  { %3358 = vmatpush1.bf16.msra.mxu0 %v7299_v14  ;;  %3399 = vmatpush1.bf16.msra.mxu1 %v7300_v19 }
 0x804   :  { %3359 = vmatprep.subr.bf16.mxu0 %v7301_v10  ;;  %3400 = vmatprep.subr.bf16.mxu1 %v7302_v42  ;;  %v7320_v42 = vld [vmem:[#allocation17_spill] sm:$0xff] }
 0x807   :  { %3360 = vmatpush1.bf16.msra.mxu0 %v7303_v11  ;;  %3401 = vmatpush1.bf16.msra.mxu1 %v7304_v12 }
 0x808   :  { %3361 = vmatprep.subr.bf16.mxu0 %v7305_v15  ;;  %3402 = vmatprep.subr.bf16.mxu1 %v7306_v17 }
 0x80b   :  { %3362 = vmatpush1.bf16.msra.mxu0 %v7307_v47  ;;  %3403 = vmatpush1.bf16.msra.mxu1 %v7308_v40 }
 0x80c   :  { %3363 = vmatprep.subr.bf16.mxu0 %v7309_v48  ;;  %3404 = vmatprep.subr.bf16.mxu1 %v7310_v21 }
 0x80f   :  { %3364 = vmatpush1.bf16.msra.mxu0 %v7311_v2  ;;  %3405 = vmatpush1.bf16.msra.mxu1 %v7312_v44 }
 0x810   :  { %3365 = vmatprep.subr.bf16.mxu0 %v7313_v50  ;;  %3406 = vmatprep.subr.bf16.mxu1 %v7314_v49 }
 0x813   :  { %3366 = vmatpush1.bf16.msra.mxu0 %v7315_v3  ;;  %3407 = vmatpush1.bf16.msra.mxu1 %v7316_v33 }
 0x814   :  { %3438 = vmatprep.subr.bf16.mxu0 %v7317_v61  ;;  %3479 = vmatprep.subr.bf16.mxu1 %v7318_v9 }
 0x876   :  { %v3085_v58 = vpop.f32.mrf.mxu0  ;;  %v3126_v35 = vpop.f32.mrf.mxu1 }
 0x877   :  { %v3133_v14 = vadd.f32 %v3085_v58, %v7319_v41  ;;  %v3135_v33 = vadd.f32 %v3126_v35, %v5418_v34 }
 0x878   :  { %v3087_v25 = vpop.f32.mrf.mxu0  ;;  %v3128_v59 = vpop.f32.mrf.mxu1 }
 0x879   :  { %v3134_v11 = vadd.f32 %v3087_v25, %v7320_v42  ;;  %v3136_v2 = vadd.f32 %v3128_v59, %v5412_v26 }
 0x87a   :  { %v3089_v57 = vpop.f32.mrf.mxu0  ;;  %v3130_v27 = vpop.f32.mrf.mxu1 }
 0x87c   :  { %v3090_v24 = vpop.f32.mrf.mxu0  ;;  %v3131_v37 = vpop.f32.mrf.mxu1 }
 0x896   :  { %v3172_v19 = vpop.f32.mrf.mxu0  ;;  %v3213_v10 = vpop.f32.mrf.mxu1 }
 0x897   :  { %v3220_v12 = vadd.f32 %v3172_v19, %v3133_v14  ;;  %v3222_v61 = vadd.f32 %v3213_v10, %v3135_v33 }
 0x898   :  { %v3174_v15 = vpop.f32.mrf.mxu0  ;;  %v3215_v17 = vpop.f32.mrf.mxu1 }
 0x899   :  { %v3224_v47 = vmul.f32 0.5, %v3220_v12  ;;  %v3221_v40 = vadd.f32 %v3174_v15, %v3134_v11  ;;  %v3223_v3 = vadd.f32 %v3215_v17, %v3136_v2  ;;  %v3226_v9 = vmul.f32 0.5, %v3222_v61  ;;  %v7321_v15 = vld [vmem:[#allocation97_spill] sm:$0xff] }
 0x89a   :  { %v3176_v48 = vpop.f32.mrf.mxu0  ;;  %v3217_v21 = vpop.f32.mrf.mxu1 }
 0x89b   :  { %4444 = vtanh.f32 %v3224_v47  ;;  %v3225_v44 = vmul.f32 0.5, %v3221_v40  ;;  %v7322_v21 = vld [vmem:[#allocation99_spill] sm:$0xff] }
 0x89c   :  { %v3177_v50 = vpop.f32.mrf.mxu0  ;;  %v3218_v49 = vpop.f32.mrf.mxu1 }
 0x89d   :  { %4446 = vtanh.f32 %v3225_v44 }
 0x89e   :  { %4448 = vtanh.f32 %v3223_v3  ;;  %v7323_v3 = vld [vmem:[#allocation100_spill] sm:$0xff] }
 0x89f   :  { %4450 = vtanh.f32 %v3226_v9 }
 0x8a8   :  { %v4445_v58 = vpop.eup %4444 }
 0x8a9   :  { %v3230_v25 = vmul.f32 0.5, %v4445_v58 }
 0x8aa   :  { %v4447_v57 = vpop.eup %4446 }
 0x8ab   :  { %v3233_v27 = vadd.f32 0.5, %v3230_v25  ;;  %v3231_v24 = vmul.f32 0.5, %v4447_v57  ;;  %v4449_v14 = vpop.eup %4448 }
 0x8ac   :  { %v4451_v17 = vpop.eup %4450 }
 0x8ad   :  { %v3234_v37 = vadd.f32 0.5, %v3231_v24  ;;  %v3238_v19 = vmul.f32 %v4449_v14, %v3233_v27  ;;  %v3232_v49 = vmul.f32 0.5, %v4451_v17  ;;  %v7324_v27 = vld [vmem:[#allocation98_spill] sm:$0xff]  ;;  %v4304_v17 = vld [vmem:[#allocation11 + $0x60] sm:$0xff]  }
 0x8af   :  { %v3237_v59 = vmul.f32 %v3234_v37, %v6377_v20  ;;  %v3235_v58 = vadd.f32 0.5, %v3232_v49 }
 0x8b1   :  { %v6527_v11 = vadd.f32 %v3238_v19, %v3237_v59 }
 0x8b3   :  { %4452 = vtanh.f32 %v6527_v11 }
 0x8b6   :  { %v3280_v12 = vpop.f32.mrf.mxu0  ;;  %v3321_v35 = vpop.f32.mrf.mxu1 }
 0x8b7   :  { %v3328_v10 = vadd.f32 %v3280_v12, %v7321_v15  ;;  %v3330_v24 = vadd.f32 %v3321_v35, %v7324_v27 }
 0x8b8   :  { %v3282_v47 = vpop.f32.mrf.mxu0  ;;  %v3323_v40 = vpop.f32.mrf.mxu1 }
 0x8b9   :  { %v3332_v48 = vmul.f32 0.5, %v3328_v10  ;;  %v3329_v2 = vadd.f32 %v3282_v47, %v7322_v21  ;;  %v3331_v33 = vadd.f32 %v3323_v40, %v7323_v3  ;;  %v3334_v14 = vmul.f32 0.5, %v3330_v24  ;;  %v4303_v10 = vld [vmem:[#allocation11 + $0x28] sm:$0xff]   ;;  %v4305_v47 = vld [vmem:[#allocation11 + $0x20] sm:$0xff]   ;;  %v4306_v40 = vld [vmem:[#allocation11 + $0x58] sm:$0xff]  }
 0x8ba   :  { %v3284_v44 = vpop.f32.mrf.mxu0  ;;  %v3325_v50 = vpop.f32.mrf.mxu1  ;;  %v4308_v21 = vld [vmem:[#allocation11 + $0x50] sm:$0xff]  }
 0x8bb   :  { %4454 = vtanh.f32 %v3332_v48  ;;  %v3333_v20 = vmul.f32 0.5, %v3329_v2  ;;  %v4307_v48 = vld [vmem:[#allocation11 + $0x18] sm:$0xff]   ;;  %v4309_v2 = vld [vmem:[#allocation11 + $0x10] sm:$0xff]  }
 0x8bc   :  { %v3285_v61 = vpop.f32.mrf.mxu0  ;;  %v3326_v9 = vpop.f32.mrf.mxu1 }
 0x8bd   :  { %4456 = vtanh.f32 %v3333_v20 }
 0x8be   :  { %4458 = vtanh.f32 %v3331_v33 }
 0x8bf   :  { %4460 = vtanh.f32 %v3334_v14 }
 0x8c0   :  { %v4453_v25 = vpop.eup %4452 }
 0x8c1   :  { %v3241_v57 = vmul.f32 %v4453_v25, %v3235_v58 }
 0x8c3   :  { %v3350_v37 = vpack.c.bf16 %v3241_v57, %v3241_v57 }
 0x8c5   :  { %3384 = vmatmul.mubr.bf16.vlgmr.msra.gmra.mxu0 %v3350_v37  ;;  %3425 = vmatmul.mubr.bf16.vlgmr.msra.gmra.mxu1 %v3350_v37 }
 0x8c6   :  { %3439 = vmatpush1.bf16.msra.mxu0 %v6170_v31  ;;  %3480 = vmatpush1.bf16.msra.mxu1 %v6173_v6 }
 0x8c7   :  { %3440 = vmatprep.subr.bf16.mxu0 %v6386_v1  ;;  %3481 = vmatprep.subr.bf16.mxu1 %v6389_v28 }
 0x8c8   :  { %v4455_v59 = vpop.eup %4454  ;;  %3470 = vmatprep.mubr.bf16.mxu0 %v6967_v29  ;;  %3511 = vmatprep.mubr.bf16.mxu1 %v6967_v29 }
 0x8c9   :  { %v3338_v19 = vmul.f32 0.5, %v4455_v59 }
 0x8ca   :  { %v4457_v12 = vpop.eup %4456  ;;  %3441 = vmatpush1.bf16.msra.mxu0 %v6180_v0  ;;  %3482 = vmatpush1.bf16.msra.mxu1 %v6183_v46 }
 0x8cb   :  { %v3341_v35 = vadd.f32 0.5, %v3338_v19  ;;  %v3339_v31 = vmul.f32 0.5, %v4457_v12  ;;  %3442 = vmatprep.subr.bf16.mxu0 %v6186_v52  ;;  %3483 = vmatprep.subr.bf16.mxu1 %v6189_v30  ;;  %v4459_v6 = vpop.eup %4458 }
 0x8cc   :  { %v4461_v46 = vpop.eup %4460 }
 0x8cd   :  { %v3342_v1 = vadd.f32 0.5, %v3339_v31  ;;  %v3346_v28 = vmul.f32 %v4459_v6, %v3341_v35  ;;  %v3340_v52 = vmul.f32 0.5, %v4461_v46 }
 0x8ce   :  { %3443 = vmatpush1.bf16.msra.mxu0 %v6192_v56  ;;  %3484 = vmatpush1.bf16.msra.mxu1 %v6195_v63 }
 0x8cf   :  { %v3345_v15 = vmul.f32 %v3342_v1, %v6403_v60  ;;  %3444 = vmatprep.subr.bf16.mxu0 %v6199_v32  ;;  %3485 = vmatprep.subr.bf16.mxu1 %v6202_v43  ;;  %v3343_v30 = vadd.f32 0.5, %v3340_v52  ;;  %v4276_v43 = vld [vmem:[#allocation10 + $0x74] ss:$8 sps:$4 sm:$0xff]   ;;  %v4280_v60 = vld [vmem:[#allocation10 + $0x50] ss:$8 sps:$4 sm:$0xff]  }
 0x8d1   :  { %v3347_v0 = vadd.f32 %v3346_v28, %v3345_v15 }
 0x8d2   :  { %3445 = vmatpush1.bf16.msra.mxu0 %v6207_v4  ;;  %3486 = vmatpush1.bf16.msra.mxu1 %v6210_v5  ;;  %v4274_v4 = vld [vmem:[#allocation10 + $0x70] ss:$8 sps:$4 sm:$0xff]   ;;  %v4279_v5 = vld [vmem:[#allocation10 + $0x64] ss:$8 sps:$4 sm:$0xff]  }
 0x8d3   :  { %4462 = vtanh.f32 %v3347_v0  ;;  %3446 = vmatprep.subr.bf16.mxu0 %v6214_v53  ;;  %3487 = vmatprep.subr.bf16.mxu1 %v6217_v54  ;;  %v4277_v53 = vld [vmem:[#allocation10 + $0x60] ss:$8 sps:$4 sm:$0xff]   ;;  %v4282_v54 = vld [vmem:[#allocation10 + $0x54] ss:$8 sps:$4 sm:$0xff]  }
 0x8d6   :  { %3447 = vmatpush1.bf16.msra.mxu0 %v6410_v13  ;;  %3488 = vmatpush1.bf16.msra.mxu1 %v6413_v55  ;;  %v4285_v13 = vld [vmem:[#allocation10 + $0x44] ss:$8 sps:$4 sm:$0xff]   ;;  %v4283_v55 = vld [vmem:[#allocation10 + $0x40] ss:$8 sps:$4 sm:$0xff]  }
 0x8d7   :  { %3448 = vmatprep.subr.bf16.mxu0 %v6416_v36  ;;  %3489 = vmatprep.subr.bf16.mxu1 %v6419_v62  ;;  %v4288_v36 = vld [vmem:[#allocation10 + $0x34] ss:$8 sps:$4 sm:$0xff]   ;;  %v4286_v62 = vld [vmem:[#allocation10 + $0x30] ss:$8 sps:$4 sm:$0xff]  }
 0x8da   :  { %3449 = vmatpush1.bf16.msra.mxu0 %v6422_v18  ;;  %3490 = vmatpush1.bf16.msra.mxu1 %v6425_v7  ;;  %v4289_v18 = vld [vmem:[#allocation10 + $0x20] ss:$8 sps:$4 sm:$0xff]   ;;  %v4294_v7 = vld [vmem:[#allocation10 + $0x14] ss:$8 sps:$4 sm:$0xff]  }
 0x8db   :  { %3450 = vmatprep.subr.bf16.mxu0 %v6428_v23  ;;  %3491 = vmatprep.subr.bf16.mxu1 %v6431_v39  ;;  %v4292_v23 = vld [vmem:[#allocation10 + $0x10] ss:$8 sps:$4 sm:$0xff]   ;;  %v4297_v39 = vld [vmem:[#allocation10 + $0x4] ss:$8 sps:$4 sm:$0xff]  }
 0x8de   :  { %3451 = vmatpush1.bf16.msra.mxu0 %v6434_v51  ;;  %3492 = vmatpush1.bf16.msra.mxu1 %v6437_v38  ;;  %v4295_v51 = vld [vmem:[#allocation10] ss:$8 sps:$4 sm:$0xff]   ;;  %v4298_v38 = vld [vmem:[#allocation11 + $0x78] sm:$0xff]  }
 0x8df   :  { %3452 = vmatprep.subr.bf16.mxu0 %v6440_v8  ;;  %3493 = vmatprep.subr.bf16.mxu1 %v6443_v22  ;;  %v4299_v8 = vld [vmem:[#allocation11 + $0x38] sm:$0xff]   ;;  %v4300_v22 = vld [vmem:[#allocation11 + $0x70] sm:$0xff]  }
 0x8e0   :  { %v4463_v56 = vpop.eup %4462 }
 0x8e1   :  { %v3349_v63 = vmul.f32 %v4463_v56, %v3343_v30 }
 0x8e2   :  { %3453 = vmatpush1.bf16.msra.mxu0 %v6446_v45  ;;  %3494 = vmatpush1.bf16.msra.mxu1 %v6449_v16  ;;  %v4301_v45 = vld [vmem:[#allocation11 + $0x30] sm:$0xff]   ;;  %v4302_v16 = vld [vmem:[#allocation11 + $0x68] sm:$0xff]  }
 0x8e3   :  { %v3437_v32 = vpack.c.bf16 %v3349_v63, %v3349_v63  ;;  %3651 = vmatprep.subr.bf16.mxu0 %v4276_v43  ;;  %4043 = vmatprep.subr.bf16.mxu1 %v4298_v38 }
 0x8e5   :  { %3471 = vmatmul.mubr.bf16.vlgmr.msra.gmra.mxu0 %v3437_v32  ;;  %3512 = vmatmul.mubr.bf16.vlgmr.msra.gmra.mxu1 %v3437_v32 }
 0x8e6   :  { %3683 = vmatprep.mubr.bf16.mxu0 %v6967_v29  ;;  %3652 = vmatpush1.bf16.msra.mxu0 %v4274_v4  ;;  %v4291_v29 = vld [vmem:[#allocation10 + $0x24] ss:$8 sps:$4 sm:$0xff]  }
 0x8e7   :  { %3653 = vmatprep.subr.bf16.mxu0 %v4279_v5  ;;  %4044 = vmatpush3.bf16.msra.mxu1 %v4299_v8 }
 0x8e8   :  { %4045 = vmatprep.subr.bf16.mxu1 %v4300_v22 }
 0x8ea   :  { %3654 = vmatpush1.bf16.msra.mxu0 %v4277_v53 }
 0x8eb   :  { %3655 = vmatprep.subr.bf16.mxu0 %v4282_v54  ;;  %4046 = vmatpush3.bf16.msra.mxu1 %v4301_v45 }
 0x8ec   :  { %4047 = vmatprep.subr.bf16.mxu1 %v4302_v16 }
 0x8ee   :  { %3656 = vmatpush1.bf16.msra.mxu0 %v4280_v60 }
 0x8ef   :  { %3657 = vmatprep.subr.bf16.mxu0 %v4285_v13  ;;  %4048 = vmatpush3.bf16.msra.mxu1 %v4303_v10 }
 0x8f0   :  { %4049 = vmatprep.subr.bf16.mxu1 %v4304_v17 }
 0x8f2   :  { %3658 = vmatpush1.bf16.msra.mxu0 %v4283_v55 }
 0x8f3   :  { %3659 = vmatprep.subr.bf16.mxu0 %v4288_v36  ;;  %4050 = vmatpush3.bf16.msra.mxu1 %v4305_v47  ;;  %v4310_v36 = vld [vmem:[#allocation11 + $0x48] sm:$0xff]  }
 0x8f4   :  { %4051 = vmatprep.subr.bf16.mxu1 %v4306_v40 }
 0x8f6   :  { %3660 = vmatpush1.bf16.msra.mxu0 %v4286_v62  ;;  %v4311_v62 = vld [vmem:[#allocation11 + $0x8] sm:$0xff]  }
 0x8f7   :  { %3661 = vmatprep.subr.bf16.mxu0 %v4291_v29  ;;  %4052 = vmatpush3.bf16.msra.mxu1 %v4307_v48  ;;  %v4312_v29 = vld [vmem:[#allocation11 + $0x40] sm:$0xff]  }
 0x8f8   :  { %4053 = vmatprep.subr.bf16.mxu1 %v4308_v21  ;;  %v4026_v48 = vld [vmem:[%s6594_s10] ss:$0 sm:$0xff] }
 0x8fa   :  { %3662 = vmatpush1.bf16.msra.mxu0 %v4289_v18  ;;  %v4313_v18 = vld [vmem:[#allocation11] sm:$0xff]  }
 0x8fb   :  { %3663 = vmatprep.subr.bf16.mxu0 %v4294_v7  ;;  %4054 = vmatpush3.bf16.msra.mxu1 %v4309_v2  ;;  %v7325_v7 = vld [vmem:[#allocation71_spill] sm:$0xff] }
 0x8fc   :  { %4055 = vmatprep.subr.bf16.mxu1 %v4310_v36 }
 0x8fe   :  { %3664 = vmatpush1.bf16.msra.mxu0 %v4292_v23 }
 0x8ff   :  { %3665 = vmatprep.subr.bf16.mxu0 %v4297_v39  ;;  %4056 = vmatpush3.bf16.msra.mxu1 %v4311_v62  ;;  %v7326_v39 = vld [vmem:[#allocation72_spill] sm:$0xff] }
 0x900   :  { %4057 = vmatprep.subr.bf16.mxu1 %v4312_v29 }
 0x902   :  { %3666 = vmatpush1.bf16.msra.mxu0 %v4295_v51 }
 0x903   :  { %4058 = vmatpush3.bf16.msra.mxu1 %v4313_v18 }
 0x985   :  { %v3385_v44 = vpop.f32.mrf.mxu0  ;;  %v3426_v50 = vpop.f32.mrf.mxu1 }
 0x986   :  { %v3433_v58 = vadd.f32 %v3385_v44, %v7319_v41  ;;  %v3435_v41 = vadd.f32 %v3426_v50, %v5418_v34 }
 0x987   :  { %v3387_v49 = vpop.f32.mrf.mxu0  ;;  %v3428_v20 = vpop.f32.mrf.mxu1 }
 0x988   :  { %v3434_v27 = vadd.f32 %v3387_v49, %v7320_v42  ;;  %v3436_v31 = vadd.f32 %v3428_v20, %v5412_v26 }
 0x989   :  { %v3389_v3 = vpop.f32.mrf.mxu0  ;;  %v3430_v33 = vpop.f32.mrf.mxu1 }
 0x98b   :  { %v3390_v61 = vpop.f32.mrf.mxu0  ;;  %v3431_v9 = vpop.f32.mrf.mxu1 }
 0x9a5   :  { %v3472_v25 = vpop.f32.mrf.mxu0  ;;  %v3513_v57 = vpop.f32.mrf.mxu1 }
 0x9a6   :  { %v3520_v24 = vadd.f32 %v3472_v25, %v3433_v58  ;;  %v3522_v0 = vadd.f32 %v3513_v57, %v3435_v41 }
 0x9a7   :  { %v3474_v37 = vpop.f32.mrf.mxu0  ;;  %v3515_v14 = vpop.f32.mrf.mxu1 }
 0x9a8   :  { %v3524_v59 = vmul.f32 0.5, %v3520_v24  ;;  %v3521_v19 = vadd.f32 %v3474_v37, %v3434_v27  ;;  %v3523_v15 = vadd.f32 %v3515_v14, %v3436_v31  ;;  %v3526_v42 = vmul.f32 0.5, %v3522_v0 }
 0x9a9   :  { %v3476_v12 = vpop.f32.mrf.mxu0  ;;  %v3517_v35 = vpop.f32.mrf.mxu1 }
 0x9aa   :  { %4464 = vtanh.f32 %v3524_v59  ;;  %v3525_v6 = vmul.f32 0.5, %v3521_v19 }
 0x9ab   :  { %v3477_v1 = vpop.f32.mrf.mxu0  ;;  %v3518_v28 = vpop.f32.mrf.mxu1 }
 0x9ac   :  { %4466 = vtanh.f32 %v3525_v6 }
 0x9ad   :  { %4468 = vtanh.f32 %v3523_v15 }
 0x9ae   :  { %4470 = vtanh.f32 %v3526_v42 }
 0x9b7   :  { %v4465_v46 = vpop.eup %4464 }
 0x9b8   :  { %v3530_v52 = vmul.f32 0.5, %v4465_v46 }
 0x9b9   :  { %v4467_v30 = vpop.eup %4466 }
 0x9ba   :  { %v3533_v56 = vadd.f32 0.5, %v3530_v52  ;;  %v3531_v63 = vmul.f32 0.5, %v4467_v30  ;;  %v4469_v43 = vpop.eup %4468 }
 0x9bb   :  { %v4471_v53 = vpop.eup %4470 }
 0x9bc   :  { %v3534_v32 = vadd.f32 0.5, %v3531_v63  ;;  %v3538_v4 = vmul.f32 %v4469_v43, %v3533_v56  ;;  %v3532_v54 = vmul.f32 0.5, %v4471_v53 }
 0x9be   :  { %v3537_v26 = vmul.f32 %v3534_v32, %v6527_v11  ;;  %v3535_v60 = vadd.f32 0.5, %v3532_v54  ;;  %v3559_v11 = vld [vmem:[%s6592_s8] sm:$0x3] }
 0x9bf   :  { %v3564_v23 = vrot.slane %v3559_v11, %v7325_v7  ;;  %v3568_v51 = vrot.slane %v3559_v11, %v7326_v39 }
 0x9c0   :  { %v3539_v5 = vadd.f32 %v3538_v4, %v3537_v26 }
 0x9c2   :  { %4472 = vtanh.f32 %v3539_v5 }
 0x9cf   :  { %v4473_v34 = vpop.eup %4472 }
 0x9d0   :  { %v3541_v13 = vmul.f32 %v4473_v34, %v3535_v60 }
 0x9d2   :  { %v3542_v55 = vpack.c.bf16 %v3541_v13, %v3541_v13 }
 0x9d4   :  { %3684 = vmatmul.mubr.bf16.vlgmr.msra.gmra.mxu0 %v3542_v55 }
 0xa94   :  { %v3685_v38 = vpop.f32.mrf.mxu0 }
 0xa95   :  { %v3686_v8 = vadd.f32 %v3685_v38, %v3564_v23 }
 0xa96   :  { %v3687_v22 = vpop.f32.mrf.mxu0 }
 0xa97   :  { %v3688_v45 = vadd.f32 %v3687_v22, %v3568_v51  ;;  %v3692_v17 = vpack.c.bf16 %v3686_v8, %v3686_v8 }
 0xa98   :  { %v3689_v16 = vpop.f32.mrf.mxu0 }
 0xa99   :  { %v3693_v10 = vpack.c.bf16 %v3688_v45, %v3688_v45 }
 0xa9a   :  { %v3690_v47 = vpop.f32.mrf.mxu0 }
 0xa9b   :  { %3861 = vmatprep.mubr.bf16.mxu1 %v3693_v10 }
 0xa9c   :  { %3862 = vmatmul.mubr.bf16.vlgmr.msra.gmra.mxu1 %v3692_v17 }
 0xb5c   :  { %v4059_v40 = vpop.f32.mrf.mxu1 }
 0xb5e   :  { %v4060_v21 = vpop.f32.mrf.mxu1 }
 0xb5f   :  { %v4061_v2 = vadd.f32 %v4060_v21, %v4059_v40 }
 0xb60   :  { %v4062_v44 = vpop.f32.mrf.mxu1 }
 0xb61   :  { %v3864_v50 = vadd.f32 %v4061_v2, %v4026_v48 }
 0xb62   :  { %v4063_v49 = vpop.f32.mrf.mxu1 }
 0xb63   :  { %3869 = vst [vmem:[%s6595_s11] sm:$0xff] %v3864_v50 }
 0xb64   :  { %3874 = vsyncpa [#allocation4], 1 }
 0xb65   :  { %3875 = vsyncpa [#allocation6], 1 }
 0xb66   :  { %3876 = vsyncpa [#allocation9], 1 }
 0xb67   :  { %3877 = vsyncpa [#allocation12], 1 }

</bundles_post_ra>
